<compile_context>
chip_gen: v6e
topology: v6e:2x2x1
jax: 0.10.0
libtpu: 0.0.40
codegen_flags: <defaults>
</compile_context>

<pallas_src>
import numpy as np
import jax
import jax.numpy as jnp
from jax import lax
from jax.experimental import pallas as pl
from jax.experimental.pallas import tpu as pltpu


# ----------------------------------------------------------------------------
# Fused BasicBlock kernel (one grid step == one image of the batch)
# ----------------------------------------------------------------------------
def _make_basic_block_kernel(H, W, Cout, has_downsample):
    """conv1(3x3)+bn1+relu -> conv2(3x3)+bn2 -> (+ fused 1x1-conv downsample /
    identity) residual add -> relu, all in one kernel.  Weights are pre-packed
    as (9*Cin, N) with BN scale folded in, so each conv is one MXU matmul."""

    def kernel(x_ref, wc_ref, b1_ref, w2_ref, b2_ref, *rest):
        if has_downsample:
            bd_ref, o_ref, xpad_ref, ypad_ref = rest
        else:
            o_ref, xpad_ref, ypad_ref = rest

        Cin = x_ref.shape[3]
        M = H * W

        # ---- build the zero-halo'd input tile in VMEM (pad fused in-kernel).
        # Only the 1-pixel halo ring is zeroed; the interior is overwritten.
        zr = jnp.zeros((1, 1, W + 2, Cin), jnp.bfloat16)
        zc = jnp.zeros((1, H + 2, 1, Cin), jnp.bfloat16)
        xpad_ref[:, 0:1, :, :] = zr
        xpad_ref[:, H + 1:H + 2, :, :] = zr
        xpad_ref[:, :, 0:1, :] = zc
        xpad_ref[:, :, W + 1:W + 2, :] = zc
        xpad_ref[:, 1:1 + H, 1:1 + W, :] = x_ref[...]
        xp = xpad_ref[...]                                 # (1, H+2, W+2, Cin) bf16

        # ---- conv1 (+ fused 1x1 downsample columns): ONE MXU matmul.
        # 9 taps folded into the contraction dim; N = 2*Cout when downsampling.
        t1 = jnp.concatenate(
            [xp[:, dy:dy + H, dx:dx + W, :] for dy in range(3) for dx in range(3)],
            axis=-1).reshape(M, 9 * Cin)
        ycat = jnp.dot(t1, wc_ref[...], preferred_element_type=jnp.float32)
        if has_downsample:
            y1 = jnp.maximum(ycat[:, :Cout] + b1_ref[...], 0.0)   # bn1 + ReLU
            res = ycat[:, Cout:] + bd_ref[...]                    # 1x1 conv + bn_d
        else:
            y1 = jnp.maximum(ycat + b1_ref[...], 0.0)             # bn1 + ReLU
            res = xp[:, 1:1 + H, 1:1 + W, :].reshape(M, Cin).astype(jnp.float32)

        # ---- re-pad the (bf16) intermediate in VMEM scratch for conv2.
        zr2 = jnp.zeros((1, 1, W + 2, Cout), jnp.bfloat16)
        zc2 = jnp.zeros((1, H + 2, 1, Cout), jnp.bfloat16)
        ypad_ref[:, 0:1, :, :] = zr2
        ypad_ref[:, H + 1:H + 2, :, :] = zr2
        ypad_ref[:, :, 0:1, :] = zc2
        ypad_ref[:, :, W + 1:W + 2, :] = zc2
        ypad_ref[:, 1:1 + H, 1:1 + W, :] = (
            y1.astype(jnp.bfloat16).reshape(1, H, W, Cout))
        yp = ypad_ref[...]                                 # (1, H+2, W+2, Cout) bf16

        # ---- conv2: ONE MXU matmul over the 9*Cout contraction, bn2 bias.
        t2 = jnp.concatenate(
            [yp[:, dy:dy + H, dx:dx + W, :] for dy in range(3) for dx in range(3)],
            axis=-1).reshape(M, 9 * Cout)
        y2 = jnp.dot(t2, w2_ref[...], preferred_element_type=jnp.float32) + b2_ref[...]

        # ---- residual add + final ReLU, lane-dense (…,128) store.
        o_ref[...] = jnp.maximum(y2 + res, 0.0).reshape(1, H, W, Cout)

    return kernel


# ----------------------------------------------------------------------------
# Parameter packing: fold BN scale into conv weights, fuse 1x1 downsample
# into the conv1 weight (center tap), cast to bf16.  Done once, outside jit.
# ----------------------------------------------------------------------------
def prepare_params(params):
    _, Cin, Cout = params["w1"].shape
    w1s = params["w1"] * params["s1"]                       # (9, Cin, Cout), f32
    if "wd" in params:
        wds = params["wd"] * params["sd"]                   # (Cin, Cout)
        wde = jnp.zeros((9, Cin, Cout), jnp.float32).at[4].set(wds)   # center tap
        wc = jnp.concatenate([w1s, wde], axis=-1)           # (9, Cin, 2*Cout)
    else:
        wc = w1s
    packed = {
        "wc": wc.reshape(9 * Cin, -1).astype(jnp.bfloat16),
        "b1": params["b1"].reshape(1, Cout).astype(jnp.float32),
        "w2": (params["w2"] * params["s2"]).reshape(9 * Cout, Cout).astype(jnp.bfloat16),
        "b2": params["b2"].reshape(1, Cout).astype(jnp.float32),
    }
    if "wd" in params:
        packed["bd"] = params["bd"].reshape(1, Cout).astype(jnp.float32)
    return packed


# ----------------------------------------------------------------------------
# Wrapper
# ----------------------------------------------------------------------------
@jax.jit
def basic_block_pallas(x_nchw, packed):
    """x_nchw: (B, Cin, H, W) float32 -> (B, Cout, H, W) float32."""
    B, Cin, H, W = x_nchw.shape
    Cout = packed["w2"].shape[1]
    has_ds = "bd" in packed
    if not has_ds:
        assert Cin == Cout, "identity residual requires Cin == Cout"

    # channels-last, bf16 for the MXU; the zero-pad halo is built in-kernel.
    x = jnp.transpose(x_nchw, (0, 2, 3, 1)).astype(jnp.bfloat16)

    def const_spec(shape):
        nd = len(shape)
        return pl.BlockSpec(shape, lambda b, _nd=nd: (0,) * _nd)

    args = [x, packed["wc"], packed["b1"], packed["w2"], packed["b2"]]
    in_specs = [pl.BlockSpec((1, H, W, Cin), lambda b: (b, 0, 0, 0))]
    in_specs += [const_spec(a.shape) for a in args[1:]]
    if has_ds:
        args.append(packed["bd"])
        in_specs.append(const_spec(packed["bd"].shape))

    out = pl.pallas_call(
        _make_basic_block_kernel(H, W, Cout, has_ds),
        out_shape=jax.ShapeDtypeStruct((B, H, W, Cout), jnp.float32),
        grid=(B,),
        in_specs=in_specs,
        out_specs=pl.BlockSpec((1, H, W, Cout), lambda b: (b, 0, 0, 0)),
        scratch_shapes=[pltpu.VMEM((1, H + 2, W + 2, Cin), jnp.bfloat16),
                        pltpu.VMEM((1, H + 2, W + 2, Cout), jnp.bfloat16)],
        compiler_params=pltpu.CompilerParams(
            dimension_semantics=("parallel",),          # per-image independence
            vmem_limit_bytes=48 * 1024 * 1024),         # safe on v5e/v6e/v7x
    )(*args)

    return jnp.transpose(out, (0, 3, 1, 2))


# ----------------------------------------------------------------------------
# Deterministic synthetic parameters (eval-mode BN folded to scale/bias)
# ----------------------------------------------------------------------------
def make_block_params(key, cin, cout, downsample, eps=1e-5):
    rng = [key]

    def nxt():
        rng[0], sub = jax.random.split(rng[0])
        return sub

    def normal(shape, std):
        return std * jax.random.normal(nxt(), shape, jnp.float32)

    def bn_fold(c):
        gamma = 1.0 + normal((c,), 0.1)
        beta = normal((c,), 0.1)
        mean = normal((c,), 0.1)
        var = 0.5 + jax.random.uniform(nxt(), (c,), jnp.float32)
        scale = gamma / jnp.sqrt(var + eps)
        return scale, beta - mean * scale

    # conv taps packed (dy-major, dx-minor): shape (9, Cin, Cout), f32.
    p = {"w1": normal((9, cin, cout), 1.0 / np.sqrt(9 * cin)),
         "w2": normal((9, cout, cout), 1.0 / np.sqrt(9 * cout))}
    p["s1"], p["b1"] = bn_fold(cout)
    p["s2"], p["b2"] = bn_fold(cout)
    if downsample:
        p["wd"] = normal((cin, cout), 1.0 / np.sqrt(cin))   # 1x1 conv
        p["sd"], p["bd"] = bn_fold(cout)
    return p


# ----------------------------------------------------------------------------
# Pure-JAX reference (f32, HIGHEST precision) for correctness
# ----------------------------------------------------------------------------
def basic_block_ref(x_nchw, params):
    B, Cin, H, W = x_nchw.shape
    Cout = params["w1"].shape[2]
    # match the kernel's bf16 input/weight quantization; do the math in f32
    x = jnp.transpose(x_nchw, (0, 2, 3, 1)).astype(jnp.bfloat16).astype(jnp.float32)

    def q(w):
        return w.astype(jnp.bfloat16).astype(jnp.float32)

    def conv3(v, w9, ci, co):
        w = q(w9).reshape(3, 3, ci, co)                      # HWIO
        return lax.conv_general_dilated(
            v, w, (1, 1), "SAME",
            dimension_numbers=("NHWC", "HWIO", "NHWC"),
            precision=lax.Precision.HIGHEST)

    out = conv3(x, params["w1"], Cin, Cout) * params["s1"] + params["b1"]
    out = jnp.maximum(out, 0.0)
    out = conv3(out, params["w2"], Cout, Cout) * params["s2"] + params["b2"]
    if "wd" in params:
        res = jnp.einsum("bhwc,cd->bhwd", x, q(params["wd"]),
                         precision=lax.Precision.HIGHEST)
        res = res * params["sd"] + params["bd"]
    else:
        res = x
    out = jnp.maximum(out + res, 0.0)
    return jnp.transpose(out, (0, 3, 1, 2))


# ----------------------------------------------------------------------------
if __name__ == "__main__":
    key = jax.random.PRNGKey(0)
    kp, kx = jax.random.split(key)
    B, H, W = 2, 16, 16

    # case 1: first block of a stage -> channel change, 1x1-conv+BN downsample
    cin, cout = 64, 128
    params_ds = make_block_params(kp, cin, cout, downsample=True)
    packed_ds = prepare_params(params_ds)
    x1 = jax.random.normal(kx, (B, cin, H, W), jnp.float32)
    out1 = jax.block_until_ready(basic_block_pallas(x1, packed_ds))
    ref1 = basic_block_ref(x1, params_ds)
    np.testing.assert_allclose(np.asarray(out1), np.asarray(ref1),
                               rtol=2e-2, atol=5e-2)   # bf16-MXU tolerance

    # case 2: identity-residual block (downsample=None)
    kp2, kx2 = jax.random.split(kp)
    params_id = make_block_params(kp2, cout, cout, downsample=False)
    packed_id = prepare_params(params_id)
    x2 = jax.random.normal(kx2, (B, cout, H, W), jnp.float32)
    out2 = jax.block_until_ready(basic_block_pallas(x2, packed_id))
    ref2 = basic_block_ref(x2, params_id)
    np.testing.assert_allclose(np.asarray(out2), np.asarray(ref2),
                               rtol=2e-2, atol=5e-2)

    print("KERNEL_OK")
</pallas_src>

<mosaic_0001>
module attributes {stable_mosaic.version = 11 : i64} {
  func.func @kernel(%arg0: i32, %arg1: memref<1x16x16x64xbf16, #tpu.memory_space<vmem>>, %arg2: memref<576x256xbf16, #tpu.memory_space<vmem>>, %arg3: memref<1x128xf32, #tpu.memory_space<vmem>>, %arg4: memref<1152x128xbf16, #tpu.memory_space<vmem>>, %arg5: memref<1x128xf32, #tpu.memory_space<vmem>>, %arg6: memref<1x128xf32, #tpu.memory_space<vmem>>, %arg7: memref<1x16x16x128xf32, #tpu.memory_space<vmem>>, %arg8: memref<1x18x18x64xbf16, #tpu.memory_space<vmem>>, %arg9: memref<1x18x18x128xbf16, #tpu.memory_space<vmem>>) attributes {dimension_semantics = [#tpu.dimension_semantics<parallel>], iteration_bounds = array<i64: 2>, scalar_prefetch = 0 : i64, scratch_operands = 2 : i64, tpu.core_type = #tpu.core_type<tc>, window_params = [{transform_indices = @transform_0, window_bounds = array<i64: 1, 16, 16, 64>}, {pipeline_mode = #tpu.pipeline_mode<synchronous>, transform_indices = @transform_1, window_bounds = array<i64: 576, 256>}, {pipeline_mode = #tpu.pipeline_mode<synchronous>, transform_indices = @transform_2, window_bounds = array<i64: 1, 128>}, {pipeline_mode = #tpu.pipeline_mode<synchronous>, transform_indices = @transform_3, window_bounds = array<i64: 1152, 128>}, {pipeline_mode = #tpu.pipeline_mode<synchronous>, transform_indices = @transform_4, window_bounds = array<i64: 1, 128>}, {pipeline_mode = #tpu.pipeline_mode<synchronous>, transform_indices = @transform_5, window_bounds = array<i64: 1, 128>}, {transform_indices = @transform_6, window_bounds = array<i64: 1, 16, 16, 128>}]} {
    %cst = arith.constant 0.000000e+00 : bf16
    %0 = vector.broadcast %cst : bf16 to vector<1x1x18x64xbf16>
    %cst_0 = arith.constant 0.000000e+00 : bf16
    %1 = vector.broadcast %cst_0 : bf16 to vector<1x18x1x64xbf16>
    %c0 = arith.constant 0 : index
    %c0_1 = arith.constant 0 : index
    %c0_2 = arith.constant 0 : index
    %c0_3 = arith.constant 0 : index
    %2 = vector.load %arg8[%c0, %c0_1, %c0_2, %c0_3] : memref<1x18x18x64xbf16, #tpu.memory_space<vmem>>, vector<1x1x18x64xbf16>
    tpu.vector_store %arg8[%c0, %c0_1, %c0_2, %c0_3], %0 {strides = array<i32>} : memref<1x18x18x64xbf16, #tpu.memory_space<vmem>>, vector<1x1x18x64xbf16>,
    %c0_4 = arith.constant 0 : index
    %c17 = arith.constant 17 : index
    %c0_5 = arith.constant 0 : index
    %c0_6 = arith.constant 0 : index
    %3 = vector.load %arg8[%c0_4, %c17, %c0_5, %c0_6] : memref<1x18x18x64xbf16, #tpu.memory_space<vmem>>, vector<1x1x18x64xbf16>
    tpu.vector_store %arg8[%c0_4, %c17, %c0_5, %c0_6], %0 {strides = array<i32>} : memref<1x18x18x64xbf16, #tpu.memory_space<vmem>>, vector<1x1x18x64xbf16>,
    %c0_7 = arith.constant 0 : index
    %c0_8 = arith.constant 0 : index
    %c0_9 = arith.constant 0 : index
    %c0_10 = arith.constant 0 : index
    %4 = vector.load %arg8[%c0_7, %c0_8, %c0_9, %c0_10] : memref<1x18x18x64xbf16, #tpu.memory_space<vmem>>, vector<1x18x1x64xbf16>
    tpu.vector_store %arg8[%c0_7, %c0_8, %c0_9, %c0_10], %1 {strides = array<i32>} : memref<1x18x18x64xbf16, #tpu.memory_space<vmem>>, vector<1x18x1x64xbf16>,
    %c0_11 = arith.constant 0 : index
    %c0_12 = arith.constant 0 : index
    %c17_13 = arith.constant 17 : index
    %c0_14 = arith.constant 0 : index
    %5 = vector.load %arg8[%c0_11, %c0_12, %c17_13, %c0_14] : memref<1x18x18x64xbf16, #tpu.memory_space<vmem>>, vector<1x18x1x64xbf16>
    tpu.vector_store %arg8[%c0_11, %c0_12, %c17_13, %c0_14], %1 {strides = array<i32>} : memref<1x18x18x64xbf16, #tpu.memory_space<vmem>>, vector<1x18x1x64xbf16>,
    %c0_15 = arith.constant 0 : index
    %c0_16 = arith.constant 0 : index
    %c0_17 = arith.constant 0 : index
    %c0_18 = arith.constant 0 : index
    %6 = vector.load %arg1[%c0_15, %c0_16, %c0_17, %c0_18] : memref<1x16x16x64xbf16, #tpu.memory_space<vmem>>, vector<1x16x16x64xbf16>
    %c0_19 = arith.constant 0 : index
    %c1 = arith.constant 1 : index
    %c1_20 = arith.constant 1 : index
    %c0_21 = arith.constant 0 : index
    %7 = vector.load %arg8[%c0_19, %c1, %c1_20, %c0_21] : memref<1x18x18x64xbf16, #tpu.memory_space<vmem>>, vector<1x16x16x64xbf16>
    tpu.vector_store %arg8[%c0_19, %c1, %c1_20, %c0_21], %6 {strides = array<i32>} : memref<1x18x18x64xbf16, #tpu.memory_space<vmem>>, vector<1x16x16x64xbf16>,
    %c0_22 = arith.constant 0 : index
    %c0_23 = arith.constant 0 : index
    %c0_24 = arith.constant 0 : index
    %c0_25 = arith.constant 0 : index
    %8 = vector.load %arg8[%c0_22, %c0_23, %c0_24, %c0_25] : memref<1x18x18x64xbf16, #tpu.memory_space<vmem>>, vector<1x18x18x64xbf16>
    %9 = vector.extract_strided_slice %8 {offsets = [0, 0, 0, 0], sizes = [1, 16, 16, 64], strides = [1, 1, 1, 1]} : vector<1x18x18x64xbf16> to vector<1x16x16x64xbf16>
    %10 = vector.extract_strided_slice %8 {offsets = [0, 0, 1, 0], sizes = [1, 16, 16, 64], strides = [1, 1, 1, 1]} : vector<1x18x18x64xbf16> to vector<1x16x16x64xbf16>
    %11 = vector.extract_strided_slice %8 {offsets = [0, 0, 2, 0], sizes = [1, 16, 16, 64], strides = [1, 1, 1, 1]} : vector<1x18x18x64xbf16> to vector<1x16x16x64xbf16>
    %12 = vector.extract_strided_slice %8 {offsets = [0, 1, 0, 0], sizes = [1, 16, 16, 64], strides = [1, 1, 1, 1]} : vector<1x18x18x64xbf16> to vector<1x16x16x64xbf16>
    %13 = vector.extract_strided_slice %8 {offsets = [0, 1, 1, 0], sizes = [1, 16, 16, 64], strides = [1, 1, 1, 1]} : vector<1x18x18x64xbf16> to vector<1x16x16x64xbf16>
    %14 = vector.extract_strided_slice %8 {offsets = [0, 1, 2, 0], sizes = [1, 16, 16, 64], strides = [1, 1, 1, 1]} : vector<1x18x18x64xbf16> to vector<1x16x16x64xbf16>
    %15 = vector.extract_strided_slice %8 {offsets = [0, 2, 0, 0], sizes = [1, 16, 16, 64], strides = [1, 1, 1, 1]} : vector<1x18x18x64xbf16> to vector<1x16x16x64xbf16>
    %16 = vector.extract_strided_slice %8 {offsets = [0, 2, 1, 0], sizes = [1, 16, 16, 64], strides = [1, 1, 1, 1]} : vector<1x18x18x64xbf16> to vector<1x16x16x64xbf16>
    %17 = vector.extract_strided_slice %8 {offsets = [0, 2, 2, 0], sizes = [1, 16, 16, 64], strides = [1, 1, 1, 1]} : vector<1x18x18x64xbf16> to vector<1x16x16x64xbf16>
    %18 = tpu.concatenate %9, %10, %11, %12, %13, %14, %15, %16, %17 in 3 : vector<1x16x16x64xbf16>, vector<1x16x16x64xbf16>, vector<1x16x16x64xbf16>, vector<1x16x16x64xbf16>, vector<1x16x16x64xbf16>, vector<1x16x16x64xbf16>, vector<1x16x16x64xbf16>, vector<1x16x16x64xbf16>, vector<1x16x16x64xbf16> -> vector<1x16x16x576xbf16>
    %19 = vector.shape_cast %18 : vector<1x16x16x576xbf16> to vector<256x576xbf16>
    %c0_26 = arith.constant 0 : index
    %c0_27 = arith.constant 0 : index
    %20 = vector.load %arg2[%c0_26, %c0_27] : memref<576x256xbf16, #tpu.memory_space<vmem>>, vector<576x256xbf16>
    %cst_28 = arith.constant dense<0.000000e+00> : vector<256x256xf32>
    %21 = tpu.matmul %19, %20, %cst_28 {dimension_numbers = #tpu.dot_dimension_numbers<[1], [0], [0], [1], [0, 0, 1, 1], [], []>} : vector<256x576xbf16>, vector<576x256xbf16>, vector<256x256xf32> -> vector<256x256xf32>
    %22 = vector.extract_strided_slice %21 {offsets = [0, 0], sizes = [256, 128], strides = [1, 1]} : vector<256x256xf32> to vector<256x128xf32>
    %c0_29 = arith.constant 0 : index
    %c0_30 = arith.constant 0 : index
    %23 = vector.load %arg3[%c0_29, %c0_30] : memref<1x128xf32, #tpu.memory_space<vmem>>, vector<1x128xf32>
    %24 = vector.broadcast %23 : vector<1x128xf32> to vector<256x128xf32>
    %25 = arith.addf %22, %24 : vector<256x128xf32>
    %cst_31 = arith.constant 0.000000e+00 : f32
    %26 = vector.broadcast %cst_31 : f32 to vector<256x128xf32>
    %27 = arith.maximumf %25, %26 : vector<256x128xf32>
    %28 = vector.extract_strided_slice %21 {offsets = [0, 128], sizes = [256, 128], strides = [1, 1]} : vector<256x256xf32> to vector<256x128xf32>
    %c0_32 = arith.constant 0 : index
    %c0_33 = arith.constant 0 : index
    %29 = vector.load %arg6[%c0_32, %c0_33] : memref<1x128xf32, #tpu.memory_space<vmem>>, vector<1x128xf32>
    %30 = vector.broadcast %29 : vector<1x128xf32> to vector<256x128xf32>
    %31 = arith.addf %28, %30 : vector<256x128xf32>
    %cst_34 = arith.constant 0.000000e+00 : bf16
    %32 = vector.broadcast %cst_34 : bf16 to vector<1x1x18x128xbf16>
    %cst_35 = arith.constant 0.000000e+00 : bf16
    %33 = vector.broadcast %cst_35 : bf16 to vector<1x18x1x128xbf16>
    %c0_36 = arith.constant 0 : index
    %c0_37 = arith.constant 0 : index
    %c0_38 = arith.constant 0 : index
    %c0_39 = arith.constant 0 : index
    %34 = vector.load %arg9[%c0_36, %c0_37, %c0_38, %c0_39] : memref<1x18x18x128xbf16, #tpu.memory_space<vmem>>, vector<1x1x18x128xbf16>
    tpu.vector_store %arg9[%c0_36, %c0_37, %c0_38, %c0_39], %32 {strides = array<i32>} : memref<1x18x18x128xbf16, #tpu.memory_space<vmem>>, vector<1x1x18x128xbf16>,
    %c0_40 = arith.constant 0 : index
    %c17_41 = arith.constant 17 : index
    %c0_42 = arith.constant 0 : index
    %c0_43 = arith.constant 0 : index
    %35 = vector.load %arg9[%c0_40, %c17_41, %c0_42, %c0_43] : memref<1x18x18x128xbf16, #tpu.memory_space<vmem>>, vector<1x1x18x128xbf16>
    tpu.vector_store %arg9[%c0_40, %c17_41, %c0_42, %c0_43], %32 {strides = array<i32>} : memref<1x18x18x128xbf16, #tpu.memory_space<vmem>>, vector<1x1x18x128xbf16>,
    %c0_44 = arith.constant 0 : index
    %c0_45 = arith.constant 0 : index
    %c0_46 = arith.constant 0 : index
    %c0_47 = arith.constant 0 : index
    %36 = vector.load %arg9[%c0_44, %c0_45, %c0_46, %c0_47] : memref<1x18x18x128xbf16, #tpu.memory_space<vmem>>, vector<1x18x1x128xbf16>
    tpu.vector_store %arg9[%c0_44, %c0_45, %c0_46, %c0_47], %33 {strides = array<i32>} : memref<1x18x18x128xbf16, #tpu.memory_space<vmem>>, vector<1x18x1x128xbf16>,
    %c0_48 = arith.constant 0 : index
    %c0_49 = arith.constant 0 : index
    %c17_50 = arith.constant 17 : index
    %c0_51 = arith.constant 0 : index
    %37 = vector.load %arg9[%c0_48, %c0_49, %c17_50, %c0_51] : memref<1x18x18x128xbf16, #tpu.memory_space<vmem>>, vector<1x18x1x128xbf16>
    tpu.vector_store %arg9[%c0_48, %c0_49, %c17_50, %c0_51], %33 {strides = array<i32>} : memref<1x18x18x128xbf16, #tpu.memory_space<vmem>>, vector<1x18x1x128xbf16>,
    %38 = arith.truncf %27 : vector<256x128xf32> to vector<256x128xbf16>
    %39 = vector.shape_cast %38 : vector<256x128xbf16> to vector<1x16x16x128xbf16>
    %c0_52 = arith.constant 0 : index
    %c1_53 = arith.constant 1 : index
    %c1_54 = arith.constant 1 : index
    %c0_55 = arith.constant 0 : index
    %40 = vector.load %arg9[%c0_52, %c1_53, %c1_54, %c0_55] : memref<1x18x18x128xbf16, #tpu.memory_space<vmem>>, vector<1x16x16x128xbf16>
    tpu.vector_store %arg9[%c0_52, %c1_53, %c1_54, %c0_55], %39 {strides = array<i32>} : memref<1x18x18x128xbf16, #tpu.memory_space<vmem>>, vector<1x16x16x128xbf16>,
    %c0_56 = arith.constant 0 : index
    %c0_57 = arith.constant 0 : index
    %c0_58 = arith.constant 0 : index
    %c0_59 = arith.constant 0 : index
    %41 = vector.load %arg9[%c0_56, %c0_57, %c0_58, %c0_59] : memref<1x18x18x128xbf16, #tpu.memory_space<vmem>>, vector<1x18x18x128xbf16>
    %42 = vector.extract_strided_slice %41 {offsets = [0, 0, 0, 0], sizes = [1, 16, 16, 128], strides = [1, 1, 1, 1]} : vector<1x18x18x128xbf16> to vector<1x16x16x128xbf16>
    %43 = vector.extract_strided_slice %41 {offsets = [0, 0, 1, 0], sizes = [1, 16, 16, 128], strides = [1, 1, 1, 1]} : vector<1x18x18x128xbf16> to vector<1x16x16x128xbf16>
    %44 = vector.extract_strided_slice %41 {offsets = [0, 0, 2, 0], sizes = [1, 16, 16, 128], strides = [1, 1, 1, 1]} : vector<1x18x18x128xbf16> to vector<1x16x16x128xbf16>
    %45 = vector.extract_strided_slice %41 {offsets = [0, 1, 0, 0], sizes = [1, 16, 16, 128], strides = [1, 1, 1, 1]} : vector<1x18x18x128xbf16> to vector<1x16x16x128xbf16>
    %46 = vector.extract_strided_slice %41 {offsets = [0, 1, 1, 0], sizes = [1, 16, 16, 128], strides = [1, 1, 1, 1]} : vector<1x18x18x128xbf16> to vector<1x16x16x128xbf16>
    %47 = vector.extract_strided_slice %41 {offsets = [0, 1, 2, 0], sizes = [1, 16, 16, 128], strides = [1, 1, 1, 1]} : vector<1x18x18x128xbf16> to vector<1x16x16x128xbf16>
    %48 = vector.extract_strided_slice %41 {offsets = [0, 2, 0, 0], sizes = [1, 16, 16, 128], strides = [1, 1, 1, 1]} : vector<1x18x18x128xbf16> to vector<1x16x16x128xbf16>
    %49 = vector.extract_strided_slice %41 {offsets = [0, 2, 1, 0], sizes = [1, 16, 16, 128], strides = [1, 1, 1, 1]} : vector<1x18x18x128xbf16> to vector<1x16x16x128xbf16>
    %50 = vector.extract_strided_slice %41 {offsets = [0, 2, 2, 0], sizes = [1, 16, 16, 128], strides = [1, 1, 1, 1]} : vector<1x18x18x128xbf16> to vector<1x16x16x128xbf16>
    %51 = tpu.concatenate %42, %43, %44, %45, %46, %47, %48, %49, %50 in 3 : vector<1x16x16x128xbf16>, vector<1x16x16x128xbf16>, vector<1x16x16x128xbf16>, vector<1x16x16x128xbf16>, vector<1x16x16x128xbf16>, vector<1x16x16x128xbf16>, vector<1x16x16x128xbf16>, vector<1x16x16x128xbf16>, vector<1x16x16x128xbf16> -> vector<1x16x16x1152xbf16>
    %52 = vector.shape_cast %51 : vector<1x16x16x1152xbf16> to vector<256x1152xbf16>
    %c0_60 = arith.constant 0 : index
    %c0_61 = arith.constant 0 : index
    %53 = vector.load %arg4[%c0_60, %c0_61] : memref<1152x128xbf16, #tpu.memory_space<vmem>>, vector<1152x128xbf16>
    %cst_62 = arith.constant dense<0.000000e+00> : vector<256x128xf32>
    %54 = tpu.matmul %52, %53, %cst_62 {dimension_numbers = #tpu.dot_dimension_numbers<[1], [0], [0], [1], [0, 0, 1, 1], [], []>} : vector<256x1152xbf16>, vector<1152x128xbf16>, vector<256x128xf32> -> vector<256x128xf32>
    %c0_63 = arith.constant 0 : index
    %c0_64 = arith.constant 0 : index
    %55 = vector.load %arg5[%c0_63, %c0_64] : memref<1x128xf32, #tpu.memory_space<vmem>>, vector<1x128xf32>
    %56 = vector.broadcast %55 : vector<1x128xf32> to vector<256x128xf32>
    %57 = arith.addf %54, %56 : vector<256x128xf32>
    %58 = arith.addf %57, %31 : vector<256x128xf32>
    %cst_65 = arith.constant 0.000000e+00 : f32
    %59 = vector.broadcast %cst_65 : f32 to vector<256x128xf32>
    %60 = arith.maximumf %58, %59 : vector<256x128xf32>
    %61 = vector.shape_cast %60 : vector<256x128xf32> to vector<1x16x16x128xf32>
    %c0_66 = arith.constant 0 : index
    %c0_67 = arith.constant 0 : index
    %c0_68 = arith.constant 0 : index
    %c0_69 = arith.constant 0 : index
    %62 = vector.load %arg7[%c0_66, %c0_67, %c0_68, %c0_69] : memref<1x16x16x128xf32, #tpu.memory_space<vmem>>, vector<1x16x16x128xf32>
    tpu.vector_store %arg7[%c0_66, %c0_67, %c0_68, %c0_69], %61 {strides = array<i32>} : memref<1x16x16x128xf32, #tpu.memory_space<vmem>>, vector<1x16x16x128xf32>,
    return
  }
  func.func @transform_0(%arg0: i32) -> (i32, i32, i32, i32) {
    %c0_i32 = arith.constant 0 : i32
    %c0_i32_0 = arith.constant 0 : i32
    %c0_i32_1 = arith.constant 0 : i32
    %c0_i32_2 = arith.constant 0 : i32
    return %arg0, %c0_i32, %c0_i32_0, %c0_i32_1 : i32, i32, i32, i32
  }
  func.func @transform_1(%arg0: i32) -> (i32, i32) {
    %c0_i32 = arith.constant 0 : i32
    %c0_i32_0 = arith.constant 0 : i32
    %c0_i32_1 = arith.constant 0 : i32
    return %c0_i32, %c0_i32_0 : i32, i32
  }
  func.func @transform_2(%arg0: i32) -> (i32, i32) {
    %c0_i32 = arith.constant 0 : i32
    %c0_i32_0 = arith.constant 0 : i32
    %c0_i32_1 = arith.constant 0 : i32
    return %c0_i32, %c0_i32_0 : i32, i32
  }
  func.func @transform_3(%arg0: i32) -> (i32, i32) {
    %c0_i32 = arith.constant 0 : i32
    %c0_i32_0 = arith.constant 0 : i32
    %c0_i32_1 = arith.constant 0 : i32
    return %c0_i32, %c0_i32_0 : i32, i32
  }
  func.func @transform_4(%arg0: i32) -> (i32, i32) {
    %c0_i32 = arith.constant 0 : i32
    %c0_i32_0 = arith.constant 0 : i32
    %c0_i32_1 = arith.constant 0 : i32
    return %c0_i32, %c0_i32_0 : i32, i32
  }
  func.func @transform_5(%arg0: i32) -> (i32, i32) {
    %c0_i32 = arith.constant 0 : i32
    %c0_i32_0 = arith.constant 0 : i32
    %c0_i32_1 = arith.constant 0 : i32
    return %c0_i32, %c0_i32_0 : i32, i32
  }
  func.func @transform_6(%arg0: i32) -> (i32, i32, i32, i32) {
    %c0_i32 = arith.constant 0 : i32
    %c0_i32_0 = arith.constant 0 : i32
    %c0_i32_1 = arith.constant 0 : i32
    %c0_i32_2 = arith.constant 0 : i32
    return %arg0, %c0_i32, %c0_i32_0, %c0_i32_1 : i32, i32, i32, i32
  }
}

</mosaic_0001>

<bundles_post_ra>
// kernel: basic_block_pallas.1
= control target key start
LH: loop header
LB: loop body
LE: loop exit
PB: predicated region body
PF: predicated region fallthrough
CT: control target
= control target key end

     0   :  { %11 = vsyncpa [#allocation5], 0  ;;  %s9591_s0 = inlined_call_operand.vmem [shape: bf16[2,16,16,64], index: 0, kind: input, shape index: {}]   ;;  %s9592_s1 = inlined_call_operand.vmem [shape: bf16[576,256], index: 1, kind: input, shape index: {}]   ;;  %s9593_s2 = inlined_call_operand.vmem [shape: f32[1,128], index: 2, kind: input, shape index: {}]   ;;  %s9594_s3 = inlined_call_operand.hbm [shape: bf16[1152,128], index: 3, kind: input, shape index: {}]   ;;  %s9595_s4 = inlined_call_operand.vmem [shape: f32[1,128], index: 4, kind: input, shape index: {}]   ;;  %s9596_s5 = inlined_call_operand.vmem [shape: f32[1,128], index: 5, kind: input, shape index: {}]   ;;  %s9597_s6 = inlined_call_operand.hbm [shape: f32[2,16,16,128], index: 6, kind: output, shape index: {}]  }
   0x1   :  { %12 = vsyncpa [#allocation6], 0 }
   0x2   :  { %14 = vsyncpa [#allocation6 + $0x1], 0  ;;  %s6819_s21 = smov 0   ;;  %s6821_s22 = smov 0  }
   0x3   :  { %s6823_s23 = smov 0   ;;  %s6825_s24 = smov 0  }
   0x4 LB: > { %s6840_s25 = sadd.s32 4294967295, %s6774_s24   ;;  %s5508_s26 = sadd.s32 4294967294, %s6774_s24   ;;  %s6774_s24 = sphi %s6825_s24, %s9880_s24   ;;  %s6770_s23 = sphi %s6823_s23, %s9879_s23   ;;  %s6766_s22 = sphi %s6821_s22, %s9878_s22   ;;  %s6762_s21 = sphi %s6819_s21, %s9877_s21  }
   0x5   : > { %s6844_s27 = sadd.s32 1, %s6774_s24   ;;  %s158_s28 = sadd.s32 1, %s6770_s23 }
   0x6   : > { %s155_s29 = ssub.s32 %s6774_s24, %s6844_s27  ;;  %p168_p0 = scmp.ne.s32.totalorder %s6770_s23, %s6766_s22 }
   0x7   : > { %p156_p1 = scmp.eq.s32.totalorder %s155_s29, 0  ;;  %p169_p2 = scmp.eq.s32.totalorder %s6840_s25, 1 }
   0x8   : > { %p174_p3 = scmp.ne.s32.totalorder %s6766_s22, %s6762_s21  ;;  %p175_p4 = scmp.eq.s32.totalorder %s5508_s26, 1 }
   0x9   : > { %s6855_s30 = scalar_select %p156_p1, %s6770_s23, %s158_s28  }
   0xa   : > { %p6857_p5 = por %p169_p2, %p168_p0  ;;  %p6861_p6 = por %p175_p4, %p174_p3 }
   0xb   : > { %p5509_p7 = scmp.ge.s32.totalorder %s6774_s24, 1  ;;  %p182_p8 = scmp.lt.s32.totalorder %s6774_s24, 3 }
   0xc   : > { %s9605_s8 = scalar_select %p6861_p6, 1, 0 }
   0xd   : > { %p6365_p9 = scmp.eq.s32.totalorder %s6840_s25, 0  ;;  %p6868_p10 = pnand %p5509_p7, %p182_p8 }
   0xe   : > { %s6776_s10 = smov [#allocation4]  }
   0xf   : > { %s200_s11 = sshll.u32 %s6776_s10, 4  ;;  %p6357_p11 = pneg %p6868_p10  ;;  %s201_s11 = int_to_ptr.vmem [resolvable:$true] %s200_s11 }
  0x10   : > { %s6695_s12 = scalar_lea.vmem %s201_s11, 9216  ;;  %p6703_p3 = scmp.lt.s32.totalorder %s201_s11, %s201_s11 }
  0x11   : > { %p6358_p12 = pnand %p6365_p9, %p6357_p11  ;;  %p6696_p0 = scmp.ne.s32.totalorder %s201_s11, %s6695_s12 }
  0x12   : > { %p6704_p4 = scmp.lt.s32.totalorder %s6695_s12, %s6695_s12 }
  0x13   : > { %p6686_p13 = pneg %p6358_p12 }
  0x14   : > { %p6705_p6 = por %p6704_p4, %p6703_p3 }
  0x15   : > { %p6698_p1 = pnand %p6696_p0, %p6686_p13 }
  0x17   : > { %p6699_p2 = pneg %p6698_p1 }
  0x19   : > { %p6706_p7 = pnand %p6705_p6, %p6699_p2 }
  0x1b   : > { %6709 = shalt.err (!%p6706_p7)
}
  0x1c   : > { %s6777_s13 = smov 64   ;;  %s6778_s14 = smov 4  }
  0x1d   : > { %6360 = dma.hbm_to_vmem [thread:$0]  (!%p6358_p12), %s9594_s3, 9216, %s201_s11, [#allocation5], %s6777_s13, %s6777_s13, %s6778_s14  }
  0x1e   : > { %230 = sbr.rel (%p6868_p10) target bundleno = 1121 (0x461), region = 44 }
  0x23   : > { %6753 = dma.done.wait (%p6365_p9), [#allocation5], 9216  }
  0x24   : > { %6755 = vsyncadd (%p6365_p9), [#allocation5], 4294958080  ;;  %p260_p8 = scmp.lt.s32.totalorder %s6840_s25, 1  ;;  %vm266_vm0 = vcmask 519168   ;;  %vm269_vm1 = vcmask 516096   ;;  %v9598_v0 = vmov 0  }
  0x25   : > { %vm276_vm2 = vsmask.f32 256  ;;  %267 = vst.msk [vmem:[#allocation2] sm:$0xf] %vm266_vm0, %v9598_v0  ;;  %268 = vst.msk [vmem:[#allocation2 + $0x4] sm:$0xf] %vm266_vm0, %v9598_v0 }
  0x26   : > { %s261_s17 = scalar_select %p260_p8, %s6840_s25, 1  ;;  %270 = vst.msk [vmem:[#allocation2 + $0x8] sm:$0x1] %vm269_vm1, %v9598_v0  ;;  %274 = vst.msk [vmem:[#allocation2 + $0xd4] sm:$0x1] %vm269_vm1, %v9598_v0  ;;  %v9611_v20 = vmov 0 }
  0x27   : > { %272 = vst.msk [vmem:[#allocation2 + $0xcc] sm:$0xf] %vm266_vm0, %v9598_v0  ;;  %273 = vst.msk [vmem:[#allocation2 + $0xd0] sm:$0xf] %vm266_vm0, %v9598_v0  ;;  %vm332_vm4 = vsmask.f32 7938 }
  0x28   : > { %2765 = vst [vmem:[#allocation3] sm:$0xf] %v9598_v0  ;;  %2766 = vst [vmem:[#allocation3 + $0x4] sm:$0xf] %v9598_v0  ;;  %s5789_s18 = sshll.u32 %s261_s17, 7  ;;  %s6780_s28 = smov 64  }
  0x29   : > { %2767 = vst [vmem:[#allocation3 + $0x8] sm:$0x1] %v9598_v0  ;;  %2769 = vst [vmem:[#allocation3 + $0xcc] sm:$0xf] %v9598_v0  ;;  %s6908_s26 = scalar_lea.vmem %s9591_s0, %s5789_s18  ;;  %vm420_vm5 = vsmask.f32 4368 }
  0x2a   : > { %2770 = vst [vmem:[#allocation3 + $0xd0] sm:$0xf] %v9598_v0  ;;  %2771 = vst [vmem:[#allocation3 + $0xd4] sm:$0x1] %v9598_v0  ;;  %v281_v2 = vld [vmem:[#allocation2 + $0xc] sm:$0x1] }
  0x2b   : > { %vm6912_vm3 = vmand %vm269_vm1, %vm276_vm2  ;;  %v388_v3 = vld [vmem:[%s6908_s26] sm:$0xf]  ;;  %v389_v4 = vld [vmem:[%s6908_s26 + $0x4] sm:$0xf]  ;;  %vm1039_vm9 = vsmask.f32 7424 }
  0x2c   : > { %v282_v5 = vsel %vm6912_vm3, 0, %v281_v2  ;;  %v423_v6 = vshrl.u32 %v388_v3, 16  ;;  %v426_v7 = vshll.u32 %v388_v3, 16  ;;  %v431_v8 = vshrl.u32 %v389_v4, 16  ;;  %v284_v9 = vld [vmem:[#allocation2 + $0x18] sm:$0x1]  ;;  %vm6926_vm6 = vmand %vm269_vm1, %vm332_vm4 }
  0x2d   : > { %283 = vst [vmem:[#allocation2 + $0xc] sm:$0x1] %v282_v5  ;;  %v434_v10 = vshll.u32 %v389_v4, 16  ;;  %v285_v11 = vsel %vm6912_vm3, 0, %v284_v9  ;;  %v390_v12 = vld [vmem:[%s6908_s26 + $0x8] sm:$0xf]  ;;  %vm6934_vm7 = vmor %vm276_vm2, %vm420_vm5 }
  0x2e   : > { %v391_v13 = vld [vmem:[%s6908_s26 + $0xc] sm:$0xf]  ;;  %v425_v15 = vrot.slane %v423_v6, 7  ;;  %v6930_v16 = vrot.slane %v431_v8, 7  ;;  %286 = vst [vmem:[#allocation2 + $0x18] sm:$0x1] %v285_v11  ;;  %vm6952_vm8 = vmand %vm266_vm0, %vm332_vm4 }
  0x2f   : > { %v440_v17 = vshrl.u32 %v390_v12, 16  ;;  %v443_v18 = vshll.u32 %v390_v12, 16  ;;  %v278_v19 = vld [vmem:[#allocation2] sm:$0x1]  ;;  %v9612_v20 = vsel %vm6934_vm7, 4294967295, %v9611_v20  ;;  %v448_v21 = vshrl.u32 %v391_v13, 16 }
  0x30   : > { %9613 = vst [vmem:[#allocation10_spill] sm:$0xff] %v9612_v20  ;;  %v451_v22 = vshll.u32 %v391_v13, 16  ;;  %v279_v23 = vsel %vm6912_vm3, 0, %v278_v19  ;;  %v334_v24 = vld [vmem:[#allocation2 + $0x8] sm:$0x1]  ;;  %v428_v25 = vor.u32 %v426_v7, %v425_v15  ;;  %v429_v26 = vrot.slane %v425_v15, 4 }
  0x31   : > { %v436_v27 = vor.u32 %v434_v10, %v6930_v16  ;;  %v442_v28 = vrot.slane %v440_v17, 7  ;;  %280 = vst [vmem:[#allocation2] sm:$0x1] %v279_v23  ;;  %v337_v29 = vld [vmem:[#allocation2 + $0x14] sm:$0x1]  ;;  %v6941_v30 = vrot.slane %v448_v21, 7 }
  0x32   : > { %v335_v31 = vsel %vm6926_vm6, 0, %v334_v24  ;;  %v338_v32 = vsel %vm6926_vm6, 0, %v337_v29  ;;  %v438_v33 = vrot.slane %v6930_v16, 4  ;;  %v287_v34 = vld [vmem:[#allocation2 + $0x24] sm:$0x1]  ;;  %vm1264_vm10 = vcmask 1046528  }
  0x33   : > { %v437_v35 = vsel %vm6934_vm7, %v429_v26, %v436_v27  ;;  %v445_v37 = vor.u32 %v443_v18, %v442_v28  ;;  %v446_v38 = vrot.slane %v442_v28, 4  ;;  %336 = vst [vmem:[#allocation2 + $0x8] sm:$0x1] %v335_v31  ;;  %339 = vst [vmem:[#allocation2 + $0x14] sm:$0x1] %v338_v32  ;;  %v288_v39 = vsel %vm6912_vm3, 0, %v287_v34 }
  0x34   : > { %v392_v40 = vld [vmem:[%s6908_s26 + $0x10] sm:$0xf]  ;;  %v393_v41 = vld [vmem:[%s6908_s26 + $0x14] sm:$0xf]  ;;  %748 = vst.msk [vmem:[#allocation2 + $0x10] sm:$0xf] %vm266_vm0, %v437_v35  ;;  %v453_v42 = vor.u32 %v451_v22, %v6941_v30 }
  0x35   : > { %289 = vst [vmem:[#allocation2 + $0x24] sm:$0x1] %v288_v39  ;;  %v457_v43 = vshrl.u32 %v392_v40, 16  ;;  %v460_v44 = vshll.u32 %v392_v40, 16  ;;  %v465_v45 = vshrl.u32 %v393_v41, 16  ;;  %v468_v48 = vshll.u32 %v393_v41, 16 }
  0x36   : > { %v340_v46 = vld [vmem:[#allocation2 + $0x20] sm:$0x1]  ;;  %v745_v47 = vld [vmem:[#allocation2 + $0xc] sm:$0xf]  ;;  %v455_v50 = vrot.slane %v6941_v30, 4  ;;  %v454_v52 = vsel %vm6934_vm7, %v446_v38, %v453_v42  ;;  %vm1427_vm11 = vcmask 523264  }
  0x37   : > { %v341_v49 = vsel %vm6926_vm6, 0, %v340_v46  ;;  %v746_v51 = vsel %vm6952_vm8, %v428_v25, %v745_v47  ;;  %v752_v53 = vld [vmem:[#allocation2 + $0x18] sm:$0xf]  ;;  %v459_v54 = vrot.slane %v457_v43, 7  ;;  %v6969_v55 = vrot.slane %v465_v45, 7  ;;  %s257_s17 = sand.u32 1, %s6766_s22  }
  0x38   : > { %342 = vst [vmem:[#allocation2 + $0x20] sm:$0x1] %v341_v49  ;;  %v290_v56 = vld [vmem:[#allocation2 + $0x30] sm:$0x1]  ;;  %747 = vst [vmem:[#allocation2 + $0xc] sm:$0xf] %v746_v51  ;;  %v753_v57 = vsel %vm6952_vm8, %v445_v37, %v752_v53 }
  0x39   : > { %755 = vst.msk [vmem:[#allocation2 + $0x1c] sm:$0xf] %vm266_vm0, %v454_v52  ;;  %v291_v58 = vsel %vm6912_vm3, 0, %v290_v56  ;;  %v394_v59 = vld [vmem:[%s6908_s26 + $0x18] sm:$0xf]  ;;  %v6409_v61 = vld [vmem:[#allocation2] sm:$0xff]   ;;  %v462_v62 = vor.u32 %v460_v44, %v459_v54  ;;  %v470_v2 = vor.u32 %v468_v48, %v6969_v55 }
  0x3a   : > { %v395_v60 = vld [vmem:[%s6908_s26 + $0x1c] sm:$0xf]  ;;  %754 = vst [vmem:[#allocation2 + $0x18] sm:$0xf] %v753_v57  ;;  %v463_v63 = vrot.slane %v459_v54, 4  ;;  %v474_v3 = vshrl.u32 %v394_v59, 16 }
  0x3b   : > { %292 = vst [vmem:[#allocation2 + $0x30] sm:$0x1] %v291_v58  ;;  %v477_v4 = vshll.u32 %v394_v59, 16  ;;  %v482_v5 = vshrl.u32 %v395_v60, 16  ;;  %v485_v6 = vshll.u32 %v395_v60, 16  ;;  %v472_v8 = vrot.slane %v6969_v55, 4 }
  0x3c   : > { %v343_v7 = vld [vmem:[#allocation2 + $0x2c] sm:$0x1]  ;;  %v6410_v9 = vld [vmem:[#allocation2 + $0x8] ss:$0 sps:$4 sm:$0x11]   ;;  %v1041_v10 = vshrl.u32 %v6409_v61, 16  ;;  %v471_v11 = vsel %vm6934_vm7, %v463_v63, %v470_v2 }
  0x3d   : > { %v1043_v12 = vshll.u32 %v6409_v61, 16  ;;  %v749_v13 = vld [vmem:[#allocation2 + $0x14] sm:$0x1]  ;;  %762 = vst.msk [vmem:[#allocation2 + $0x28] sm:$0xf] %vm266_vm0, %v471_v11  ;;  %v476_v15 = vrot.slane %v474_v3, 7 }
  0x3e   : > { %v1048_v16 = vshll.u32 %v6410_v9, 16  ;;  %v750_v17 = vsel %vm6912_vm3, %v438_v33, %v749_v13  ;;  %v759_v18 = vld [vmem:[#allocation2 + $0x24] sm:$0xf]  ;;  %v6985_v19 = vrot.slane %v482_v5, 7  ;;  %v344_v21 = vsel %vm6926_vm6, 0, %v343_v7  ;;  %s5514_s20 = sshll.u32 %s257_s17, 8 }
  0x3f   : > { %v1045_v22 = vrot.slane %v1043_v12, 1  ;;  %751 = vst [vmem:[#allocation2 + $0x14] sm:$0x1] %v750_v17  ;;  %v760_v23 = vsel %vm6952_vm8, %v462_v62, %v759_v18  ;;  %v756_v24 = vld [vmem:[#allocation2 + $0x20] sm:$0x1]  ;;  %v479_v25 = vor.u32 %v477_v4, %v476_v15  ;;  %v480_v26 = vrot.slane %v476_v15, 4 }
  0x40   : > { %345 = vst [vmem:[#allocation2 + $0x2c] sm:$0x1] %v344_v21  ;;  %v293_v27 = vld [vmem:[#allocation2 + $0x3c] sm:$0x1]  ;;  %v6991_v28 = vld [vmem:[#allocation2 + $0xc] sm:$0xff]   ;;  %v1050_v29 = vrot.slane %v1048_v16, 1  ;;  %v757_v30 = vsel %vm6912_vm3, %v455_v50, %v756_v24  ;;  %v487_v31 = vor.u32 %v485_v6, %v6985_v19 }
  0x41   : > { %761 = vst [vmem:[#allocation2 + $0x24] sm:$0xf] %v760_v23  ;;  %v6996_v32 = vld [vmem:[#allocation2 + $0x18] sm:$0xff]   ;;  %v1046_v33 = vor.u32 %v1045_v22, %v1041_v10  ;;  %758 = vst [vmem:[#allocation2 + $0x20] sm:$0x1] %v757_v30  ;;  %v294_v35 = vsel %vm6912_vm3, 0, %v293_v27  ;;  %1318 = vrot.lane.b32.xlu0 %v6991_v28, %s6780_s28 }
  0x42   : > { %v766_v34 = vld [vmem:[#allocation2 + $0x30] sm:$0xf]  ;;  %v1053_v37 = vshrl.u32 %v6991_v28, 16  ;;  %v1055_v38 = vshll.u32 %v6991_v28, 16  ;;  %v488_v39 = vsel %vm6934_vm7, %v480_v26, %v487_v31  ;;  %295 = vst [vmem:[#allocation2 + $0x3c] sm:$0x1] %v294_v35  ;;  %1320 = vrot.lane.b32.xlu1 %v6996_v32, %s6780_s28 }
  0x43   : > { %v767_v40 = vsel %vm6952_vm8, %v479_v25, %v766_v34  ;;  %v396_v41 = vld [vmem:[%s6908_s26 + $0x20] sm:$0xf]  ;;  %v397_v42 = vld [vmem:[%s6908_s26 + $0x24] sm:$0xf]  ;;  %v1051_v43 = vsel %vm1039_vm9, %v1046_v33, %v1050_v29  ;;  %v1065_v44 = vshrl.u32 %v6996_v32, 16  ;;  %v1067_v45 = vshll.u32 %v6996_v32, 16 }
  0x44   : > { %768 = vst [vmem:[#allocation2 + $0x30] sm:$0xf] %v767_v40  ;;  %769 = vst.msk [vmem:[#allocation2 + $0x34] sm:$0xf] %vm266_vm0, %v488_v39  ;;  %v491_v46 = vshrl.u32 %v396_v41, 16  ;;  %v1057_v48 = vrot.slane %v1055_v38, 1 }
  0x45   : > { %v346_v47 = vld [vmem:[#allocation2 + $0x38] sm:$0x1]  ;;  %v494_v49 = vshll.u32 %v396_v41, 16  ;;  %v499_v50 = vshrl.u32 %v397_v42, 16  ;;  %v502_v51 = vshll.u32 %v397_v42, 16  ;;  %v1069_v52 = vrot.slane %v1067_v45, 1  ;;  %1232 = vrot.lane.b32.xlu0 %v1051_v43, %s6780_s28 }
  0x46   : > { %v493_v53 = vrot.slane %v491_v46, 7  ;;  %v347_v54 = vsel %vm6926_vm6, 0, %v346_v47  ;;  %v489_v56 = vrot.slane %v6985_v19, 4  ;;  %v296_v57 = vld [vmem:[#allocation2 + $0x48] sm:$0x1]  ;;  %v1058_v60 = vor.u32 %v1057_v48, %v1053_v37  ;;  %s9331_s29 = scalar_lea.vmem [#allocation7], %s5514_s20 }
  0x47   : > { %v7020_v58 = vld [vmem:[#allocation2 + $0x14] ss:$0 sps:$4 sm:$0x11]   ;;  %v7022_v59 = vrot.slane %v499_v50, 7  ;;  %348 = vst [vmem:[#allocation2 + $0x38] sm:$0x1] %v347_v54  ;;  %v1070_v5 = vor.u32 %v1069_v52, %v1065_v44 }
  0x48   : > { %v6412_v61 = vld [vmem:[#allocation2 + $0x24] sm:$0xff]   ;;  %v763_v62 = vld [vmem:[#allocation2 + $0x2c] sm:$0x1]  ;;  %v496_v63 = vor.u32 %v494_v49, %v493_v53  ;;  %v497_v2 = vrot.slane %v493_v53, 4  ;;  %v1060_v3 = vshll.u32 %v7020_v58, 16  ;;  %v297_v12 = vsel %vm6912_vm3, 0, %v296_v57 }
  0x49   : > { %v7025_v4 = vld [vmem:[#allocation2 + $0x20] ss:$0 sps:$4 sm:$0x11]   ;;  %v764_v6 = vsel %vm6912_vm3, %v472_v8, %v763_v62  ;;  %v504_v7 = vor.u32 %v502_v51, %v7022_v59  ;;  %v1077_v9 = vshrl.u32 %v6412_v61, 16  ;;  %v1079_v10 = vshll.u32 %v6412_v61, 16  ;;  %1322 = vrot.lane.b32.xlu0 %v6412_v61, %s6780_s28  ;;  %s5822_s9 = sshll.u32 %s6840_s25, 12 }
  0x4a   : > { %765 = vst [vmem:[#allocation2 + $0x2c] sm:$0x1] %v764_v6  ;;  %v773_v11 = vld [vmem:[#allocation2 + $0x3c] sm:$0xf]  ;;  %v506_v13 = vrot.slane %v7022_v59, 4  ;;  %v1062_v15 = vrot.slane %v1060_v3, 1 }
  0x4b   : > { %v1072_v55 = vshll.u32 %v7025_v4, 16  ;;  %v505_v8 = vsel %vm6934_vm7, %v497_v2, %v504_v7  ;;  %v774_v16 = vsel %vm6952_vm8, %v496_v63, %v773_v11  ;;  %298 = vst [vmem:[#allocation2 + $0x48] sm:$0x1] %v297_v12  ;;  %v7041_v17 = vld [vmem:[#allocation2 + $0x30] sm:$0xff]   ;;  %v1081_v18 = vrot.slane %v1079_v10, 1  ;;  %s5434_s10 = sshll.u32 %s9331_s29, 4  ;;  %s9545_s10 = int_to_ptr.vmem [resolvable:$true] %s5434_s10 }
  0x4c   : > { %775 = vst [vmem:[#allocation2 + $0x3c] sm:$0xf] %v774_v16  ;;  %776 = vst.msk [vmem:[#allocation2 + $0x40] sm:$0xf] %vm266_vm0, %v505_v8  ;;  %v398_v19 = vld [vmem:[%s6908_s26 + $0x28] sm:$0xf]  ;;  %v7047_v22 = vsel %vm1039_vm9, %v1058_v60, %v1062_v15 }
  0x4d   : > { %v399_v21 = vld [vmem:[%s6908_s26 + $0x2c] sm:$0xf]  ;;  %v1074_v23 = vrot.slane %v1072_v55, 1  ;;  %v508_v24 = vshrl.u32 %v398_v19, 16  ;;  %v511_v25 = vshll.u32 %v398_v19, 16  ;;  %1234 = vrot.lane.b32.xlu1 %v7047_v22, %s6780_s28  ;;  %v1089_v29 = vshrl.u32 %v7041_v17, 16  ;;  %1324 = vrot.lane.b32.xlu0 %v7041_v17, %s6780_s28 }
  0x4e   : > { %v349_v26 = vld [vmem:[#allocation2 + $0x44] sm:$0x1]  ;;  %v770_v27 = vld [vmem:[#allocation2 + $0x38] sm:$0x1]  ;;  %v1091_v30 = vshll.u32 %v7041_v17, 16  ;;  %v516_v31 = vshrl.u32 %v399_v21, 16  ;;  %v1082_v53 = vor.u32 %v1081_v18, %v1077_v9 }
  0x4f   : > { %v7054_v33 = vsel %vm1039_vm9, %v1070_v5, %v1074_v23  ;;  %v771_v34 = vsel %vm6912_vm3, %v489_v56, %v770_v27  ;;  %v510_v35 = vrot.slane %v508_v24, 7  ;;  %v519_v37 = vshll.u32 %v399_v21, 16  ;;  %v299_v38 = vld [vmem:[#allocation2 + $0x54] sm:$0x1]  ;;  %v400_v39 = vld [vmem:[%s6908_s26 + $0x30] sm:$0xf] }
  0x50   : > { %772 = vst [vmem:[#allocation2 + $0x38] sm:$0x1] %v771_v34  ;;  %v1093_v40 = vrot.slane %v1091_v30, 1  ;;  %v7061_v41 = vrot.slane %v516_v31, 7  ;;  %v350_v42 = vsel %vm6926_vm6, 0, %v349_v26  ;;  %v300_v43 = vsel %vm6912_vm3, 0, %v299_v38 }
  0x51   : > { %v401_v44 = vld [vmem:[%s6908_s26 + $0x34] sm:$0xf]  ;;  %v7068_v45 = vld [vmem:[#allocation2 + $0x2c] ss:$0 sps:$4 sm:$0x11]   ;;  %v513_v46 = vor.u32 %v511_v25, %v510_v35  ;;  %v514_v47 = vrot.slane %v510_v35, 4  ;;  %1236 = vrot.lane.b32.xlu1 %v7054_v33, %s6780_s28 }
  0x52   : > { %351 = vst [vmem:[#allocation2 + $0x44] sm:$0x1] %v350_v42  ;;  %301 = vst [vmem:[#allocation2 + $0x54] sm:$0x1] %v300_v43  ;;  %v521_v48 = vor.u32 %v519_v37, %v7061_v41  ;;  %v780_v49 = vld [vmem:[#allocation2 + $0x48] sm:$0xf]  ;;  %v1094_v25 = vor.u32 %v1093_v40, %v1089_v29 }
  0x53   : > { %v525_v50 = vshrl.u32 %v400_v39, 16  ;;  %v528_v51 = vshll.u32 %v400_v39, 16  ;;  %v352_v52 = vld [vmem:[#allocation2 + $0x50] sm:$0x1]  ;;  %v1084_v54 = vshll.u32 %v7068_v45, 16  ;;  %v7074_v56 = vld [vmem:[#allocation2 + $0x3c] sm:$0xff]   ;;  %v781_v57 = vsel %vm6952_vm8, %v513_v46, %v780_v49 }
  0x54   : > { %v522_v60 = vsel %vm6934_vm7, %v514_v47, %v521_v48  ;;  %782 = vst [vmem:[#allocation2 + $0x48] sm:$0xf] %v781_v57  ;;  %v533_v62 = vshrl.u32 %v401_v44, 16  ;;  %v536_v63 = vshll.u32 %v401_v44, 16  ;;  %v302_v2 = vld [vmem:[#allocation2 + $0x60] sm:$0x1]  ;;  %1326 = vrot.lane.b32.xlu0 %v7074_v56, %s6780_s28 }
  0x55   : > { %v527_v61 = vrot.slane %v525_v50, 7  ;;  %v1086_v3 = vrot.slane %v1084_v54, 1  ;;  %783 = vst.msk [vmem:[#allocation2 + $0x4c] sm:$0xf] %vm266_vm0, %v522_v60  ;;  %v1101_v5 = vshrl.u32 %v7074_v56, 16  ;;  %v1103_v6 = vshll.u32 %v7074_v56, 16 }
  0x56   : > { %v353_v7 = vsel %vm6926_vm6, 0, %v352_v52  ;;  %v402_v9 = vld [vmem:[%s6908_s26 + $0x38] sm:$0xf]  ;;  %v7088_v12 = vrot.slane %v533_v62, 7  ;;  %v523_v15 = vrot.slane %v7061_v41, 4  ;;  %v303_v23 = vsel %vm6912_vm3, 0, %v302_v2 }
  0x57   : > { %v530_v10 = vor.u32 %v528_v51, %v527_v61  ;;  %v531_v11 = vrot.slane %v527_v61, 4  ;;  %354 = vst [vmem:[#allocation2 + $0x50] sm:$0x1] %v353_v7  ;;  %v403_v55 = vld [vmem:[%s6908_s26 + $0x3c] sm:$0xf]  ;;  %v7093_v8 = vsel %vm1039_vm9, %v1082_v53, %v1086_v3  ;;  %v7097_v17 = vrot.slane %v1103_v6, 1 }
  0x58   : > { %v7095_v16 = vld [vmem:[#allocation2 + $0x38] ss:$0 sps:$4 sm:$0x11]   ;;  %1238 = vrot.lane.b32.xlu1 %v7093_v8, %s6780_s28  ;;  %v538_v19 = vor.u32 %v536_v63, %v7088_v12  ;;  %v542_v24 = vshrl.u32 %v402_v9, 16  ;;  %304 = vst [vmem:[#allocation2 + $0x60] sm:$0x1] %v303_v23 }
  0x59   : > { %v777_v18 = vld [vmem:[#allocation2 + $0x44] sm:$0x1]  ;;  %v787_v21 = vld [vmem:[#allocation2 + $0x54] sm:$0xf]  ;;  %v1096_v26 = vshll.u32 %v7095_v16, 16  ;;  %v545_v29 = vshll.u32 %v402_v9, 16 }
  0x5a   : > { %v778_v27 = vsel %vm6912_vm3, %v506_v13, %v777_v18  ;;  %v788_v30 = vsel %vm6952_vm8, %v530_v10, %v787_v21  ;;  %v355_v31 = vld [vmem:[#allocation2 + $0x5c] sm:$0x1]  ;;  %v305_v34 = vld [vmem:[#allocation2 + $0x6c] sm:$0x1]  ;;  %v539_v35 = vsel %vm6934_vm7, %v531_v11, %v538_v19  ;;  %v544_v37 = vrot.slane %v542_v24, 7  ;;  %s9551_s13 = scalar_lea.sflag [#allocation6], %s257_s17 }
  0x5b   : > { %779 = vst [vmem:[#allocation2 + $0x44] sm:$0x1] %v778_v27  ;;  %789 = vst [vmem:[#allocation2 + $0x54] sm:$0xf] %v788_v30  ;;  %v550_v38 = vshrl.u32 %v403_v55, 16  ;;  %v1098_v59 = vrot.slane %v1096_v26, 1 }
  0x5c   : > { %v404_v39 = vld [vmem:[%s6908_s26 + $0x40] sm:$0xf]  ;;  %790 = vst.msk [vmem:[#allocation2 + $0x58] sm:$0xf] %vm266_vm0, %v539_v35  ;;  %v553_v13 = vshll.u32 %v403_v55, 16  ;;  %v356_v40 = vsel %vm6926_vm6, 0, %v355_v31  ;;  %v547_v49 = vor.u32 %v545_v29, %v544_v37 }
  0x5d   : > { %v540_v41 = vrot.slane %v7088_v12, 4  ;;  %v7118_v42 = vld [vmem:[#allocation2 + $0x48] sm:$0xff]   ;;  %v548_v43 = vrot.slane %v544_v37, 4  ;;  %v7120_v44 = vrot.slane %v550_v38, 7  ;;  %357 = vst [vmem:[#allocation2 + $0x5c] sm:$0x1] %v356_v40  ;;  %v7125_v47 = vsel %vm1039_vm9, %v1094_v25, %v1098_v59 }
  0x5e   : > { %v306_v46 = vsel %vm6912_vm3, 0, %v305_v34  ;;  %v784_v48 = vld [vmem:[#allocation2 + $0x50] sm:$0x1]  ;;  %v405_v50 = vld [vmem:[%s6908_s26 + $0x44] sm:$0xf]  ;;  %v559_v51 = vshrl.u32 %v404_v39, 16  ;;  %1240 = vrot.lane.b32.xlu1 %v7125_v47, %s6780_s28  ;;  %1328 = vrot.lane.b32.xlu0 %v7118_v42, %s6780_s28  ;;  %v1106_v25 = vor.u32 %v7097_v17, %v1101_v5 }
  0x5f   : > { %307 = vst [vmem:[#allocation2 + $0x6c] sm:$0x1] %v306_v46  ;;  %v562_v52 = vshll.u32 %v404_v39, 16  ;;  %v785_v53 = vsel %vm6912_vm3, %v523_v15, %v784_v48  ;;  %v1113_v54 = vshrl.u32 %v7118_v42, 16  ;;  %v1115_v57 = vshll.u32 %v7118_v42, 16  ;;  %s6710_s25 = scalar_lea.vmem %s9545_s10, 4096 }
  0x60   : > { %v555_v60 = vor.u32 %v553_v13, %v7120_v44  ;;  %v358_v61 = vld [vmem:[#allocation2 + $0x68] sm:$0x1]  ;;  %v308_v62 = vld [vmem:[#allocation2 + $0x78] sm:$0x1]  ;;  %786 = vst [vmem:[#allocation2 + $0x50] sm:$0x1] %v785_v53  ;;  %p6711_p6 = scmp.ne.s32.totalorder %s9545_s10, %s6710_s25 }
  0x61   : > { %v561_v63 = vrot.slane %v559_v51, 7  ;;  %v567_v2 = vshrl.u32 %v405_v50, 16  ;;  %v570_v3 = vshll.u32 %v405_v50, 16  ;;  %v359_v6 = vsel %vm6926_vm6, 0, %v358_v61  ;;  %v406_v7 = vld [vmem:[%s6908_s26 + $0x48] sm:$0xf] }
  0x62   : > { %v1117_v9 = vrot.slane %v1115_v57, 1  ;;  %v556_v10 = vsel %vm6934_vm7, %v548_v43, %v555_v60  ;;  %v794_v11 = vld [vmem:[#allocation2 + $0x60] sm:$0xf]  ;;  %360 = vst [vmem:[#allocation2 + $0x68] sm:$0x1] %v359_v6  ;;  %v557_v12 = vrot.slane %v7120_v44, 4  ;;  %p6712_p9 = pnand %p6711_p6, %p6857_p5 }
  0x63   : > { %v309_v15 = vsel %vm6912_vm3, 0, %v308_v62  ;;  %v7145_v55 = vld [vmem:[#allocation2 + $0x44] ss:$0 sps:$4 sm:$0x11]   ;;  %v795_v18 = vsel %vm6952_vm8, %v547_v49, %v794_v11  ;;  %797 = vst.msk [vmem:[#allocation2 + $0x64] sm:$0xf] %vm266_vm0, %v556_v10  ;;  %v564_v19 = vor.u32 %v562_v52, %v561_v63 }
  0x64   : > { %v565_v21 = vrot.slane %v561_v63, 4  ;;  %310 = vst [vmem:[#allocation2 + $0x78] sm:$0x1] %v309_v15  ;;  %v7150_v23 = vld [vmem:[#allocation2 + $0x54] sm:$0xff]   ;;  %796 = vst [vmem:[#allocation2 + $0x60] sm:$0xf] %v795_v18  ;;  %v1118_v52 = vor.u32 %v1117_v9, %v1113_v54  ;;  %p6713_p10 = pneg %p6712_p9 }
  0x65   : > { %v7152_v24 = vrot.slane %v567_v2, 7  ;;  %v1108_v26 = vshll.u32 %v7145_v55, 16  ;;  %v791_v27 = vld [vmem:[#allocation2 + $0x5c] sm:$0x1]  ;;  %v407_v30 = vld [vmem:[%s6908_s26 + $0x4c] sm:$0xf]  ;;  %1330 = vrot.lane.b32.xlu0 %v7150_v23, %s6780_s28 }
  0x66   : > { %v576_v31 = vshrl.u32 %v406_v7, 16  ;;  %v792_v34 = vsel %vm6912_vm3, %v540_v41, %v791_v27  ;;  %v1125_v35 = vshrl.u32 %v7150_v23, 16  ;;  %v1127_v37 = vshll.u32 %v7150_v23, 16  ;;  %v801_v56 = vld [vmem:[#allocation2 + $0x6c] sm:$0xf]  ;;  %s6781_s14 = smov [#allocation7]  }
  0x67   : > { %v572_v29 = vor.u32 %v570_v3, %v7152_v24  ;;  %v361_v38 = vld [vmem:[#allocation2 + $0x74] sm:$0x1]  ;;  %v1110_v5 = vrot.slane %v1108_v26, 1  ;;  %793 = vst [vmem:[#allocation2 + $0x5c] sm:$0x1] %v792_v34  ;;  %v802_v17 = vsel %vm6952_vm8, %v564_v19, %v801_v56  ;;  %v579_v59 = vshll.u32 %v406_v7, 16 }
  0x68   : > { %v578_v39 = vrot.slane %v576_v31, 7  ;;  %v311_v13 = vld [vmem:[#allocation2 + $0x84] sm:$0x1]  ;;  %v7168_v40 = vld [vmem:[#allocation2 + $0x50] ss:$0 sps:$4 sm:$0x11]  }
  0x69   : > { %v1129_v41 = vrot.slane %v1127_v37, 1  ;;  %v573_v43 = vsel %vm6934_vm7, %v565_v21, %v572_v29  ;;  %803 = vst [vmem:[#allocation2 + $0x6c] sm:$0xf] %v802_v17  ;;  %v7173_v44 = vsel %vm1039_vm9, %v1106_v25, %v1110_v5  ;;  %v798_v46 = vld [vmem:[#allocation2 + $0x68] sm:$0x1]  ;;  %v584_v50 = vshrl.u32 %v407_v30, 16 }
  0x6a   : > { %804 = vst.msk [vmem:[#allocation2 + $0x70] sm:$0xf] %vm266_vm0, %v573_v43  ;;  %v581_v48 = vor.u32 %v579_v59, %v578_v39  ;;  %v582_v49 = vrot.slane %v578_v39, 4  ;;  %v408_v51 = vld [vmem:[%s6908_s26 + $0x50] sm:$0xf]  ;;  %1242 = vrot.lane.b32.xlu1 %v7173_v44, %s6780_s28  ;;  %v1120_v53 = vshll.u32 %v7168_v40, 16  ;;  %v799_v57 = vsel %vm6912_vm3, %v557_v12, %v798_v46 }
  0x6b   : > { %v587_v60 = vshll.u32 %v407_v30, 16  ;;  %v808_v61 = vld [vmem:[#allocation2 + $0x78] sm:$0xf]  ;;  %v7182_v62 = vld [vmem:[#allocation2 + $0x60] sm:$0xff]   ;;  %800 = vst [vmem:[#allocation2 + $0x68] sm:$0x1] %v799_v57  ;;  %v1130_v37 = vor.u32 %v1129_v41, %v1125_v35 }
  0x6c   : > { %v7184_v63 = vrot.slane %v584_v50, 7  ;;  %v809_v2 = vsel %vm6952_vm8, %v581_v48, %v808_v61  ;;  %v362_v3 = vsel %vm6926_vm6, 0, %v361_v38  ;;  %v574_v54 = vrot.slane %v7152_v24, 4  ;;  %v409_v9 = vld [vmem:[%s6908_s26 + $0x54] sm:$0xf]  ;;  %1332 = vrot.lane.b32.xlu0 %v7182_v62, %s6780_s28 }
  0x6d   : > { %v1122_v6 = vrot.slane %v1120_v53, 1  ;;  %810 = vst [vmem:[#allocation2 + $0x78] sm:$0xf] %v809_v2  ;;  %363 = vst [vmem:[#allocation2 + $0x74] sm:$0x1] %v362_v3  ;;  %v312_v7 = vsel %vm6912_vm3, 0, %v311_v13 }
  0x6e   : > { %v593_v10 = vshrl.u32 %v408_v51, 16  ;;  %v596_v11 = vshll.u32 %v408_v51, 16  ;;  %v1137_v12 = vshrl.u32 %v7182_v62, 16  ;;  %v1139_v15 = vshll.u32 %v7182_v62, 16  ;;  %313 = vst [vmem:[#allocation2 + $0x84] sm:$0x1] %v312_v7 }
  0x6f   : > { %v589_v18 = vor.u32 %v587_v60, %v7184_v63  ;;  %v601_v19 = vshrl.u32 %v409_v9, 16  ;;  %v364_v21 = vld [vmem:[#allocation2 + $0x80] sm:$0x1]  ;;  %v7200_v24 = vsel %vm1039_vm9, %v1118_v52, %v1122_v6  ;;  %v7202_v25 = vld [vmem:[#allocation2 + $0x5c] ss:$0 sps:$4 sm:$0x11]  }
  0x70   : > { %v595_v26 = vrot.slane %v593_v10, 7  ;;  %1244 = vrot.lane.b32.xlu1 %v7200_v24, %s6780_s28  ;;  %v1141_v27 = vrot.slane %v1139_v15, 1  ;;  %v604_v34 = vshll.u32 %v409_v9, 16  ;;  %v1132_v29 = vshll.u32 %v7202_v25, 16  ;;  %v314_v59 = vld [vmem:[#allocation2 + $0x90] sm:$0x1] }
  0x71   : > { %v590_v30 = vsel %vm6934_vm7, %v582_v49, %v589_v18  ;;  %v7208_v31 = vrot.slane %v601_v19, 7  ;;  %v7211_v56 = vld [vmem:[#allocation2 + $0x6c] sm:$0xff]   ;;  %v365_v5 = vsel %vm6926_vm6, 0, %v364_v21  ;;  %v410_v13 = vld [vmem:[%s6908_s26 + $0x58] sm:$0xf]  ;;  %v591_v49 = vrot.slane %v7184_v63, 4 }
  0x72   : > { %811 = vst.msk [vmem:[#allocation2 + $0x7c] sm:$0xf] %vm266_vm0, %v590_v30  ;;  %v599_v38 = vrot.slane %v595_v26, 4  ;;  %v598_v17 = vor.u32 %v596_v11, %v595_v26  ;;  %366 = vst [vmem:[#allocation2 + $0x80] sm:$0x1] %v365_v5  ;;  %v1134_v43 = vrot.slane %v1132_v29, 1  ;;  %1334 = vrot.lane.b32.xlu0 %v7211_v56, %s6780_s28  ;;  %v1142_v41 = vor.u32 %v1141_v27, %v1137_v12 }
  0x73   : > { %v606_v39 = vor.u32 %v604_v34, %v7208_v31  ;;  %v7220_v35 = vld [vmem:[#allocation2 + $0x68] ss:$0 sps:$4 sm:$0x11]   ;;  %v315_v57 = vsel %vm6912_vm3, 0, %v314_v59  ;;  %v411_v60 = vld [vmem:[%s6908_s26 + $0x5c] sm:$0xf] }
  0x74   : > { %v805_v46 = vld [vmem:[#allocation2 + $0x74] sm:$0x1]  ;;  %v7226_v50 = vsel %vm1039_vm9, %v1130_v37, %v1134_v43  ;;  %v1144_v51 = vshll.u32 %v7220_v35, 16  ;;  %v1151_v61 = vshll.u32 %v7211_v56, 16  ;;  %316 = vst [vmem:[#allocation2 + $0x90] sm:$0x1] %v315_v57 }
  0x75   : > { %v607_v48 = vsel %vm6934_vm7, %v599_v38, %v606_v39  ;;  %v806_v52 = vsel %vm6912_vm3, %v574_v54, %v805_v46  ;;  %v815_v53 = vld [vmem:[#allocation2 + $0x84] sm:$0xf]  ;;  %1246 = vrot.lane.b32.xlu1 %v7226_v50, %s6780_s28  ;;  %v610_v2 = vshrl.u32 %v410_v13, 16  ;;  %v613_v3 = vshll.u32 %v410_v13, 16  ;;  %v367_v54 = vld [vmem:[#allocation2 + $0x8c] sm:$0x1] }
  0x76   : > { %818 = vst.msk [vmem:[#allocation2 + $0x88] sm:$0xf] %vm266_vm0, %v607_v48  ;;  %807 = vst [vmem:[#allocation2 + $0x74] sm:$0x1] %v806_v52  ;;  %v816_v63 = vsel %vm6952_vm8, %v598_v17, %v815_v53  ;;  %v1146_v6 = vrot.slane %v1144_v51, 1  ;;  %v618_v7 = vshrl.u32 %v411_v60, 16 }
  0x77   : > { %817 = vst [vmem:[#allocation2 + $0x84] sm:$0xf] %v816_v63  ;;  %v621_v9 = vshll.u32 %v411_v60, 16  ;;  %v368_v10 = vsel %vm6926_vm6, 0, %v367_v54  ;;  %v317_v11 = vld [vmem:[#allocation2 + $0x9c] sm:$0x1] }
  0x78   : > { %v612_v15 = vrot.slane %v610_v2, 7  ;;  %369 = vst [vmem:[#allocation2 + $0x8c] sm:$0x1] %v368_v10  ;;  %v318_v18 = vsel %vm6912_vm3, 0, %v317_v11  ;;  %v7247_v19 = vsel %vm1039_vm9, %v1142_v41, %v1146_v6  ;;  %v7249_v26 = vrot.slane %v618_v7, 7 }
  0x79   : > { %v7242_v12 = vld [vmem:[#allocation2 + $0x78] sm:$0xff]   ;;  %v812_v21 = vld [vmem:[#allocation2 + $0x80] sm:$0x1]  ;;  %v608_v27 = vrot.slane %v7208_v31, 4  ;;  %319 = vst [vmem:[#allocation2 + $0x9c] sm:$0x1] %v318_v18  ;;  %1248 = vrot.lane.b32.xlu1 %v7247_v19, %s6780_s28 }
  0x7a   : > { %v412_v30 = vld [vmem:[%s6908_s26 + $0x60] sm:$0xf]  ;;  %1336 = vrot.lane.b32.xlu0 %v7242_v12, %s6780_s28  ;;  %v1149_v34 = vshrl.u32 %v7211_v56, 16  ;;  %v1153_v37 = vrot.slane %v1151_v61, 1  ;;  %v813_v29 = vsel %vm6912_vm3, %v591_v49, %v812_v21  ;;  %v615_v38 = vor.u32 %v613_v3, %v612_v15  ;;  %v413_v5 = vld [vmem:[%s6908_s26 + $0x64] sm:$0xf] }
  0x7b   : > { %v370_v17 = vld [vmem:[#allocation2 + $0x98] sm:$0x1]  ;;  %814 = vst [vmem:[#allocation2 + $0x80] sm:$0x1] %v813_v29  ;;  %v616_v39 = vrot.slane %v612_v15, 4  ;;  %v623_v31 = vor.u32 %v621_v9, %v7249_v26  ;;  %v627_v59 = vshrl.u32 %v412_v30, 16 }
  0x7c   : > { %v630_v13 = vshll.u32 %v412_v30, 16  ;;  %v6434_v43 = vld [vmem:[%s9592_s1 + $0x74] ss:$8 sps:$4 sm:$0xff]   ;;  %v1163_v41 = vshll.u32 %v7242_v12, 16  ;;  %v635_v46 = vshrl.u32 %v413_v5, 16  ;;  %v638_v48 = vshll.u32 %v413_v5, 16 }
  0x7d   : > { %v371_v49 = vsel %vm6926_vm6, 0, %v370_v17  ;;  %v7268_v51 = vld [vmem:[#allocation2 + $0x74] ss:$0 sps:$4 sm:$0x11]   ;;  %v624_v52 = vsel %vm6934_vm7, %v616_v39, %v623_v31  ;;  %v629_v53 = vrot.slane %v627_v59, 7  ;;  %2076 = vmatprep.subr.bf16.mxu0 %v6434_v43  ;;  %v1154_v57 = vor.u32 %v1153_v37, %v1149_v34 }
  0x7e   : > { %372 = vst [vmem:[#allocation2 + $0x98] sm:$0x1] %v371_v49  ;;  %v7272_v60 = vld [vmem:[#allocation2 + $0x84] sm:$0xff]   ;;  %v822_v61 = vld [vmem:[#allocation2 + $0x90] sm:$0xf]  ;;  %v7275_v63 = vrot.slane %v635_v46, 7 }
  0x7f   : > { %825 = vst.msk [vmem:[#allocation2 + $0x94] sm:$0xf] %vm266_vm0, %v624_v52  ;;  %v1156_v2 = vshll.u32 %v7268_v51, 16  ;;  %v823_v3 = vsel %vm6952_vm8, %v615_v38, %v822_v61  ;;  %v819_v54 = vld [vmem:[#allocation2 + $0x8c] sm:$0x1]  ;;  %v632_v6 = vor.u32 %v630_v13, %v629_v53  ;;  %v633_v7 = vrot.slane %v629_v53, 4  ;;  %1338 = vrot.lane.b32.xlu0 %v7272_v60, %s6780_s28 }
  0x80   : > { %v6436_v9 = vld [vmem:[%s9592_s1 + $0x70] ss:$8 sps:$4 sm:$0xff]   ;;  %v1161_v10 = vshrl.u32 %v7242_v12, 16  ;;  %v1165_v11 = vrot.slane %v1163_v41, 1  ;;  %824 = vst [vmem:[#allocation2 + $0x90] sm:$0xf] %v823_v3  ;;  %v820_v15 = vsel %vm6912_vm3, %v608_v27, %v819_v54  ;;  %v640_v18 = vor.u32 %v638_v48, %v7275_v63 }
  0x81   : > { %v829_v21 = vld [vmem:[#allocation2 + $0x9c] sm:$0xf]  ;;  %v320_v30 = vld [vmem:[#allocation2 + $0xa8] sm:$0x1]  ;;  %v1158_v34 = vrot.slane %v1156_v2, 1  ;;  %v625_v29 = vrot.slane %v7249_v26, 4  ;;  %2077 = vmatpush1.bf16.msra.mxu0 %v6436_v9 }
  0x82   : > { %821 = vst [vmem:[#allocation2 + $0x8c] sm:$0x1] %v820_v15  ;;  %v830_v37 = vsel %vm6952_vm8, %v632_v6, %v829_v21  ;;  %v321_v38 = vsel %vm6912_vm3, 0, %v320_v30  ;;  %v414_v5 = vld [vmem:[%s6908_s26 + $0x68] sm:$0xf]  ;;  %v1175_v27 = vshll.u32 %v7272_v60, 16  ;;  %v641_v39 = vsel %vm6934_vm7, %v633_v7, %v640_v18 }
  0x83   : > { %v7295_v17 = vld [vmem:[#allocation2 + $0x80] ss:$0 sps:$4 sm:$0x11]   ;;  %831 = vst [vmem:[#allocation2 + $0x9c] sm:$0xf] %v830_v37  ;;  %v7301_v31 = vsel %vm1039_vm9, %v1154_v57, %v1158_v34  ;;  %v644_v59 = vshrl.u32 %v414_v5, 16  ;;  %v1166_v41 = vor.u32 %v1165_v11, %v1161_v10 }
  0x84   : > { %322 = vst [vmem:[#allocation2 + $0xa8] sm:$0x1] %v321_v38  ;;  %832 = vst.msk [vmem:[#allocation2 + $0xa0] sm:$0xf] %vm266_vm0, %v641_v39  ;;  %v415_v26 = vld [vmem:[%s6908_s26 + $0x6c] sm:$0xf]  ;;  %1250 = vrot.lane.b32.xlu1 %v7301_v31, %s6780_s28 }
  0x85   : > { %v647_v13 = vshll.u32 %v414_v5, 16  ;;  %v6438_v43 = vld [vmem:[%s9592_s1 + $0x64] ss:$8 sps:$4 sm:$0xff]   ;;  %v1168_v46 = vshll.u32 %v7295_v17, 16  ;;  %v826_v48 = vld [vmem:[#allocation2 + $0x98] sm:$0x1] }
  0x86   : > { %v652_v49 = vshrl.u32 %v415_v26, 16  ;;  %v655_v52 = vshll.u32 %v415_v26, 16  ;;  %v827_v53 = vsel %vm6912_vm3, %v625_v29, %v826_v48  ;;  %v646_v57 = vrot.slane %v644_v59, 7  ;;  %2078 = vmatprep.subr.bf16.mxu0 %v6438_v43  ;;  %v6440_v61 = vld [vmem:[%s9592_s1 + $0x60] ss:$8 sps:$4 sm:$0xff]  }
  0x87   : > { %v1170_v2 = vrot.slane %v1168_v46, 1  ;;  %v1173_v3 = vshrl.u32 %v7272_v60, 16  ;;  %v1177_v54 = vrot.slane %v1175_v27, 1  ;;  %828 = vst [vmem:[#allocation2 + $0x98] sm:$0x1] %v827_v53  ;;  %v7319_v9 = vld [vmem:[#allocation2 + $0x90] sm:$0xff]   ;;  %2079 = vmatpush1.bf16.msra.mxu0 %v6440_v61 }
  0x88   : > { %v7317_v6 = vrot.slane %v652_v49, 7  ;;  %v373_v7 = vld [vmem:[#allocation2 + $0xa4] sm:$0x1]  ;;  %v1268_v10 = vrot.slane %v6991_v28, 1  ;;  %v649_v11 = vor.u32 %v647_v13, %v646_v57  ;;  %v650_v15 = vrot.slane %v646_v57, 4  ;;  %1340 = vrot.lane.b32.xlu0 %v7319_v9, %s6780_s28 }
  0x89   : > { %v374_v18 = vsel %vm6926_vm6, 0, %v373_v7  ;;  %v7325_v21 = vsel %vm1039_vm9, %v1166_v41, %v1170_v2  ;;  %v7327_v30 = vld [vmem:[#allocation2 + $0x8c] ss:$0 sps:$4 sm:$0x11]   ;;  %v1269_v34 = vrot.slane %v7020_v58, 1  ;;  %v1185_v28 = vshrl.u32 %v7319_v9, 16 }
  0x8a   : > { %v657_v37 = vor.u32 %v655_v52, %v7317_v6  ;;  %375 = vst [vmem:[#allocation2 + $0xa4] sm:$0x1] %v374_v18  ;;  %1252 = vrot.lane.b32.xlu1 %v7325_v21, %s6780_s28  ;;  %v1187_v29 = vshll.u32 %v7319_v9, 16  ;;  %v1178_v5 = vor.u32 %v1177_v54, %v1173_v3  ;;  %v1180_v27 = vshll.u32 %v7327_v30, 16  ;;  %v6442_v59 = vld [vmem:[%s9592_s1 + $0x54] ss:$8 sps:$4 sm:$0xff]  }
  0x8b   : > { %v836_v38 = vld [vmem:[#allocation2 + $0xa8] sm:$0xf]  ;;  %v7338_v39 = vld [vmem:[#allocation2 + $0x9c] sm:$0xff]   ;;  %v6444_v43 = vld [vmem:[%s9592_s1 + $0x50] ss:$8 sps:$4 sm:$0xff]   ;;  %v642_v48 = vrot.slane %v7275_v63, 4  ;;  %2080 = vmatprep.subr.bf16.mxu0 %v6442_v59  ;;  %v7360_v57 = vsel %vm1264_vm10, %v1268_v10, %v1269_v34 }
  0x8c   : > { %v658_v58 = vsel %vm6934_vm7, %v650_v15, %v657_v37  ;;  %v837_v26 = vsel %vm6952_vm8, %v649_v11, %v836_v38  ;;  %v1189_v13 = vrot.slane %v1187_v29, 1  ;;  %v323_v41 = vld [vmem:[#allocation2 + $0xb4] sm:$0x1]  ;;  %v1182_v46 = vrot.slane %v1180_v27, 1  ;;  %v416_v52 = vld [vmem:[%s6908_s26 + $0x70] sm:$0xf]  ;;  %1342 = vrot.lane.b32.xlu0 %v7338_v39, %s6780_s28  ;;  %2081 = vmatpush1.bf16.msra.mxu0 %v6444_v43 }
  0x8d   : > { %838 = vst [vmem:[#allocation2 + $0xa8] sm:$0xf] %v837_v26  ;;  %839 = vst.msk [vmem:[#allocation2 + $0xac] sm:$0xf] %vm266_vm0, %v658_v58  ;;  %v324_v49 = vsel %vm6912_vm3, 0, %v323_v41  ;;  %v661_v61 = vshrl.u32 %v416_v52, 16 }
  0x8e   : > { %v7357_v53 = vld [vmem:[#allocation2 + $0x98] ss:$0 sps:$4 sm:$0x11]   ;;  %325 = vst [vmem:[#allocation2 + $0xb4] sm:$0x1] %v324_v49  ;;  %v7363_v2 = vsel %vm1039_vm9, %v1178_v5, %v1182_v46  ;;  %v1190_v63 = vor.u32 %v1189_v13, %v1185_v28  ;;  %v1271_v3 = vrot.slane %v6996_v32, 1 }
  0x8f   : > { %v417_v54 = vld [vmem:[%s6908_s26 + $0x74] sm:$0xf]  ;;  %v664_v7 = vshll.u32 %v416_v52, 16  ;;  %v6446_v11 = vld [vmem:[%s9592_s1 + $0x44] ss:$8 sps:$4 sm:$0xff]   ;;  %1254 = vrot.lane.b32.xlu1 %v7363_v2, %s6780_s28  ;;  %v1192_v10 = vshll.u32 %v7357_v53, 16 }
  0x90   : > { %v663_v18 = vrot.slane %v661_v61, 7  ;;  %v669_v34 = vshrl.u32 %v417_v54, 16  ;;  %v672_v37 = vshll.u32 %v417_v54, 16  ;;  %2082 = vmatprep.subr.bf16.mxu0 %v6446_v11  ;;  %v6448_v32 = vld [vmem:[%s9592_s1 + $0x40] ss:$8 sps:$4 sm:$0xff]   ;;  %1368 = vrot.lane.b32.xlu0 %v7360_v57, %s6780_s28  ;;  %v1199_v13 = vshll.u32 %v7338_v39, 16 }
  0x91   : > { %v833_v15 = vld [vmem:[#allocation2 + $0xa4] sm:$0x1]  ;;  %v376_v29 = vld [vmem:[#allocation2 + $0xb0] sm:$0x1]  ;;  %v6450_v38 = vld [vmem:[%s9592_s1 + $0x34] ss:$8 sps:$4 sm:$0xff]   ;;  %2083 = vmatpush1.bf16.msra.mxu0 %v6448_v32 }
  0x92   : > { %v834_v28 = vsel %vm6912_vm3, %v642_v48, %v833_v15  ;;  %v1194_v5 = vrot.slane %v1192_v10, 1  ;;  %v666_v27 = vor.u32 %v664_v7, %v663_v18  ;;  %v667_v58 = vrot.slane %v663_v18, 4  ;;  %v6452_v59 = vld [vmem:[%s9592_s1 + $0x30] ss:$8 sps:$4 sm:$0xff]   ;;  %2084 = vmatprep.subr.bf16.mxu0 %v6450_v38  ;;  %v326_v48 = vld [vmem:[#allocation2 + $0xc0] sm:$0x1] }
  0x93   : > { %835 = vst [vmem:[#allocation2 + $0xa4] sm:$0x1] %v834_v28  ;;  %v7383_v26 = vrot.slane %v669_v34, 7  ;;  %v377_v43 = vsel %vm6926_vm6, 0, %v376_v29  ;;  %v418_v49 = vld [vmem:[%s6908_s26 + $0x78] sm:$0xf] }
  0x94   : > { %v7392_v41 = vsel %vm1039_vm9, %v1190_v63, %v1194_v5  ;;  %378 = vst [vmem:[#allocation2 + $0xb0] sm:$0x1] %v377_v43  ;;  %v419_v52 = vld [vmem:[%s6908_s26 + $0x7c] sm:$0xf]  ;;  %v7399_v61 = vld [vmem:[#allocation2 + $0xa8] sm:$0xff]   ;;  %v1272_v54 = vrot.slane %v7025_v4, 1 }
  0x95   : > { %v674_v46 = vor.u32 %v672_v37, %v7383_v26  ;;  %1256 = vrot.lane.b32.xlu1 %v7392_v41, %s6780_s28  ;;  %v843_v7 = vld [vmem:[#allocation2 + $0xb4] sm:$0xf]  ;;  %v327_v11 = vsel %vm6912_vm3, 0, %v326_v48  ;;  %v678_v63 = vshrl.u32 %v418_v49, 16  ;;  %v681_v18 = vshll.u32 %v418_v49, 16  ;;  %2085 = vmatpush1.bf16.msra.mxu0 %v6452_v59  ;;  %s6714_s26 = sshll.u32 %s6781_s14, 4  ;;  %s6715_s26 = int_to_ptr.vmem [resolvable:$false] %s6714_s26 }
  0x96   : > { %v844_v15 = vsel %vm6952_vm8, %v666_v27, %v843_v7  ;;  %328 = vst [vmem:[#allocation2 + $0xc0] sm:$0x1] %v327_v11  ;;  %v686_v34 = vshrl.u32 %v419_v52, 16  ;;  %v6454_v37 = vld [vmem:[%s9592_s1 + $0x24] ss:$8 sps:$4 sm:$0xff]   ;;  %v1197_v4 = vshrl.u32 %v7338_v39, 16  ;;  %p6717_p11 = scmp.lt.s32.totalorder %s9545_s10, %s6715_s26 }
  0x97   : > { %v675_v10 = vsel %vm6934_vm7, %v667_v58, %v674_v46  ;;  %v1201_v28 = vrot.slane %v1199_v13, 1  ;;  %845 = vst [vmem:[#allocation2 + $0xb4] sm:$0xf] %v844_v15  ;;  %v680_v32 = vrot.slane %v678_v63, 7  ;;  %v689_v29 = vshll.u32 %v419_v52, 16  ;;  %2086 = vmatprep.subr.bf16.mxu0 %v6454_v37  ;;  %s6716_s15 = scalar_lea.vmem %s6715_s26, 8192 }
  0x98   : > { %846 = vst.msk [vmem:[#allocation2 + $0xb8] sm:$0xf] %vm266_vm0, %v675_v10  ;;  %v6456_v38 = vld [vmem:[%s9592_s1 + $0x20] ss:$8 sps:$4 sm:$0xff]   ;;  %v659_v5 = vrot.slane %v7317_v6, 4  ;;  %v7417_v27 = vrot.slane %v686_v34, 7  ;;  %v7427_v46 = vsel %vm1264_vm10, %v1271_v3, %v1272_v54  ;;  %p6718_p12 = scmp.lt.s32.totalorder %s6716_s15, %s6710_s25 }
  0x99   : > { %v6457_v58 = vld [vmem:[%s9592_s1 + $0x14] ss:$8 sps:$4 sm:$0xff]   ;;  %1344 = vrot.lane.b32.xlu1 %v7399_v61, %s6780_s28  ;;  %v684_v43 = vrot.slane %v680_v32, 4  ;;  %v683_v48 = vor.u32 %v681_v18, %v680_v32  ;;  %v1202_v52 = vor.u32 %v1201_v28, %v1197_v4  ;;  %2087 = vmatpush1.bf16.msra.mxu0 %v6456_v38  ;;  %v6459_v63 = vld [vmem:[%s9592_s1 + $0x10] ss:$8 sps:$4 sm:$0xff]   ;;  %v1211_v34 = vshll.u32 %v7399_v61, 16 }
  0x9a   : > { %v379_v13 = vld [vmem:[#allocation2 + $0xbc] sm:$0x1]  ;;  %v7424_v59 = vld [vmem:[#allocation2 + $0xa4] ss:$0 sps:$4 sm:$0x11]   ;;  %v691_v6 = vor.u32 %v689_v29, %v7417_v27  ;;  %2088 = vmatprep.subr.bf16.mxu0 %v6457_v58  ;;  %v676_v28 = vrot.slane %v7383_v26, 4  ;;  %p6719_p13 = por %p6718_p12, %p6717_p11 }
  0x9b   : > { %v380_v49 = vsel %vm6926_vm6, 0, %v379_v13  ;;  %v1204_v7 = vshll.u32 %v7424_v59, 16  ;;  %v840_v11 = vld [vmem:[#allocation2 + $0xb0] sm:$0x1]  ;;  %v6461_v10 = vld [vmem:[%s9592_s1 + $0x4] ss:$8 sps:$4 sm:$0xff]  }
  0x9c   : > { %381 = vst [vmem:[#allocation2 + $0xbc] sm:$0x1] %v380_v49  ;;  %v841_v3 = vsel %vm6912_vm3, %v659_v5, %v840_v11  ;;  %v692_v54 = vsel %vm6934_vm7, %v684_v43, %v691_v6  ;;  %v6463_v32 = vld [vmem:[%s9592_s1] ss:$8 sps:$4 sm:$0xff]   ;;  %v6464_v29 = vld [vmem:[%s9592_s1 + $0xf4] ss:$8 sps:$4 sm:$0xff]   ;;  %p6720_p0 = pnand %p6719_p13, %p6713_p10 }
  0x9d   : > { %1370 = vrot.lane.b32.xlu1 %v7427_v46, %s6780_s28  ;;  %v1206_v15 = vrot.slane %v1204_v7, 1  ;;  %842 = vst [vmem:[#allocation2 + $0xb0] sm:$0x1] %v841_v3  ;;  %v850_v18 = vld [vmem:[#allocation2 + $0xc0] sm:$0xf]  ;;  %2089 = vmatpush1.bf16.msra.mxu0 %v6459_v63  ;;  %v1209_v38 = vshrl.u32 %v7399_v61, 16 }
  0x9e   : > { %853 = vst.msk [vmem:[#allocation2 + $0xc4] sm:$0xf] %vm266_vm0, %v692_v54  ;;  %v851_v37 = vsel %vm6952_vm8, %v683_v48, %v850_v18  ;;  %2090 = vmatprep.subr.bf16.mxu0 %v6461_v10  ;;  %v7464_v5 = vld [vmem:[#allocation2 + $0x24] sm:$0xff]   ;;  %v1275_v58 = vrot.slane %v7068_v45, 1  ;;  %v6466_v13 = vld [vmem:[%s9592_s1 + $0xf0] ss:$8 sps:$4 sm:$0xff]  }
  0x9f   : > { %v7450_v4 = vsel %vm1039_vm9, %v1202_v52, %v1206_v15  ;;  %852 = vst [vmem:[#allocation2 + $0xc0] sm:$0xf] %v851_v37  ;;  %v7461_v36 = vld [vmem:[#allocation2 + $0xb4] sm:$0xff]   ;;  %v1274_v26 = vrot.slane %v7464_v5, 1  ;;  %v1213_v43 = vrot.slane %v1211_v34, 1  ;;  %vm2772_vm12 = vcmask 1040384  }
  0xa0   : > { %1258 = vrot.lane.b32.xlu0 %v7450_v4, %s6780_s28  ;;  %v6467_v6 = vld [vmem:[%s9592_s1 + $0xe4] ss:$8 sps:$4 sm:$0xff]   ;;  %v6479_v52 = vld [vmem:[%s9592_s1 + $0x174] ss:$8 sps:$4 sm:$0xff]   ;;  %v6481_v45 = vld [vmem:[%s9592_s1 + $0x170] ss:$8 sps:$4 sm:$0xff]  }
  0xa1   : > { %2091 = vmatpush1.bf16.msra.mxu0 %v6463_v32  ;;  %v7487_v11 = vsel %vm1264_vm10, %v1274_v26, %v1275_v58  ;;  %v1223_v63 = vshll.u32 %v7461_v36, 16  ;;  %v6469_v3 = vld [vmem:[%s9592_s1 + $0xe0] ss:$8 sps:$4 sm:$0xff]   ;;  %2269 = vmatprep.subr.bf16.mxu1 %v6479_v52  ;;  %v1214_v54 = vor.u32 %v1213_v43, %v1209_v38  ;;  %v6470_v15 = vld [vmem:[%s9592_s1 + $0xd4] ss:$8 sps:$4 sm:$0xff]   ;;  %v1221_v32 = vshrl.u32 %v7461_v36, 16  ;;  %vm8003_vm13 = vmand %vm2772_vm12, %vm276_vm2 }
  0xa2   : > { %2092 = vmatprep.subr.bf16.mxu0 %v6464_v29  ;;  %2270 = vmatpush1.bf16.msra.mxu1 %v6481_v45  ;;  %v6485_v18 = vld [vmem:[%s9592_s1 + $0x164] ss:$8 sps:$4 sm:$0xff]   ;;  %v6487_v37 = vld [vmem:[%s9592_s1 + $0x160] ss:$8 sps:$4 sm:$0xff]   ;;  %v6472_v38 = vld [vmem:[%s9592_s1 + $0xd0] ss:$8 sps:$4 sm:$0xff]  }
  0xa3   : > { %v847_v48 = vld [vmem:[#allocation2 + $0xbc] sm:$0x1]  ;;  %v1225_v29 = vrot.slane %v1223_v63, 1  ;;  %2271 = vmatprep.subr.bf16.mxu1 %v6485_v18  ;;  %v6473_v52 = vld [vmem:[%s9592_s1 + $0xc4] ss:$8 sps:$4 sm:$0xff]   ;;  %v1281_v18 = vrot.slane %v7145_v55, 1  ;;  %vm8016_vm14 = vmand %vm2772_vm12, %vm332_vm4 }
  0xa4   : > { %v848_v49 = vsel %vm6912_vm3, %v676_v28, %v847_v48  ;;  %1346 = vrot.lane.b32.xlu0 %v7461_v36, %s6780_s28  ;;  %v7484_v7 = vld [vmem:[#allocation2 + $0xb0] ss:$0 sps:$4 sm:$0x11]   ;;  %v6491_v58 = vld [vmem:[%s9592_s1 + $0x154] ss:$8 sps:$4 sm:$0xff]   ;;  %vm3300_vm15 = vcmask 1043456  }
  0xa5   : > { %849 = vst [vmem:[#allocation2 + $0xbc] sm:$0x1] %v848_v49  ;;  %v1216_v10 = vshll.u32 %v7484_v7, 16  ;;  %2093 = vmatpush2.bf16.msra.mxu0 %v6466_v13  ;;  %v6493_v13 = vld [vmem:[%s9592_s1 + $0x150] ss:$8 sps:$4 sm:$0xff]   ;;  %v1278_v49 = vrot.slane %v7095_v16, 1  ;;  %v1226_v45 = vor.u32 %v1225_v29, %v1221_v32  ;;  %vm8279_vm0 = vmand %vm3300_vm15, %vm332_vm4 }
  0xa6   : > { %2094 = vmatprep.subr.bf16.mxu0 %v6467_v6  ;;  %v7505_v28 = vld [vmem:[#allocation2 + $0xc0] sm:$0xff]   ;;  %2272 = vmatpush1.bf16.msra.mxu1 %v6487_v37  ;;  %v7524_v48 = vld [vmem:[#allocation2 + $0x30] sm:$0xff]   ;;  %v1284_v29 = vrot.slane %v7168_v40, 1  ;;  %v1287_v40 = vrot.slane %v7202_v25, 1 }
  0xa7   : > { %v1218_v34 = vrot.slane %v1216_v10, 1  ;;  %v1277_v6 = vrot.slane %v7524_v48, 1  ;;  %2273 = vmatprep.subr.bf16.mxu1 %v6491_v58  ;;  %v6499_v16 = vld [vmem:[%s9592_s1 + $0x140] ss:$8 sps:$4 sm:$0xff]   ;;  %v6476_v58 = vld [vmem:[%s9592_s1 + $0xb4] ss:$8 sps:$4 sm:$0xff]  }
  0xa8   : > { %1372 = vrot.lane.b32.xlu0 %v7487_v11, %s6780_s28  ;;  %v6475_v37 = vld [vmem:[%s9592_s1 + $0xc0] ss:$8 sps:$4 sm:$0xff]  }
  0xa9   : > { %v7512_v26 = vsel %vm1039_vm9, %v1214_v54, %v1218_v34  ;;  %2095 = vmatpush2.bf16.msra.mxu0 %v6469_v3  ;;  %v6497_v54 = vld [vmem:[%s9592_s1 + $0x144] ss:$8 sps:$4 sm:$0xff]   ;;  %v7535_v3 = vld [vmem:[#allocation2 + $0x3c] sm:$0xff]   ;;  %v1283_v34 = vrot.slane %v7118_v42, 1  ;;  %v7549_v32 = vsel %vm1264_vm10, %v1277_v6, %v1278_v49  ;;  %v6478_v49 = vld [vmem:[%s9592_s1 + $0xb0] ss:$8 sps:$4 sm:$0xff]  }
  0xaa   : > { %1260 = vrot.lane.b32.xlu1 %v7512_v26, %s6780_s28  ;;  %2096 = vmatprep.subr.bf16.mxu0 %v6470_v15  ;;  %v1280_v10 = vrot.slane %v7535_v3, 1  ;;  %v6503_v42 = vld [vmem:[%s9592_s1 + $0x134] ss:$8 sps:$4 sm:$0xff]   ;;  %v6535_v0 = vld [vmem:[%s9592_s1 + $0x1a0] ss:$8 sps:$4 sm:$0xff]  }
  0xab   : > { %2274 = vmatpush1.bf16.msra.mxu1 %v6493_v13  ;;  %v6505_v13 = vld [vmem:[%s9592_s1 + $0x130] ss:$8 sps:$4 sm:$0xff]  }
  0xac   : > { %v7522_v43 = vld [vmem:[#allocation2 + $0xbc] ss:$0 sps:$4 sm:$0x11]   ;;  %2275 = vmatprep.subr.bf16.mxu1 %v6497_v54  ;;  %v7571_v6 = vsel %vm1264_vm10, %v1280_v10, %v1281_v18  ;;  %v7581_v54 = vsel %vm1264_vm10, %v1283_v34, %v1284_v29  ;;  %v6482_v10 = vld [vmem:[%s9592_s1 + $0xa4] ss:$8 sps:$4 sm:$0xff]   ;;  %v1293_v29 = vrot.slane %v7268_v51, 1 }
  0xad   : > { %v1228_v63 = vshll.u32 %v7522_v43, 16  ;;  %2097 = vmatpush2.bf16.msra.mxu0 %v6472_v38  ;;  %v1286_v38 = vrot.slane %v7150_v23, 1  ;;  %v1289_v23 = vrot.slane %v7182_v62, 1  ;;  %v6506_v62 = vld [vmem:[%s9592_s1 + $0x124] ss:$8 sps:$4 sm:$0xff]  }
  0xae   : > { %1348 = vrot.lane.b32.xlu1 %v7505_v28, %s6780_s28  ;;  %2098 = vmatprep.subr.bf16.mxu0 %v6473_v52  ;;  %v7577_v52 = vld [vmem:[#allocation2] sm:$0xff]  }
  0xaf   : > { %v1230_v15 = vrot.slane %v1228_v63, 1  ;;  %2276 = vmatpush1.bf16.msra.mxu1 %v6499_v16  ;;  %v1265_v25 = vrot.slane %v7577_v52, 1  ;;  %v1290_v16 = vrot.slane %v7220_v35, 1  ;;  %v6508_v18 = vld [vmem:[%s9592_s1 + $0x120] ss:$8 sps:$4 sm:$0xff]  }
  0xb0   : > { %2277 = vmatprep.subr.bf16.mxu1 %v6503_v42  ;;  %v6484_v35 = vld [vmem:[%s9592_s1 + $0xa0] ss:$8 sps:$4 sm:$0xff]   ;;  %v6488_v42 = vld [vmem:[%s9592_s1 + $0x94] ss:$8 sps:$4 sm:$0xff]  }
  0xb1   : > { %v7559_v55 = vsel %vm1039_vm9, %v1226_v45, %v1230_v15  ;;  %2099 = vmatpush2.bf16.msra.mxu0 %v6475_v37  ;;  %v6663_v45 = vld [vmem:[#allocation2 + $0x8] ss:$0 sps:$4 sm:$0x11]   ;;  %v7593_v15 = vsel %vm1264_vm10, %v1286_v38, %v1287_v40  ;;  %v1292_v37 = vrot.slane %v7211_v56, 1  ;;  %v1295_v38 = vrot.slane %v7242_v12, 1 }
  0xb2   : > { %1262 = vrot.lane.b32.xlu0 %v7559_v55, %s6780_s28  ;;  %1374 = vrot.lane.b32.xlu1 %v7549_v32, %s6780_s28  ;;  %v1266_v63 = vrot.slane %v6663_v45, 1  ;;  %v1296_v40 = vrot.slane %v7295_v17, 1  ;;  %v6509_v56 = vld [vmem:[%s9592_s1 + $0x114] ss:$8 sps:$4 sm:$0xff]   ;;  %v6490_v12 = vld [vmem:[%s9592_s1 + $0x90] ss:$8 sps:$4 sm:$0xff]  }
  0xb3   : > { %2100 = vmatprep.subr.bf16.mxu0 %v6476_v58  ;;  %2278 = vmatpush1.bf16.msra.mxu1 %v6505_v13  ;;  %v7607_v58 = vsel %vm1264_vm10, %v1289_v23, %v1290_v16  ;;  %v1319_v13 = vpop.permute.xlu0 %1318  ;;  %v7629_v17 = vsel %vm1264_vm10, %v1292_v37, %v1293_v29  ;;  %v1298_v23 = vrot.slane %v7272_v60, 1  ;;  %v6494_v45 = vld [vmem:[%s9592_s1 + $0x84] ss:$8 sps:$4 sm:$0xff]   ;;  %v6496_v16 = vld [vmem:[%s9592_s1 + $0x80] ss:$8 sps:$4 sm:$0xff]   ;;  %v1301_v60 = vrot.slane %v7319_v9, 1 }
  0xb4   : > { %v1267_v34 = vsel %vm1264_vm10, %v1265_v25, %v1266_v63  ;;  %2279 = vmatprep.subr.bf16.mxu1 %v6506_v62  ;;  %v1299_v25 = vrot.slane %v7327_v30, 1  ;;  %v7637_v63 = vsel %vm1264_vm10, %v1295_v38, %v1296_v40  ;;  %v1302_v30 = vrot.slane %v7357_v53, 1  ;;  %v1321_v62 = vpop.permute.xlu1 %1320  ;;  %v6515_v53 = vld [vmem:[%s9592_s1 + $0x1f4] ss:$8 sps:$4 sm:$0xff]   ;;  %v382_v37 = vld [vmem:[#allocation2 + $0xc8] sm:$0x1] }
  0xb5   : > { %2101 = vmatpush2.bf16.msra.mxu0 %v6478_v49  ;;  %v1478_v51 = vsel %vm1427_vm11, %v1267_v34, %v1319_v13  ;;  %v6511_v49 = vld [vmem:[%s9592_s1 + $0x110] ss:$8 sps:$4 sm:$0xff]   ;;  %v1304_v34 = vrot.slane %v7338_v39, 1  ;;  %v1307_v38 = vrot.slane %v7399_v61, 1  ;;  %v1308_v40 = vrot.slane %v7484_v7, 1 }
  0xb6   : > { %1376 = vrot.lane.b32.xlu0 %v7571_v6, %s6780_s28  ;;  %1378 = vrot.lane.b32.xlu1 %v7581_v54, %s6780_s28  ;;  %v7660_v9 = vsel %vm1264_vm10, %v1298_v23, %v1299_v25  ;;  %v383_v13 = vsel %vm6926_vm6, 0, %v382_v37  ;;  %v6517_v39 = vld [vmem:[%s9592_s1 + $0x1f0] ss:$8 sps:$4 sm:$0xff]   ;;  %v385_v61 = vld [vmem:[#allocation2 + $0xd4] sm:$0x1]  ;;  %v693_v25 = vrot.slane %v7417_v27, 4 }
  0xb7   : > { %2102 = vmatprep.subr.bf16.mxu0 %v6482_v10  ;;  %2280 = vmatpush1.bf16.msra.mxu1 %v6508_v18  ;;  %v6512_v10 = vld [vmem:[%s9592_s1 + $0x104] ss:$8 sps:$4 sm:$0xff]   ;;  %v7652_v18 = vld [vmem:[%s9592_s1 + $0x234] ss:$8 sps:$4 sm:$0xff]   ;;  %v1233_v29 = vpop.permute.xlu0 %1232  ;;  %384 = vst [vmem:[#allocation2 + $0xc8] sm:$0x1] %v383_v13 }
  0xb8   : > { %2108 = vmatprep.mubr.bf16.mxu0 %v1478_v51  ;;  %2281 = vmatprep.subr.bf16.mxu1 %v6509_v56  ;;  %v7674_v56 = vld [vmem:[%s9592_s1 + $0x230] ss:$8 sps:$4 sm:$0xff]   ;;  %v7680_v51 = vsel %vm1264_vm10, %v1301_v60, %v1302_v30  ;;  %v6518_v23 = vld [vmem:[%s9592_s1 + $0x1e4] ss:$8 sps:$4 sm:$0xff]   ;;  %v6521_v60 = vld [vmem:[%s9592_s1 + $0x1d4] ss:$8 sps:$4 sm:$0xff]  }
  0xb9   : > { %2103 = vmatpush2.bf16.msra.mxu0 %v6484_v35  ;;  %v6514_v35 = vld [vmem:[%s9592_s1 + $0x100] ss:$8 sps:$4 sm:$0xff]   ;;  %v7707_v27 = vld [vmem:[%s9592_s1 + $0x224] ss:$8 sps:$4 sm:$0xff]   ;;  %v1354_v13 = vshrl.u32 %v7505_v28, 16 }
  0xba   : > { %1380 = vrot.lane.b32.xlu0 %v7593_v15, %s6780_s28  ;;  %1382 = vrot.lane.b32.xlu1 %v7607_v58, %s6780_s28  ;;  %v7719_v30 = vld [vmem:[%s9592_s1 + $0x220] ss:$8 sps:$4 sm:$0xff]  }
  0xbb   : > { %2104 = vmatprep.subr.bf16.mxu0 %v6488_v42  ;;  %2282 = vmatpush1.bf16.msra.mxu1 %v6511_v49  ;;  %v1305_v42 = vrot.slane %v7424_v59, 1  ;;  %v329_v59 = vld [vmem:[#allocation2 + $0xcc] sm:$0x1]  ;;  %v386_v49 = vsel %vm6926_vm6, 0, %v385_v61  ;;  %v7753_v61 = vld [vmem:[%s9592_s1 + $0x210] ss:$8 sps:$4 sm:$0xff]  }
  0xbc   : > { %2283 = vmatprep.subr.bf16.mxu1 %v6512_v10  ;;  %v330_v7 = vsel %vm6912_vm3, 0, %v329_v59  ;;  %v1310_v10 = vrot.slane %v7461_v36, 1  ;;  %387 = vst [vmem:[#allocation2 + $0xd4] sm:$0x1] %v386_v49  ;;  %v1311_v36 = vrot.slane %v7522_v43, 1 }
  0xbd   : > { %2105 = vmatpush2.bf16.msra.mxu0 %v6490_v12  ;;  %v1429_v12 = vsel %vm1427_vm11, %v7577_v52, %v1233_v29  ;;  %331 = vst [vmem:[#allocation2 + $0xcc] sm:$0x1] %v330_v7  ;;  %v6520_v52 = vld [vmem:[%s9592_s1 + $0x1e0] ss:$8 sps:$4 sm:$0xff]   ;;  %v7727_v43 = vld [vmem:[%s9592_s1 + $0x214] ss:$8 sps:$4 sm:$0xff]  }
  0xbe   : > { %1384 = vrot.lane.b32.xlu0 %v7629_v17, %s6780_s28  ;;  %1386 = vrot.lane.b32.xlu1 %v7637_v63, %s6780_s28  ;;  %v854_v37 = vld [vmem:[#allocation2 + $0xc8] sm:$0x1]  ;;  %v6664_v29 = vld [vmem:[#allocation2 + $0x18] sm:$0xff]   ;;  %v6665_v7 = vld [vmem:[#allocation2 + $0xc] sm:$0xff]  }
  0xbf   : > { %2106 = vmatprep.subr.bf16.mxu0 %v6494_v45  ;;  %2284 = vmatpush1.bf16.msra.mxu1 %v6514_v35  ;;  %v1356_v45 = vshll.u32 %v7505_v28, 16  ;;  %v1235_v14 = vpop.permute.xlu1 %1234  ;;  %v7722_v35 = vsel %vm1264_vm10, %v1307_v38, %v1308_v40  ;;  %v6524_v38 = vld [vmem:[%s9592_s1 + $0x1c4] ss:$8 sps:$4 sm:$0xff]   ;;  %v855_v40 = vsel %vm6912_vm3, %v693_v25, %v854_v37 }
  0xc0   : > { %2285 = vmatprep.subr.bf16.mxu1 %v6515_v53  ;;  %856 = vst [vmem:[#allocation2 + $0xc8] sm:$0x1] %v855_v40  ;;  %v1432_v49 = vsel %vm1427_vm11, %v6665_v7, %v1235_v14  ;;  %v7769_v14 = vld [vmem:[%s9592_s1 + $0x204] ss:$8 sps:$4 sm:$0xff]  }
  0xc1   : > { %2107 = vmatpush2.bf16.msra.mxu0 %v6496_v16  ;;  %v1482_v16 = vsel %vm1427_vm11, %v7360_v57, %v1321_v62  ;;  %v7714_v57 = vsel %vm1264_vm10, %v1304_v34, %v1305_v42  ;;  %v1323_v62 = vpop.permute.xlu0 %1322  ;;  %v6523_v34 = vld [vmem:[%s9592_s1 + $0x1d0] ss:$8 sps:$4 sm:$0xff]  }
  0xc2   : > { %1388 = vrot.lane.b32.xlu0 %v7660_v9, %s6780_s28  ;;  %2470 = vmatprep.subr.bf16.mxu0 %v7652_v18  ;;  %v1486_v25 = vsel %vm1427_vm11, %v7427_v46, %v1323_v62 }
  0xc3   : > { %1390 = vrot.lane.b32.xlu1 %v7680_v51, %s6780_s28  ;;  %2286 = vmatpush2.bf16.msra.mxu1 %v6517_v39  ;;  %v1237_v53 = vpop.permute.xlu1 %1236  ;;  %v7746_v39 = vsel %vm1264_vm10, %v1310_v10, %v1311_v36  ;;  %v7757_v1 = vld [vmem:[#allocation2 + $0xd4] ss:$0 sps:$4 sm:$0x11]   ;;  %v6526_v10 = vld [vmem:[%s9592_s1 + $0x1c0] ss:$8 sps:$4 sm:$0xff]  }
  0xc4   : > { %2109 = vmatmul.mubr.bf16.vlgmr.msra.gmra.mxu0 %v1429_v12  ;;  %2287 = vmatprep.subr.bf16.mxu1 %v6518_v23  ;;  %v1435_v42 = vsel %vm1427_vm11, %v6664_v29, %v1237_v53  ;;  %v7748_v59 = vld [vmem:[#allocation2 + $0xcc] sm:$0xff]   ;;  %9616 = vst [vmem:[#allocation11_spill] sm:$0xff] %v7757_v1  ;;  %v1365_v12 = vrot.slane %v7505_v28, 1  ;;  %v1358_v28 = vrot.slane %v1356_v45, 1  ;;  %v7780_v36 = vld [vmem:[%s9592_s1 + $0x200] ss:$8 sps:$4 sm:$0xff]  }
  0xc5   : > { %2471 = vmatpush1.bf16.msra.mxu0 %v7674_v56  ;;  %2118 = vmatprep.mubr.bf16.mxu0 %v1482_v16  ;;  %v1325_v23 = vpop.permute.xlu0 %1324  ;;  %v6530_v16 = vld [vmem:[%s9592_s1 + $0x1b4] ss:$8 sps:$4 sm:$0xff]   ;;  %v1416_v62 = vshll.u32 %v7757_v1, 16  ;;  %v6532_v45 = vld [vmem:[%s9592_s1 + $0x1b0] ss:$8 sps:$4 sm:$0xff]  }
  0xc6   : > { %1392 = vrot.lane.b32.xlu0 %v7714_v57, %s6780_s28  ;;  %2472 = vmatprep.subr.bf16.mxu0 %v7707_v27  ;;  %v6533_v53 = vld [vmem:[%s9592_s1 + $0x1a4] ss:$8 sps:$4 sm:$0xff]   ;;  %v1359_v40 = vor.u32 %v1358_v28, %v1354_v13  ;;  %v6538_v28 = vld [vmem:[%s9592_s1 + $0x190] ss:$8 sps:$4 sm:$0xff]  }
  0xc7   : > { %1394 = vrot.lane.b32.xlu1 %v7722_v35, %s6780_s28  ;;  %2301 = vmatprep.mubr.bf16.mxu1 %v1435_v42  ;;  %v1418_v1 = vrot.slane %v1416_v62, 1 }
  0xc8   : > { %2288 = vmatpush2.bf16.msra.mxu1 %v6520_v52  ;;  %v1411_v52 = vshll.u32 %v7748_v59, 16 }
  0xc9   : > { %2289 = vmatprep.subr.bf16.mxu1 %v6521_v60  ;;  %2473 = vmatpush1.bf16.msra.mxu0 %v7719_v30  ;;  %v1409_v60 = vshrl.u32 %v7748_v59, 16  ;;  %v1327_v29 = vpop.permute.xlu0 %1326 }
  0xca   : > { %2474 = vmatprep.subr.bf16.mxu0 %v7727_v43  ;;  %v1413_v37 = vrot.slane %v1411_v52, 1  ;;  %v6536_v52 = vld [vmem:[%s9592_s1 + $0x194] ss:$8 sps:$4 sm:$0xff]   ;;  %v1494_v62 = vsel %vm1427_vm11, %v7549_v32, %v1327_v29 }
  0xcb   : > { %1396 = vrot.lane.b32.xlu1 %v7746_v39, %s6780_s28 }
  0xcc   : > { %2119 = vmatmul.mubr.bf16.gmra.mxu0 %v1432_v49  ;;  %2290 = vmatpush2.bf16.msra.mxu1 %v6523_v34  ;;  %v6539_v34 = vld [vmem:[#allocation2 + $0xc8] ss:$0 sps:$4 sm:$0x11]  }
  0xcd   : > { %2128 = vmatprep.mubr.bf16.mxu0 %v1486_v25  ;;  %2291 = vmatprep.subr.bf16.mxu1 %v6524_v38  ;;  %v1239_v38 = vpop.permute.xlu1 %1238  ;;  %v1361_v7 = vshll.u32 %v6539_v34, 16  ;;  %v1366_v49 = vrot.slane %v6539_v34, 1  ;;  %v1490_v25 = vsel %vm1427_vm11, %v7487_v11, %v1325_v23 }
  0xce   : > { %2475 = vmatpush1.bf16.msra.mxu0 %v7753_v61 }
  0xcf   : > { %2476 = vmatprep.subr.bf16.mxu0 %v7769_v14  ;;  %v1363_v20 = vrot.slane %v1361_v7, 1  ;;  %v7802_v13 = vsel %vm1264_vm10, %v1365_v12, %v1366_v49  ;;  %v6666_v49 = vld [vmem:[#allocation2 + $0x48] sm:$0xff]  }
  0xd0   : > { %2292 = vmatpush2.bf16.msra.mxu1 %v6526_v10  ;;  %v1414_v10 = vor.u32 %v1413_v37, %v1409_v60  ;;  %1398 = vrot.lane.b32.xlu1 %v7802_v13, %s6780_s28 }
  0xd1   : > { %2293 = vmatprep.subr.bf16.mxu1 %v6530_v16  ;;  %v7805_v23 = vsel %vm1039_vm9, %v1359_v40, %v1363_v20  ;;  %v1329_v16 = vpop.permute.xlu0 %1328  ;;  %v1241_v12 = vpop.permute.xlu1 %1240  ;;  %v1438_v20 = vsel %vm1427_vm11, %v7464_v5, %v1239_v38 }
  0xd2   : > { %2477 = vmatpush1.bf16.msra.mxu0 %v7780_v36  ;;  %1420 = vrot.lane.b32.xlu0 %v7805_v23, %s6780_s28  ;;  %v1419_v60 = vsel %vm1039_vm9, %v1414_v10, %v1418_v1  ;;  %v1498_v1 = vsel %vm1427_vm11, %v7571_v6, %v1329_v16  ;;  %v6667_v16 = vld [vmem:[#allocation2 + $0x54] sm:$0xff]  }
  0xd4   : > { %2129 = vmatmul.mubr.bf16.gmra.mxu0 %v1435_v42  ;;  %2294 = vmatpush2.bf16.msra.mxu1 %v6532_v45  ;;  %v6540_v42 = vld [vmem:[%s9592_s1 + $0x184] ss:$8 sps:$4 sm:$0xff]   ;;  %v6542_v45 = vld [vmem:[%s9592_s1 + $0x180] ss:$8 sps:$4 sm:$0xff]  }
  0xd5   : > { %2138 = vmatprep.mubr.bf16.mxu0 %v1490_v25  ;;  %2295 = vmatprep.subr.bf16.mxu1 %v6533_v53 }
  0xd6   : > { %1422 = vrot.lane.b32.xlu0 %v1419_v60, %s6780_s28  ;;  %s9543_s28 = scalar_lea.hbm %s9597_s6, %s5822_s9 }
  0xd7   : > { %v1331_v53 = vpop.permute.xlu0 %1330 }
  0xd8   : > { %2296 = vmatpush2.bf16.msra.mxu1 %v6535_v0  ;;  %v1441_v0 = vsel %vm1427_vm11, %v7524_v48, %v1241_v12  ;;  %v1502_v7 = vsel %vm1427_vm11, %v7581_v54, %v1331_v53  ;;  %v6668_v53 = vld [vmem:[#allocation2 + $0x60] sm:$0xff]  }
  0xd9   : > { %2297 = vmatprep.subr.bf16.mxu1 %v6536_v52 }
  0xdc   : > { %2139 = vmatmul.mubr.bf16.gmra.mxu0 %v1438_v20  ;;  %2298 = vmatpush2.bf16.msra.mxu1 %v6538_v28  ;;  %v1243_v34 = vpop.permute.xlu1 %1242 }
  0xdd   : > { %2148 = vmatprep.mubr.bf16.mxu0 %v1494_v62  ;;  %2299 = vmatprep.subr.bf16.mxu1 %v6540_v42  ;;  %v7833_v40 = vsel %vm1427_vm11, %v7535_v3, %v1243_v34 }
  0xde   : > { %v1333_v5 = vpop.permute.xlu0 %1332 }
  0xdf   : > { %v1506_v52 = vsel %vm1427_vm11, %v7593_v15, %v1333_v5 }
  0xe0   : > { %2300 = vmatpush2.bf16.msra.mxu1 %v6542_v45 }
  0xe1   : > { %6343 = vmatprep.subr.bf16.mxu1 %v7652_v18 }
  0xe2   : > { %v1245_v37 = vpop.permute.xlu1 %1244 }
  0xe3   : > { %v7839_v25 = vsel %vm1427_vm11, %v6666_v49, %v1245_v37 }
  0xe4   : > { %2149 = vmatmul.mubr.bf16.gmra.mxu0 %v1441_v0  ;;  %v1335_v29 = vpop.permute.xlu0 %1334 }
  0xe5   : > { %2158 = vmatprep.mubr.bf16.mxu0 %v1498_v1  ;;  %v1510_v60 = vsel %vm1427_vm11, %v7607_v58, %v1335_v29 }
  0xe7   : > { %v1247_v38 = vpop.permute.xlu1 %1246 }
  0xe8   : > { %v7845_v28 = vsel %vm1427_vm11, %v6667_v16, %v1247_v38 }
  0xeb   : > { %v1249_v18 = vpop.permute.xlu1 %1248 }
  0xec   : > { %2159 = vmatmul.mubr.bf16.gmra.mxu0 %v7833_v40  ;;  %v1337_v48 = vpop.permute.xlu0 %1336  ;;  %v7851_v34 = vsel %vm1427_vm11, %v6668_v53, %v1249_v18 }
  0xed   : > { %2168 = vmatprep.mubr.bf16.mxu0 %v1502_v7  ;;  %v1514_v1 = vsel %vm1427_vm11, %v7629_v17, %v1337_v48  ;;  %v6669_v7 = vld [vmem:[#allocation2 + $0x6c] sm:$0xff]  }
  0xf1   : > { %v1339_v10 = vpop.permute.xlu0 %1338 }
  0xf2   : > { %v1518_v48 = vsel %vm1427_vm11, %v7637_v63, %v1339_v10 }
  0xf4   : > { %2169 = vmatmul.mubr.bf16.gmra.mxu0 %v7839_v25 }
  0xf5   : > { %2178 = vmatprep.mubr.bf16.mxu0 %v1506_v52 }
  0xf6   : > { %v1251_v3 = vpop.permute.xlu1 %1250 }
  0xf7   : > { %v7861_v18 = vsel %vm1427_vm11, %v6669_v7, %v1251_v3  ;;  %v6672_v3 = vld [vmem:[#allocation2 + $0x90] sm:$0xff]  }
  0xfa   : > { %v1341_v42 = vpop.permute.xlu0 %1340 }
  0xfc   : > { %v1253_v12 = vpop.permute.xlu1 %1252  ;;  %2179 = vmatmul.mubr.bf16.gmra.mxu0 %v7845_v28 }
  0xfd   : > { %2188 = vmatprep.mubr.bf16.mxu0 %v1510_v60 }
  0xfe   : > { %v1343_v62 = vpop.permute.xlu0 %1342 }
 0x101   : > { %v1255_v45 = vpop.permute.xlu1 %1254 }
 0x102   : > { %v1369_v5 = vpop.permute.xlu0 %1368 }
 0x103   : > { %v1542_v37 = vsel %vm1427_vm11, %v7047_v22, %v1369_v5 }
 0x104   : > { %2302 = vmatmul.mubr.bf16.vlgmr.msra.gmra.mxu1 %v1542_v37  ;;  %2189 = vmatmul.mubr.bf16.gmra.mxu0 %v7851_v34 }
 0x105   : > { %2311 = vmatprep.mubr.bf16.mxu1 %v1438_v20  ;;  %2198 = vmatprep.mubr.bf16.mxu0 %v1514_v1  ;;  %v6670_v20 = vld [vmem:[#allocation2 + $0x78] sm:$0xff]   ;;  %v6674_v1 = vld [vmem:[#allocation2 + $0xa8] sm:$0xff]  }
 0x106   : > { %6347 = vmatpush1.bf16.msra.mxu1 %v7674_v56  ;;  %v1459_v49 = vsel %vm1427_vm11, %v6670_v20, %v1253_v12 }
 0x107   : > { %v1257_v29 = vpop.permute.xlu1 %1256  ;;  %6344 = vmatprep.subr.bf16.mxu1 %v7707_v27 }
 0x108   : > { %v1465_v16 = vsel %vm1427_vm11, %v6672_v3, %v1257_v29 }
 0x10a   : > { %6348 = vmatpush1.bf16.msra.mxu1 %v7719_v30  ;;  %v1522_v30 = vsel %vm1427_vm11, %v7660_v9, %v1341_v42 }
 0x10b   : > { %v1345_v38 = vpop.permute.xlu1 %1344  ;;  %6345 = vmatprep.subr.bf16.mxu1 %v7727_v43 }
 0x10c   : > { %2199 = vmatmul.mubr.bf16.gmra.mxu0 %v7861_v18 }
 0x10d   : > { %2208 = vmatprep.mubr.bf16.mxu0 %v1518_v48  ;;  %v9617_v48 = vmov 0  }
 0x10e   : > { %6349 = vmatpush1.bf16.msra.mxu1 %v7753_v61  ;;  %v6671_v61 = vld [vmem:[#allocation2 + $0x84] sm:$0xff]  }
 0x10f   : > { %v1371_v22 = vpop.permute.xlu1 %1370  ;;  %6346 = vmatprep.subr.bf16.mxu1 %v7769_v14  ;;  %v1462_v14 = vsel %vm1427_vm11, %v6671_v61, %v1255_v45  ;;  %v6551_v61 = vld [vmem:[#allocation4 + $0x78] sm:$0xff]  }
 0x110   : > { %v1546_v56 = vsel %vm1427_vm11, %v7054_v33, %v1371_v22 }
 0x111   : > { %2312 = vmatmul.mubr.bf16.gmra.mxu1 %v1546_v56  ;;  %v6676_v56 = vld [vmem:[#allocation2 + $0xc0] sm:$0xff]  }
 0x112   : > { %v1259_v27 = vpop.permute.xlu0 %1258  ;;  %2321 = vmatprep.mubr.bf16.mxu1 %v1441_v0  ;;  %6350 = vmatpush1.bf16.msra.mxu1 %v7780_v36  ;;  %v1526_v0 = vsel %vm1427_vm11, %v7680_v51, %v1343_v62  ;;  %v6673_v62 = vld [vmem:[#allocation2 + $0x9c] sm:$0xff]  }
 0x113   : > { %v1468_v45 = vsel %vm1427_vm11, %v6673_v62, %v1259_v27  ;;  %5823 = vmatprep.subr.bf16.mxu1 %v6551_v61 }
 0x114   : > { %2209 = vmatmul.mubr.bf16.gmra.mxu0 %v1459_v49 }
 0x115   : > { %2218 = vmatprep.mubr.bf16.mxu0 %v1522_v30 }
 0x116   : > { %v1347_v43 = vpop.permute.xlu0 %1346 }
 0x117   : > { %v1534_v5 = vsel %vm1427_vm11, %v7722_v35, %v1347_v43 }
 0x11a   : > { %v1373_v52 = vpop.permute.xlu0 %1372 }
 0x11b   : > { %v1550_v33 = vsel %vm1427_vm11, %v7093_v8, %v1373_v52  ;;  %v1530_v8 = vsel %vm1427_vm11, %v7714_v57, %v1345_v38  ;;  %v6675_v38 = vld [vmem:[#allocation2 + $0xb4] sm:$0xff]  }
 0x11c   : > { %2322 = vmatmul.mubr.bf16.gmra.mxu1 %v1550_v33  ;;  %v1261_v10 = vpop.permute.xlu1 %1260  ;;  %2219 = vmatmul.mubr.bf16.gmra.mxu0 %v1462_v14 }
 0x11d   : > { %2331 = vmatprep.mubr.bf16.mxu1 %v7833_v40  ;;  %2228 = vmatprep.mubr.bf16.mxu0 %v1526_v0  ;;  %v1471_v37 = vsel %vm1427_vm11, %v6674_v1, %v1261_v10  ;;  %v6555_v10 = vld [vmem:[#allocation4 + $0x70] sm:$0xff]   ;;  %v6562_v1 = vld [vmem:[#allocation4 + $0x20] sm:$0xff]  }
 0x120   : > { %v1349_v36 = vpop.permute.xlu1 %1348 }
 0x121   : > { %v1538_v29 = vsel %vm1427_vm11, %v7746_v39, %v1349_v36  ;;  %v6556_v36 = vld [vmem:[#allocation4 + $0x30] sm:$0xff]  }
 0x124   : > { %v1263_v12 = vpop.permute.xlu0 %1262  ;;  %v1375_v42 = vpop.permute.xlu1 %1374  ;;  %2229 = vmatmul.mubr.bf16.gmra.mxu0 %v1465_v16 }
 0x125   : > { %v1554_v60 = vsel %vm1427_vm11, %v7125_v47, %v1375_v42  ;;  %2238 = vmatprep.mubr.bf16.mxu0 %v1530_v8  ;;  %v1474_v7 = vsel %vm1427_vm11, %v6675_v38, %v1263_v12  ;;  %v6558_v12 = vld [vmem:[#allocation4 + $0x28] sm:$0xff]   ;;  %v6559_v42 = vld [vmem:[#allocation4 + $0xf0] sm:$0xff]   ;;  %v9625_v38 = vmov 0 }
 0x126   : > { %2332 = vmatmul.mubr.bf16.gmra.mxu1 %v1554_v60  ;;  %v1424_v60 = vrot.slane %v7748_v59, 1  ;;  %v9626_v38 = vsel %vm8016_vm14, 4294967295, %v9625_v38 }
 0x127   : > { %2341 = vmatprep.mubr.bf16.mxu1 %v7839_v25  ;;  %9627 = vst [vmem:[#allocation15_spill] sm:$0xff] %v9626_v38 }
 0x128   : > { %v1377_v40 = vpop.permute.xlu0 %1376  ;;  %v1379_v47 = vpop.permute.xlu1 %1378 }
 0x129   : > { %v1558_v53 = vsel %vm1427_vm11, %v7173_v44, %v1377_v40  ;;  %v1562_v25 = vsel %vm1427_vm11, %v7200_v24, %v1379_v47  ;;  %v9621_v40 = vld [vmem:[#allocation11_spill] sm:$0xff] }
 0x12a   : > { %v1425_v62 = vrot.slane %v9621_v40, 1 }
 0x12c   : > { %2239 = vmatmul.mubr.bf16.gmra.mxu0 %v1468_v45  ;;  %v1381_v44 = vpop.permute.xlu0 %1380  ;;  %v1383_v24 = vpop.permute.xlu1 %1382 }
 0x12d   : > { %2248 = vmatprep.mubr.bf16.mxu0 %v1534_v5  ;;  %v1570_v22 = vsel %vm1427_vm11, %v7247_v19, %v1383_v24  ;;  %v6561_v5 = vld [vmem:[#allocation4 + $0xb0] sm:$0xff]  }
 0x12e   : > { %2342 = vmatmul.mubr.bf16.gmra.mxu1 %v1558_v53  ;;  %v2777_v53 = vld [vmem:[#allocation3 + $0xc] sm:$0x1] }
 0x12f   : > { %2351 = vmatprep.mubr.bf16.mxu1 %v7845_v28  ;;  %v1566_v28 = vsel %vm1427_vm11, %v7226_v50, %v1381_v44 }
 0x134   : > { %2249 = vmatmul.mubr.bf16.gmra.mxu0 %v1471_v37 }
 0x135   : > { %2258 = vmatprep.mubr.bf16.mxu0 %v1538_v29  ;;  %v1426_v29 = vsel %vm1264_vm10, %v1424_v60, %v1425_v62  ;;  %v6578_v60 = vld [vmem:[#allocation4] sm:$0xff]  }
 0x136   : > { %2352 = vmatmul.mubr.bf16.gmra.mxu1 %v1562_v25  ;;  %v2774_v25 = vld [vmem:[#allocation3] sm:$0x1] }
 0x137   : > { %2361 = vmatprep.mubr.bf16.mxu1 %v7851_v34  ;;  %v1385_v34 = vpop.permute.xlu0 %1384 }
 0x138   : > { %v1574_v50 = vsel %vm1427_vm11, %v7301_v31, %v1385_v34  ;;  %v6566_v34 = vld [vmem:[#allocation4 + $0x18] sm:$0xff]  }
 0x13c   : > { %2259 = vmatmul.mubr.bf16.gmra.mxu0 %v1474_v7 }
 0x13d   : > { %2494 = vmatprep.mubr.bf16.mxu0 %v9617_v48 }
 0x13e   : > { %2362 = vmatmul.mubr.bf16.gmra.mxu1 %v1566_v28  ;;  %v6564_v28 = vld [vmem:[#allocation4 + $0x58] sm:$0xff]  }
 0x13f   : > { %2371 = vmatprep.mubr.bf16.mxu1 %v7861_v18  ;;  %v1387_v18 = vpop.permute.xlu1 %1386 }
 0x140   : > { %v1578_v19 = vsel %vm1427_vm11, %v7325_v21, %v1387_v18 }
 0x144   : > { %5625 = vmatmul.mubr.msk.bf16.vlgmr.msra.gmra.mxu0 %vm1427_vm11, %v7427_v46  ;;  %v1389_v46 = vpop.permute.xlu0 %1388 }
 0x145   : > { %2504 = vmatprep.mubr.bf16.mxu0 %v9617_v48  ;;  %v1582_v31 = vsel %vm1427_vm11, %v7363_v2, %v1389_v46  ;;  %v6567_v46 = vld [vmem:[#allocation4 + $0xe0] sm:$0xff]  }
 0x146   : > { %2372 = vmatmul.mubr.bf16.gmra.mxu1 %v1570_v22  ;;  %v6565_v22 = vld [vmem:[#allocation4 + $0xa8] sm:$0xff]  }
 0x147   : > { %2381 = vmatprep.mubr.bf16.mxu1 %v1459_v49 }
 0x14c   : > { %5626 = vmatmul.mubr.msk.bf16.gmra.mxu0 %vm1427_vm11, %v7487_v11  ;;  %v1391_v11 = vpop.permute.xlu1 %1390 }
 0x14d   : > { %2514 = vmatprep.mubr.bf16.mxu0 %v9617_v48  ;;  %v1586_v21 = vsel %vm1427_vm11, %v7392_v41, %v1391_v11  ;;  %v2780_v11 = vld [vmem:[#allocation3 + $0x18] sm:$0x1] }
 0x14e   : > { %2382 = vmatmul.mubr.bf16.gmra.mxu1 %v1574_v50  ;;  %v2829_v50 = vld [vmem:[#allocation3 + $0x8] sm:$0x1] }
 0x14f   : > { %2391 = vmatprep.mubr.bf16.mxu1 %v1462_v14  ;;  %v6552_v14 = vld [vmem:[#allocation4 + $0x38] sm:$0xff]  }
 0x154   : > { %5627 = vmatmul.mubr.msk.bf16.gmra.mxu0 %vm1427_vm11, %v7549_v32  ;;  %v1393_v32 = vpop.permute.xlu0 %1392 }
 0x155   : > { %2524 = vmatprep.mubr.bf16.mxu0 %v9617_v48  ;;  %v1590_v2 = vsel %vm1427_vm11, %v7450_v4, %v1393_v32  ;;  %v6569_v32 = vld [vmem:[#allocation4 + $0xa0] sm:$0xff]  }
 0x156   : > { %2392 = vmatmul.mubr.bf16.gmra.mxu1 %v1578_v19  ;;  %v2830_v19 = vsel %vm8016_vm14, 0, %v2829_v50  ;;  %v6584_v50 = vld [vmem:[#allocation4 + $0x80] sm:$0xff]  }
 0x157   : > { %2401 = vmatprep.mubr.bf16.mxu1 %v1465_v16  ;;  %v6554_v16 = vld [vmem:[#allocation4 + $0xb8] sm:$0xff]   ;;  %2831 = vst [vmem:[#allocation3 + $0x8] sm:$0x1] %v2830_v19 }
 0x158   : > { %v1421_v41 = vpop.permute.xlu0 %1420 }
 0x159   : > { %v1605_v27 = vsel %vm1427_vm11, %v6676_v56, %v1421_v41 }
 0x15c   : > { %5628 = vmatmul.mubr.msk.bf16.gmra.mxu0 %vm1427_vm11, %v7571_v6  ;;  %v1395_v6 = vpop.permute.xlu1 %1394 }
 0x15d   : > { %2534 = vmatprep.mubr.bf16.mxu0 %v9617_v48 }
 0x15e   : > { %2402 = vmatmul.mubr.bf16.gmra.mxu1 %v1582_v31  ;;  %v6580_v61 = vld [vmem:[#allocation3 + $0x8] ss:$0 sps:$4 sm:$0x11]  }
 0x15f   : > { %2411 = vmatprep.mubr.bf16.mxu1 %v1468_v45  ;;  %v3620_v40 = vshll.u32 %v6580_v61, 16 }
 0x160   : > { %v1397_v4 = vpop.permute.xlu1 %1396 }
 0x161   : > { %v1598_v20 = vsel %vm1427_vm11, %v7559_v55, %v1397_v4  ;;  %v6572_v4 = vld [vmem:[#allocation4 + $0x48] sm:$0xff]  }
 0x164   : > { %5629 = vmatmul.mubr.msk.bf16.gmra.mxu0 %vm1427_vm11, %v7581_v54  ;;  %v1594_v54 = vsel %vm1427_vm11, %v7512_v26, %v1395_v6  ;;  %v1399_v26 = vpop.permute.xlu1 %1398  ;;  %v6570_v6 = vld [vmem:[#allocation4 + $0x10] sm:$0xff]  }
 0x165   : > { %2544 = vmatprep.mubr.bf16.mxu0 %v9617_v48 }
 0x166   : > { %2412 = vmatmul.mubr.bf16.gmra.mxu1 %v1586_v21  ;;  %v6568_v21 = vld [vmem:[#allocation4 + $0x50] sm:$0xff]  }
 0x167   : > { %2421 = vmatprep.mubr.bf16.mxu1 %v1471_v37  ;;  %v6563_v37 = vld [vmem:[#allocation4 + $0xe8] sm:$0xff]  }
 0x16c   : > { %5630 = vmatmul.mubr.msk.bf16.gmra.mxu0 %vm1427_vm11, %v7593_v15  ;;  %v1423_v15 = vpop.permute.xlu0 %1422 }
 0x16d   : > { %2554 = vmatprep.mubr.bf16.mxu0 %v9617_v48  ;;  %v1608_v49 = vsel %vm1427_vm11, %v7748_v59, %v1423_v15  ;;  %v2778_v59 = vsel %vm8003_vm13, 0, %v2777_v53  ;;  %v6573_v15 = vld [vmem:[#allocation4 + $0x98] sm:$0xff]  }
 0x16e   : > { %2422 = vmatmul.mubr.bf16.gmra.mxu1 %v1590_v2  ;;  %2779 = vst [vmem:[#allocation3 + $0xc] sm:$0x1] %v2778_v59  ;;  %v2781_v2 = vsel %vm8003_vm13, 0, %v2780_v11 }
 0x16f   : > { %2431 = vmatprep.mubr.bf16.mxu1 %v1474_v7  ;;  %v2832_v7 = vld [vmem:[#allocation3 + $0x14] sm:$0x1]  ;;  %2782 = vst [vmem:[#allocation3 + $0x18] sm:$0x1] %v2781_v2 }
 0x170   : > { %v2833_v24 = vsel %vm8016_vm14, 0, %v2832_v7  ;;  %v6585_v2 = vld [vmem:[#allocation4 + $0x178] sm:$0xff]  }
 0x171   : > { %2834 = vst [vmem:[#allocation3 + $0x14] sm:$0x1] %v2833_v24 }
 0x174   : > { %5631 = vmatmul.mubr.msk.bf16.gmra.mxu0 %vm1427_vm11, %v7607_v58  ;;  %v1602_v58 = vsel %vm1427_vm11, %v7805_v23, %v1399_v26 }
 0x175   : > { %2564 = vmatprep.mubr.bf16.mxu0 %v9617_v48 }
 0x176   : > { %2432 = vmatmul.mubr.bf16.gmra.mxu1 %v1594_v54  ;;  %v6571_v54 = vld [vmem:[#allocation4 + $0xd8] sm:$0xff]  }
 0x177   : > { %2441 = vmatprep.mubr.bf16.mxu1 %v1605_v27  ;;  %v2835_v27 = vld [vmem:[#allocation3 + $0x20] sm:$0x1] }
 0x17c   : > { %5632 = vmatmul.mubr.msk.bf16.gmra.mxu0 %vm1427_vm11, %v7629_v17 }
 0x17d   : > { %2574 = vmatprep.mubr.bf16.mxu0 %v9617_v48 }
 0x17e   : > { %2442 = vmatmul.mubr.bf16.gmra.mxu1 %v1598_v20  ;;  %v2836_v20 = vsel %vm8016_vm14, 0, %v2835_v27 }
 0x17f   : > { %2451 = vmatprep.mubr.bf16.mxu1 %v1608_v49  ;;  %v6574_v49 = vld [vmem:[#allocation4 + $0x8] sm:$0xff]   ;;  %2837 = vst [vmem:[#allocation3 + $0x20] sm:$0x1] %v2836_v20  ;;  %v2789_v20 = vld [vmem:[#allocation3 + $0x3c] sm:$0x1] }
 0x184   : > { %v7950_v30 = vpop.f32.mrf.mxu0  ;;  %5633 = vmatmul.mubr.msk.bf16.gmra.mxu0 %vm1427_vm11, %v7637_v63 }
 0x185   : > { %2584 = vmatprep.mubr.bf16.mxu0 %v9617_v48 }
 0x186   : > { %2452 = vmatmul.mubr.bf16.gmra.mxu1 %v1602_v58  ;;  %v7956_v55 = vpop.f32.mrf.mxu0 }
 0x187   : > { %2614 = vmatprep.mubr.bf16.mxu1 %v9617_v48 }
 0x188   : > { %v7958_v17 = vpop.f32.mrf.mxu0 }
 0x18a   : > { %v7960_v43 = vpop.f32.mrf.mxu0 }
 0x18b   : > { %9618 = vst [vmem:[#allocation12_spill] sm:$0xff] %v7960_v43 }
 0x18c   : > { %v7962_v52 = vpop.f32.mrf.mxu0  ;;  %5634 = vmatmul.mubr.msk.bf16.gmra.mxu0 %vm1427_vm11, %v7660_v9 }
 0x18d   : > { %2594 = vmatprep.mubr.bf16.mxu0 %v9617_v48 }
 0x18e   : > { %5637 = vmatmul.mubr.msk.bf16.vlgmr.msra.gmra.mxu1 %vm1427_vm11, %v7722_v35  ;;  %v7970_v63 = vpop.f32.mrf.mxu0  ;;  %v6553_v35 = vld [vmem:[#allocation4 + $0xf8] sm:$0xff]  }
 0x18f   : > { %2624 = vmatprep.mubr.bf16.mxu1 %v9617_v48  ;;  %5824 = vmatpush3.bf16.msra.mxu1 %v6552_v14  ;;  %v6575_v14 = vld [vmem:[#allocation4 + $0xd0] sm:$0xff]  }
 0x190   : > { %v7972_v23 = vpop.f32.mrf.mxu0  ;;  %5935 = vmatprep.subr.bf16.mxu0 %v6553_v35  ;;  %5825 = vmatprep.subr.bf16.mxu1 %v6555_v10  ;;  %v2783_v10 = vld [vmem:[#allocation3 + $0x24] sm:$0x1] }
 0x191   : > { %5936 = vmatpush3.bf16.msra.mxu0 %v6554_v16  ;;  %v6577_v16 = vld [vmem:[#allocation4 + $0x90] sm:$0xff]  }
 0x192   : > { %v7974_v33 = vpop.f32.mrf.mxu0  ;;  %5937 = vmatprep.subr.bf16.mxu0 %v6559_v42  ;;  %v2784_v42 = vsel %vm8003_vm13, 0, %v2783_v10 }
 0x193   : > { %9619 = vst [vmem:[#allocation13_spill] sm:$0xff] %v7974_v33  ;;  %5826 = vmatpush3.bf16.msra.mxu1 %v6556_v36  ;;  %v6576_v36 = vld [vmem:[#allocation4 + $0x40] sm:$0xff]   ;;  %2785 = vst [vmem:[#allocation3 + $0x24] sm:$0x1] %v2784_v42  ;;  %v2792_v42 = vld [vmem:[#allocation3 + $0x48] sm:$0x1] }
 0x194   : > { %v7976_v0 = vpop.f32.mrf.mxu0  ;;  %5635 = vmatmul.mubr.msk.bf16.gmra.mxu0 %vm1427_vm11, %v7680_v51 }
 0x195   : > { %2604 = vmatprep.mubr.bf16.mxu0 %v9617_v48  ;;  %5938 = vmatpush3.bf16.msra.mxu0 %v6561_v5  ;;  %v6581_v5 = vld [vmem:[#allocation4 + $0xc8] sm:$0xff]  }
 0x196   : > { %5638 = vmatmul.mubr.msk.bf16.gmra.mxu1 %vm1427_vm11, %v7746_v39  ;;  %v7984_v9 = vpop.f32.mrf.mxu0  ;;  %v6557_v39 = vld [vmem:[#allocation4 + $0x68] sm:$0xff]   ;;  %5939 = vmatprep.subr.bf16.mxu0 %v6563_v37 }
 0x197   : > { %2634 = vmatprep.mubr.bf16.mxu1 %v9617_v48  ;;  %5827 = vmatprep.subr.bf16.mxu1 %v6557_v39 }
 0x198   : > { %v7986_v3 = vpop.f32.mrf.mxu0  ;;  %5828 = vmatpush3.bf16.msra.mxu1 %v6558_v12 }
 0x199   : > { %5940 = vmatpush3.bf16.msra.mxu0 %v6565_v22  ;;  %v3821_v22 = vrot.slane %v6580_v61, 1 }
 0x19a   : > { %v7988_v51 = vpop.f32.mrf.mxu0  ;;  %5941 = vmatprep.subr.bf16.mxu0 %v6567_v46 }
 0x19b   : > { %9620 = vst [vmem:[#allocation14_spill] sm:$0xff] %v7988_v51 }
 0x19c   : > { %v7990_v8 = vpop.f32.mrf.mxu0  ;;  %5636 = vmatmul.mubr.msk.bf16.gmra.mxu0 %vm1427_vm11, %v7714_v57  ;;  %v6651_v57 = vld [vmem:[#allocation4 + $0x220] sm:$0xff]  }
 0x19d   : > { %5942 = vmatpush3.bf16.msra.mxu0 %v6569_v32  ;;  %v2841_v32 = vld [vmem:[#allocation3 + $0x38] sm:$0x1] }
 0x19e   : > { %5639 = vmatmul.mubr.msk.bf16.gmra.mxu1 %vm1427_vm11, %v7802_v13  ;;  %v7999_v45 = vpop.f32.mrf.mxu0  ;;  %v6560_v13 = vld [vmem:[#allocation4 + $0x60] sm:$0xff]   ;;  %5943 = vmatprep.subr.bf16.mxu0 %v6571_v54  ;;  %v2842_v54 = vsel %vm8016_vm14, 0, %v2841_v32 }
 0x19f   : > { %2644 = vmatprep.mubr.bf16.mxu1 %v9617_v48  ;;  %5829 = vmatprep.subr.bf16.mxu1 %v6560_v13  ;;  %v2775_v48 = vsel %vm8003_vm13, 0, %v2774_v25  ;;  %v3622_v13 = vrot.slane %v3620_v40, 1  ;;  %v6582_v25 = vld [vmem:[#allocation4 + $0x88] sm:$0xff]   ;;  %2843 = vst [vmem:[#allocation3 + $0x38] sm:$0x1] %v2842_v54  ;;  %v2793_v40 = vsel %vm8003_vm13, 0, %v2792_v42 }
 0x1a0   : > { %v8007_v47 = vpop.f32.mrf.mxu0  ;;  %5830 = vmatpush3.bf16.msra.mxu1 %v6562_v1  ;;  %2776 = vst [vmem:[#allocation3] sm:$0x1] %v2775_v48  ;;  %v2838_v1 = vld [vmem:[#allocation3 + $0x2c] sm:$0x1]  ;;  %v6583_v48 = vld [vmem:[#allocation4 + $0xc0] sm:$0xff]  }
 0x1a1   : > { %5831 = vmatprep.subr.bf16.mxu1 %v6564_v28  ;;  %5944 = vmatpush3.bf16.msra.mxu0 %v6573_v15  ;;  %2794 = vst [vmem:[#allocation3 + $0x48] sm:$0x1] %v2793_v40 }
 0x1a2   : > { %v8012_v44 = vpop.f32.mrf.mxu0  ;;  %5945 = vmatprep.subr.bf16.mxu0 %v6575_v14  ;;  %v2844_v14 = vld [vmem:[#allocation3 + $0x44] sm:$0x1] }
 0x1a3   : > { %9624 = vst [vmem:[#allocation11_spill] sm:$0xff] %v8012_v44  ;;  %v2845_v10 = vsel %vm8016_vm14, 0, %v2844_v14 }
 0x1a4   : > { %v8024_v18 = vpop.f32.mrf.mxu0  ;;  %5832 = vmatpush3.bf16.msra.mxu1 %v6566_v34  ;;  %v2786_v34 = vld [vmem:[#allocation3 + $0x30] sm:$0x1]  ;;  %2846 = vst [vmem:[#allocation3 + $0x44] sm:$0x1] %v2845_v10  ;;  %v2850_v10 = vld [vmem:[#allocation3 + $0x5c] sm:$0x1] }
 0x1a5   : > { %5833 = vmatprep.subr.bf16.mxu1 %v6568_v21  ;;  %5946 = vmatpush3.bf16.msra.mxu0 %v6577_v16  ;;  %v2787_v19 = vsel %vm8003_vm13, 0, %v2786_v34  ;;  %v2851_v42 = vsel %vm8016_vm14, 0, %v2850_v10 }
 0x1a6   : > { %5640 = vmatmul.mubr.msk.bf16.gmra.mxu1 %vm1427_vm11, %v1426_v29  ;;  %v8029_v31 = vpop.f32.mrf.mxu0  ;;  %v2839_v29 = vsel %vm8016_vm14, 0, %v2838_v1  ;;  %5947 = vmatprep.subr.bf16.mxu0 %v6581_v5  ;;  %2788 = vst [vmem:[#allocation3 + $0x30] sm:$0x1] %v2787_v19  ;;  %v2847_v1 = vld [vmem:[#allocation3 + $0x50] sm:$0x1] }
 0x1a7   : > { %v6579_v58 = vld [vmem:[#allocation3] sm:$0xff]   ;;  %2840 = vst [vmem:[#allocation3 + $0x2c] sm:$0x1] %v2839_v29  ;;  %v2848_v29 = vsel %vm8016_vm14, 0, %v2847_v1  ;;  %2852 = vst [vmem:[#allocation3 + $0x5c] sm:$0x1] %v2851_v42 }
 0x1a8   : > { %v8033_v41 = vpop.f32.mrf.mxu0  ;;  %5834 = vmatpush3.bf16.msra.mxu1 %v6570_v6  ;;  %v3613_v39 = vshrl.u32 %v6579_v58, 16  ;;  %v3615_v12 = vshll.u32 %v6579_v58, 16  ;;  %v3820_v11 = vrot.slane %v6579_v58, 1  ;;  %2849 = vst [vmem:[#allocation3 + $0x50] sm:$0x1] %v2848_v29 }
 0x1a9   : > { %5835 = vmatprep.subr.bf16.mxu1 %v6572_v4  ;;  %5948 = vmatpush3.bf16.msra.mxu0 %v6582_v25  ;;  %v6587_v4 = vld [vmem:[#allocation4 + $0x138] sm:$0xff]  }
 0x1aa   : > { %v8035_v56 = vpop.f32.mrf.mxu0  ;;  %v3617_v53 = vrot.slane %v3615_v12, 1  ;;  %5949 = vmatprep.subr.bf16.mxu0 %v6583_v48  ;;  %v8063_v6 = vsel %vm1264_vm10, %v3820_v11, %v3821_v22  ;;  %v2795_v48 = vld [vmem:[#allocation3 + $0x54] sm:$0x1] }
 0x1ab   : > { %9628 = vst [vmem:[#allocation16_spill] sm:$0xff] %v8035_v56  ;;  %v2796_v22 = vsel %vm8003_vm13, 0, %v2795_v48 }
 0x1ac   : > { %v8039_v26 = vpop.f32.mrf.mxu0  ;;  %5836 = vmatpush3.bf16.msra.mxu1 %v6574_v49  ;;  %v3618_v37 = vor.u32 %v3617_v53, %v3613_v39  ;;  %v2790_v49 = vsel %vm8003_vm13, 0, %v2789_v20  ;;  %2797 = vst [vmem:[#allocation3 + $0x54] sm:$0x1] %v2796_v22  ;;  %v2816_v22 = vld [vmem:[#allocation3 + $0xa8] sm:$0x1] }
 0x1ad   : > { %5837 = vmatprep.subr.bf16.mxu1 %v6576_v36  ;;  %5950 = vmatpush3.bf16.msra.mxu0 %v6584_v50  ;;  %2791 = vst [vmem:[#allocation3 + $0x3c] sm:$0x1] %v2790_v49  ;;  %v2817_v10 = vsel %vm8003_vm13, 0, %v2816_v22  ;;  %v2801_v22 = vld [vmem:[#allocation3 + $0x6c] sm:$0x1] }
 0x1ae   : > { %v8041_v35 = vpop.f32.mrf.mxu0  ;;  %v3623_v28 = vsel %vm1039_vm9, %v3618_v37, %v3622_v13  ;;  %v6591_v37 = vld [vmem:[#allocation4 + $0x170] sm:$0xff]   ;;  %2818 = vst [vmem:[#allocation3 + $0xa8] sm:$0x1] %v2817_v10  ;;  %v2819_v10 = vld [vmem:[#allocation3 + $0xb4] sm:$0x1]  ;;  %v2802_v56 = vsel %vm8003_vm13, 0, %v2801_v22 }
 0x1af   : > { %4551 = vmatprep.mubr.bf16.mxu1 %v3623_v28  ;;  %2803 = vst [vmem:[#allocation3 + $0x6c] sm:$0x1] %v2802_v56 }
 0x1b0   : > { %v8045_v62 = vpop.f32.mrf.mxu0  ;;  %5838 = vmatpush3.bf16.msra.mxu1 %v6578_v60 }
 0x1b1   : > { %6047 = vmatprep.subr.bf16.mxu1 %v6585_v2  ;;  %v2813_v2 = vld [vmem:[#allocation3 + $0x9c] sm:$0x1] }
 0x1b2   : > { %v8047_v59 = vpop.f32.mrf.mxu0 }
 0x1b3   : > { %9629 = vst [vmem:[#allocation17_spill] sm:$0xff] %v8047_v59  ;;  %4552 = vmatmul.mubr.bf16.vlgmr.msra.gmra.mxu1 %v6579_v58 }
 0x1b4   : > { %v8051_v7 = vpop.f32.mrf.mxu0  ;;  %6048 = vmatpush3.bf16.msra.mxu1 %v6587_v4  ;;  %v2814_v4 = vsel %vm8003_vm13, 0, %v2813_v2 }
 0x1b5   : > { %6049 = vmatprep.subr.bf16.mxu1 %v6591_v37  ;;  %2815 = vst [vmem:[#allocation3 + $0x9c] sm:$0x1] %v2814_v4 }
 0x1b6   : > { %v8054_v24 = vpop.f32.mrf.mxu0 }
 0x1b8   : > { %v8058_v46 = vpop.f32.mrf.mxu0 }
 0x1ba   : > { %v8060_v21 = vpop.f32.mrf.mxu0 }
 0x1bb   : > { %9630 = vst [vmem:[#allocation18_spill] sm:$0xff] %v8060_v21 }
 0x1bc   : > { %v8067_v27 = vpop.f32.mrf.mxu0 }
 0x1be   : > { %v8069_v15 = vpop.f32.mrf.mxu0 }
 0x1c0   : > { %v8073_v58 = vpop.f32.mrf.mxu0 }
 0x1c2   : > { %v8075_v61 = vpop.f32.mrf.mxu0 }
 0x1c3   : > { %9631 = vst [vmem:[#allocation19_spill] sm:$0xff] %v8075_v61 }
 0x1c4   : > { %v8079_v36 = vpop.f32.mrf.mxu1  ;;  %v8081_v16 = vpop.f32.mrf.mxu0 }
 0x1c6   : > { %v2305_v39 = vpop.f32.mrf.mxu1  ;;  %v8083_v12 = vpop.f32.mrf.mxu0 }
 0x1c7   : > { %v8086_v60 = vadd.f32 %v2305_v39, %v7956_v55  ;;  %v6593_v55 = vld [vmem:[#allocation4 + $0x130] sm:$0xff]   ;;  %v2868_v39 = vld [vmem:[#allocation3 + $0xa4] sm:$0x1] }
 0x1c8   : > { %v8090_v53 = vpop.f32.mrf.mxu1  ;;  %v8092_v13 = vpop.f32.mrf.mxu0  ;;  %6050 = vmatpush3.bf16.msra.mxu1 %v6593_v55  ;;  %v2869_v40 = vsel %vm8016_vm14, 0, %v2868_v39  ;;  %v2798_v55 = vld [vmem:[#allocation3 + $0x60] sm:$0x1] }
 0x1c9   : > { %9632 = vst [vmem:[#allocation20_spill] sm:$0xff] %v8092_v13  ;;  %2870 = vst [vmem:[#allocation3 + $0xa4] sm:$0x1] %v2869_v40  ;;  %v2799_v48 = vsel %vm8003_vm13, 0, %v2798_v55  ;;  %v2853_v40 = vld [vmem:[#allocation3 + $0x68] sm:$0x1] }
 0x1ca   : > { %v8094_v5 = vpop.f32.mrf.mxu0  ;;  %v8096_v25 = vpop.f32.mrf.mxu1  ;;  %2800 = vst [vmem:[#allocation3 + $0x60] sm:$0x1] %v2799_v48  ;;  %v2854_v55 = vsel %vm8016_vm14, 0, %v2853_v40  ;;  %v2820_v40 = vsel %vm8003_vm13, 0, %v2819_v10  ;;  %v6597_v10 = vld [vmem:[#allocation4 + $0x168] sm:$0xff]  }
 0x1cb   : > { %9633 = vst [vmem:[#allocation21_spill] sm:$0xff] %v8094_v5  ;;  %9634 = vst [vmem:[#allocation22_spill] sm:$0xff] %v8096_v25  ;;  %v2871_v5 = vld [vmem:[#allocation3 + $0xb0] sm:$0x1]  ;;  %6051 = vmatprep.subr.bf16.mxu1 %v6597_v10 }
 0x1cc   : > { %v8100_v28 = vpop.f32.mrf.mxu0  ;;  %2855 = vst [vmem:[#allocation3 + $0x68] sm:$0x1] %v2854_v55  ;;  %v2872_v48 = vsel %vm8016_vm14, 0, %v2871_v5  ;;  %2821 = vst [vmem:[#allocation3 + $0xb4] sm:$0x1] %v2820_v40  ;;  %v6599_v40 = vld [vmem:[#allocation4 + $0x128] sm:$0xff]  }
 0x1cd   : > { %9635 = vst [vmem:[#allocation23_spill] sm:$0xff] %v8100_v28  ;;  %2873 = vst [vmem:[#allocation3 + $0xb0] sm:$0x1] %v2872_v48  ;;  %v2874_v48 = vld [vmem:[#allocation3 + $0xbc] sm:$0x1]  ;;  %6052 = vmatpush3.bf16.msra.mxu1 %v6599_v40 }
 0x1ce   : > { %v8104_v34 = vpop.f32.mrf.mxu0  ;;  %v2875_v22 = vsel %vm8016_vm14, 0, %v2874_v48 }
 0x1cf   : > { %9636 = vst [vmem:[#allocation24_spill] sm:$0xff] %v8104_v34  ;;  %2876 = vst [vmem:[#allocation3 + $0xbc] sm:$0x1] %v2875_v22  ;;  %v2804_v22 = vld [vmem:[#allocation3 + $0x78] sm:$0x1] }
 0x1d0   : > { %v8108_v19 = vpop.f32.mrf.mxu0 }
 0x1d1   : > { %v8106_v50 = vpop.f32.mrf.mxu1  ;;  %9637 = vst [vmem:[#allocation25_spill] sm:$0xff] %v8108_v19 }
 0x1d2   : > { %v8112_v32 = vpop.f32.mrf.mxu0 }
 0x1d3   : > { %v8110_v11 = vpop.f32.mrf.mxu1  ;;  %9638 = vst [vmem:[#allocation26_spill] sm:$0xff] %v8112_v32 }
 0x1d4   : > { %v8118_v20 = vpop.f32.mrf.mxu0 }
 0x1d5   : > { %v8114_v54 = vpop.f32.mrf.mxu1  ;;  %9639 = vst [vmem:[#allocation27_spill] sm:$0xff] %v8118_v20  ;;  %v2822_v20 = vld [vmem:[#allocation3 + $0xc0] sm:$0x1] }
 0x1d6   : > { %v8122_v14 = vpop.f32.mrf.mxu0 }
 0x1d7   : > { %v8120_v49 = vpop.f32.mrf.mxu1  ;;  %9641 = vst [vmem:[#allocation29_spill] sm:$0xff] %v8122_v14 }
 0x1d8   : > { %9640 = vst [vmem:[#allocation28_spill] sm:$0xff] %v8120_v49  ;;  %v8128_v1 = vpop.f32.mrf.mxu0 }
 0x1d9   : > { %9642 = vst [vmem:[#allocation30_spill] sm:$0xff] %v8128_v1 }
 0x1da   : > { %v8132_v29 = vpop.f32.mrf.mxu0 }
 0x1db   : > { %9643 = vst [vmem:[#allocation31_spill] sm:$0xff] %v8132_v29 }
 0x1dc   : > { %v8130_v37 = vpop.f32.mrf.mxu1  ;;  %v8138_v4 = vpop.f32.mrf.mxu0 }
 0x1dd   : > { %9644 = vst [vmem:[#allocation32_spill] sm:$0xff] %v8138_v4 }
 0x1de   : > { %v8136_v2 = vpop.f32.mrf.mxu1  ;;  %v8144_v42 = vpop.f32.mrf.mxu0 }
 0x1df   : > { %9645 = vst [vmem:[#allocation33_spill] sm:$0xff] %v8144_v42 }
 0x1e0   : > { %v8142_v39 = vpop.f32.mrf.mxu1  ;;  %v8146_v29 = vpop.f32.mrf.mxu0 }
 0x1e1   : > { %9646 = vst [vmem:[#allocation34_spill] sm:$0xff] %v8146_v29 }
 0x1e2   : > { %v8150_v32 = vpop.f32.mrf.mxu1  ;;  %v8154_v21 = vpop.f32.mrf.mxu0 }
 0x1e3   : > { %9647 = vst [vmem:[#allocation35_spill] sm:$0xff] %v8150_v32  ;;  %9648 = vst [vmem:[#allocation36_spill] sm:$0xff] %v8154_v21  ;;  %v2856_v21 = vld [vmem:[#allocation3 + $0x74] sm:$0x1] }
 0x1e4   : > { %v8156_v61 = vpop.f32.mrf.mxu0  ;;  %v2857_v51 = vsel %vm8016_vm14, 0, %v2856_v21 }
 0x1e5   : > { %9649 = vst [vmem:[#allocation37_spill] sm:$0xff] %v8156_v61  ;;  %2858 = vst [vmem:[#allocation3 + $0x74] sm:$0x1] %v2857_v51 }
 0x1e6   : > { %v8162_v59 = vpop.f32.mrf.mxu1  ;;  %v8164_v55 = vpop.f32.mrf.mxu0 }
 0x1e7   : > { %9650 = vst [vmem:[#allocation38_spill] sm:$0xff] %v8164_v55 }
 0x1e8   : > { %v8166_v5 = vpop.f32.mrf.mxu1  ;;  %v8168_v32 = vpop.f32.mrf.mxu0 }
 0x1e9   : > { %9651 = vst [vmem:[#allocation39_spill] sm:$0xff] %v8168_v32 }
 0x1ea   : > { %v8174_v44 = vpop.f32.mrf.mxu1  ;;  %v8176_v56 = vpop.f32.mrf.mxu0 }
 0x1eb   : > { %9652 = vst [vmem:[#allocation40_spill] sm:$0xff] %v8176_v56 }
 0x1ec   : > { %v8178_v25 = vpop.f32.mrf.mxu1  ;;  %v8180_v43 = vpop.f32.mrf.mxu0 }
 0x1ed   : > { %9653 = vst [vmem:[#allocation41_spill] sm:$0xff] %v8178_v25  ;;  %9654 = vst [vmem:[#allocation42_spill] sm:$0xff] %v8180_v43  ;;  %v2805_v25 = vsel %vm8003_vm13, 0, %v2804_v22  ;;  %v2823_v22 = vsel %vm8003_vm13, 0, %v2822_v20 }
 0x1ee   : > { %v8182_v49 = vpop.f32.mrf.mxu1  ;;  %v8184_v21 = vpop.f32.mrf.mxu0  ;;  %2806 = vst [vmem:[#allocation3 + $0x78] sm:$0x1] %v2805_v25  ;;  %2824 = vst [vmem:[#allocation3 + $0xc0] sm:$0x1] %v2823_v22 }
 0x1ef   : > { %9655 = vst [vmem:[#allocation43_spill] sm:$0xff] %v8184_v21  ;;  %v6605_v21 = vld [vmem:[#allocation4 + $0x120] sm:$0xff]  }
 0x1f0   : > { %v8186_v33 = vpop.f32.mrf.mxu1  ;;  %v8188_v48 = vpop.f32.mrf.mxu0 }
 0x1f1   : > { %9656 = vst [vmem:[#allocation44_spill] sm:$0xff] %v8188_v48  ;;  %v6603_v48 = vld [vmem:[#allocation4 + $0x160] sm:$0xff]  }
 0x1f2   : > { %v8190_v51 = vpop.f32.mrf.mxu1  ;;  %v8192_v56 = vpop.f32.mrf.mxu0  ;;  %6053 = vmatprep.subr.bf16.mxu1 %v6603_v48  ;;  %v8243_v48 = vld [vmem:[%s9593_s2] ss:$0 sm:$0xff] }
 0x1f3   : > { %9657 = vst [vmem:[#allocation45_spill] sm:$0xff] %v8192_v56  ;;  %6054 = vmatpush3.bf16.msra.mxu1 %v6605_v21 }
 0x1f4   : > { %v8196_v29 = vpop.f32.mrf.mxu1  ;;  %v8198_v10 = vpop.f32.mrf.mxu0 }
 0x1f5   : > { %9658 = vst [vmem:[#allocation46_spill] sm:$0xff] %v8196_v29  ;;  %9659 = vst [vmem:[#allocation47_spill] sm:$0xff] %v8198_v10  ;;  %v2859_v29 = vld [vmem:[#allocation3 + $0x80] sm:$0x1] }
 0x1f6   : > { %v8200_v40 = vpop.f32.mrf.mxu1  ;;  %v8202_v42 = vpop.f32.mrf.mxu0  ;;  %v2860_v19 = vsel %vm8016_vm14, 0, %v2859_v29 }
 0x1f7   : > { %9660 = vst [vmem:[#allocation48_spill] sm:$0xff] %v8202_v42  ;;  %2861 = vst [vmem:[#allocation3 + $0x80] sm:$0x1] %v2860_v19 }
 0x1f8   : > { %v8204_v4 = vpop.f32.mrf.mxu1  ;;  %v8206_v1 = vpop.f32.mrf.mxu0 }
 0x1f9   : > { %9661 = vst [vmem:[#allocation49_spill] sm:$0xff] %v8206_v1  ;;  %v2877_v1 = vld [vmem:[#allocation3 + $0xc8] sm:$0x1] }
 0x1fa   : > { %v8208_v14 = vpop.f32.mrf.mxu1  ;;  %v8210_v56 = vpop.f32.mrf.mxu0  ;;  %v2878_v20 = vsel %vm8016_vm14, 0, %v2877_v1 }
 0x1fb   : > { %9662 = vst [vmem:[#allocation50_spill] sm:$0xff] %v8210_v56  ;;  %v2807_v56 = vld [vmem:[#allocation3 + $0x84] sm:$0x1]  ;;  %2879 = vst [vmem:[#allocation3 + $0xc8] sm:$0x1] %v2878_v20 }
 0x1fc   : > { %v8214_v25 = vpop.f32.mrf.mxu1  ;;  %v8218_v42 = vpop.f32.mrf.mxu0  ;;  %v2808_v29 = vsel %vm8003_vm13, 0, %v2807_v56 }
 0x1fd   : > { %9663 = vst [vmem:[#allocation51_spill] sm:$0xff] %v8214_v25  ;;  %9664 = vst [vmem:[#allocation52_spill] sm:$0xff] %v8218_v42 }
 0x1fe   : > { %v8220_v10 = vpop.f32.mrf.mxu1  ;;  %v8222_v43 = vpop.f32.mrf.mxu0  ;;  %2809 = vst [vmem:[#allocation3 + $0x84] sm:$0x1] %v2808_v29  ;;  %v2308_v29 = vadd.f32 %v8090_v53, %v7958_v17  ;;  %v2810_v17 = vld [vmem:[#allocation3 + $0x90] sm:$0x1] }
 0x1ff   : > { %9665 = vst [vmem:[#allocation53_spill] sm:$0xff] %v8222_v43  ;;  %v2304_v43 = vadd.f32 %v8079_v36, %v7950_v30 }
 0x200   : > { %v8226_v34 = vpop.f32.mrf.mxu1  ;;  %v8230_v22 = vpop.f32.mrf.mxu0 }
 0x201   : > { %9666 = vst [vmem:[#allocation54_spill] sm:$0xff] %v8230_v22 }
 0x202   : > { %v8232_v19 = vpop.f32.mrf.mxu1  ;;  %v8234_v25 = vpop.f32.mrf.mxu0 }
 0x203   : > { %9667 = vst [vmem:[#allocation55_spill] sm:$0xff] %v8234_v25 }
 0x204   : > { %v8238_v1 = vpop.f32.mrf.mxu1  ;;  %v2496_v42 = vpop.f32.mrf.mxu0 }
 0x205   : > { %9668 = vst [vmem:[#allocation56_spill] sm:$0xff] %v8238_v1  ;;  %v2497_v20 = vadd.f32 %v2496_v42, %v2304_v43  ;;  %v2862_v1 = vld [vmem:[#allocation3 + $0x8c] sm:$0x1] }
 0x206   : > { %v8245_v56 = vpop.f32.mrf.mxu1  ;;  %v2498_v21 = vpop.f32.mrf.mxu0  ;;  %v2863_v43 = vsel %vm8016_vm14, 0, %v2862_v1  ;;  %v2316_v1 = vadd.f32 %v8110_v11, %v7970_v63  ;;  %v3302_v11 = vld [vmem:[#allocation3 + $0xc] sm:$0xf] }
 0x207   : > { %v2662_v25 = vadd.f32 %v8243_v48, %v2497_v20  ;;  %v8253_v30 = vadd.f32 %v2498_v21, %v8086_v60  ;;  %2864 = vst [vmem:[#allocation3 + $0x8c] sm:$0x1] %v2863_v43  ;;  %v2811_v60 = vsel %vm8003_vm13, 0, %v2810_v17  ;;  %v2314_v21 = vadd.f32 %v8106_v50, %v7962_v52  ;;  %v6608_v52 = vld [vmem:[#allocation4 + $0x1f8] sm:$0xff]   ;;  %v2865_v50 = vld [vmem:[#allocation3 + $0x98] sm:$0x1] }
 0x208   : > { %v8249_v22 = vpop.f32.mrf.mxu1  ;;  %v2500_v36 = vpop.f32.mrf.mxu0  ;;  %2812 = vst [vmem:[#allocation3 + $0x90] sm:$0x1] %v2811_v60  ;;  %v2318_v60 = vadd.f32 %v8114_v54, %v7972_v23  ;;  %6159 = vmatprep.subr.bf16.mxu0 %v6608_v52  ;;  %v3306_v52 = vld [vmem:[#allocation3 + $0x14] sm:$0x1] }
 0x209   : > { %9669 = vst [vmem:[#allocation57_spill] sm:$0xff] %v8253_v30  ;;  %v2694_v28 = vmax.f32 %v2662_v25, 0.0  ;;  %v2501_v55 = vadd.f32 %v2500_v36, %v2308_v29 }
 0x20a   : > { %v8255_v32 = vpop.f32.mrf.mxu1  ;;  %v8259_v42 = vpop.f32.mrf.mxu0 }
 0x20b   : > { %9670 = vst [vmem:[#allocation58_spill] sm:$0xff] %v8259_v42  ;;  %v5790_v61 = vpack.c.bf16 %v2694_v28, %v2694_v28  ;;  %v2663_v20 = vadd.f32 %v8243_v48, %v2501_v55 }
 0x20c   : > { %v8261_v53 = vpop.f32.mrf.mxu1  ;;  %v2506_v25 = vpop.f32.mrf.mxu0 }
 0x20d   : > { %9671 = vst [vmem:[#allocation59_spill] sm:$0xff] %v8261_v53  ;;  %v2980_v36 = vshrl.u32 %v5790_v61, 16  ;;  %v2695_v43 = vmax.f32 %v2663_v20, 0.0  ;;  %v2507_v53 = vadd.f32 %v2506_v25, %v2314_v21  ;;  %v2983_v30 = vshll.u32 %v5790_v61, 16 }
 0x20e   : > { %v8270_v29 = vpop.f32.mrf.mxu1  ;;  %v2508_v28 = vpop.f32.mrf.mxu0  ;;  %v2866_v61 = vsel %vm8016_vm14, 0, %v2865_v50 }
 0x20f   : > { %v2982_v55 = vrot.slane %v2980_v36, 7  ;;  %v5791_v17 = vpack.c.bf16 %v2695_v43, %v2695_v43  ;;  %v8274_v13 = vadd.f32 %v2508_v28, %v2316_v1  ;;  %v2664_v20 = vadd.f32 %v8243_v48, %v2507_v53  ;;  %2867 = vst [vmem:[#allocation3 + $0x98] sm:$0x1] %v2866_v61  ;;  %v6611_v43 = vld [vmem:[#allocation4 + $0x158] sm:$0xff]  }
 0x210   : > { %v8272_v42 = vpop.f32.mrf.mxu1  ;;  %v2510_v21 = vpop.f32.mrf.mxu0  ;;  %6055 = vmatprep.subr.bf16.mxu1 %v6611_v43 }
 0x211   : > { %9672 = vst [vmem:[#allocation60_spill] sm:$0xff] %v8272_v42  ;;  %9673 = vst [vmem:[#allocation61_spill] sm:$0xff] %v8274_v13  ;;  %v2985_v1 = vor.u32 %v2983_v30, %v2982_v55  ;;  %v2988_v36 = vshrl.u32 %v5791_v17, 16  ;;  %v2696_v23 = vmax.f32 %v2664_v20, 0.0  ;;  %v2511_v54 = vadd.f32 %v2510_v21, %v2318_v60  ;;  %v6613_v13 = vld [vmem:[#allocation4 + $0x118] sm:$0xff]  }
 0x212   : > { %v8286_v25 = vpop.f32.mrf.mxu1  ;;  %v8288_v28 = vpop.f32.mrf.mxu0  ;;  %v2324_v42 = vadd.f32 %v8130_v37, %v7976_v0  ;;  %v2326_v30 = vadd.f32 %v8136_v2, %v7984_v9  ;;  %6056 = vmatpush3.bf16.msra.mxu1 %v6613_v13  ;;  %v2986_v0 = vrot.slane %v2982_v55, 4 }
 0x213   : > { %9676 = vst [vmem:[#allocation62_spill] sm:$0xff] %v8286_v25  ;;  %9677 = vst [vmem:[#allocation63_spill] sm:$0xff] %v8288_v28  ;;  %v3303_v50 = vsel %vm8279_vm0, %v2985_v1, %v3302_v11  ;;  %v2990_v38 = vrot.slane %v2988_v36, 7  ;;  %v2991_v25 = vshll.u32 %v5791_v17, 16  ;;  %v5792_v60 = vpack.c.bf16 %v2696_v23, %v2696_v23 }
 0x214   : > { %v8292_v53 = vpop.f32.mrf.mxu1  ;;  %3304 = vst [vmem:[#allocation3 + $0xc] sm:$0xf] %v3303_v50  ;;  %v2665_v20 = vadd.f32 %v8243_v48, %v2511_v54  ;;  %v2516_v21 = vpop.f32.mrf.mxu0  ;;  %v2328_v17 = vadd.f32 %v8142_v39, %v7986_v3  ;;  %v3309_v50 = vld [vmem:[#allocation3 + $0x18] sm:$0xf] }
 0x215   : > { %9678 = vst [vmem:[#allocation64_spill] sm:$0xff] %v8292_v53  ;;  %v2993_v37 = vor.u32 %v2991_v25, %v2990_v38  ;;  %v2995_v53 = vrot.slane %v2990_v38, 4  ;;  %v2517_v28 = vadd.f32 %v2516_v21, %v2324_v42  ;;  %v2997_v11 = vshrl.u32 %v5792_v60, 16  ;;  %v6619_v38 = vld [vmem:[#allocation4 + $0x150] sm:$0xff]  }
 0x216   : > { %v8299_v61 = vpop.f32.mrf.mxu1  ;;  %v2697_v1 = vmax.f32 %v2665_v20, 0.0  ;;  %v2518_v36 = vpop.f32.mrf.mxu0  ;;  %v3000_v3 = vshll.u32 %v5792_v60, 16  ;;  %6057 = vmatprep.subr.bf16.mxu1 %v6619_v38  ;;  %v2334_v60 = vadd.f32 %v8162_v59, %v7990_v8  ;;  %v3313_v38 = vld [vmem:[#allocation3 + $0x20] sm:$0x1] }
 0x217   : > { %v2994_v43 = vsel %vm6934_vm7, %v2986_v0, %v2993_v37  ;;  %v3307_v13 = vsel %vm8003_vm13, %v2995_v53, %v3306_v52  ;;  %v2666_v23 = vadd.f32 %v8243_v48, %v2517_v28  ;;  %v8310_v55 = vadd.f32 %v2518_v36, %v2326_v30 }
 0x218   : > { %v8303_v9 = vpop.f32.mrf.mxu1  ;;  %3305 = vst [vmem:[#allocation3 + $0x10] sm:$0xf] %v2994_v43  ;;  %3308 = vst [vmem:[#allocation3 + $0x14] sm:$0x1] %v3307_v13  ;;  %v2999_v42 = vrot.slane %v2997_v11, 7  ;;  %v5793_v39 = vpack.c.bf16 %v2697_v1, %v2697_v1  ;;  %v2520_v25 = vpop.f32.mrf.mxu0 }
 0x219   : > { %9680 = vst [vmem:[#allocation10_spill] sm:$0xff] %v8310_v55  ;;  %v2698_v20 = vmax.f32 %v2666_v23, 0.0  ;;  %v2521_v21 = vadd.f32 %v2520_v25, %v2328_v17  ;;  %v2336_v17 = vadd.f32 %v8166_v5, %v7999_v45  ;;  %v2338_v5 = vadd.f32 %v8174_v44, %v8007_v47 }
 0x21a   : > { %v8312_v54 = vpop.f32.mrf.mxu1  ;;  %v3002_v0 = vor.u32 %v3000_v3, %v2999_v42  ;;  %v3005_v37 = vshrl.u32 %v5793_v39, 16  ;;  %v8314_v53 = vpop.f32.mrf.mxu0  ;;  %v3008_v36 = vshll.u32 %v5793_v39, 16  ;;  %v3003_v23 = vrot.slane %v2999_v42, 4 }
 0x21b   : > { %9681 = vst [vmem:[#allocation65_spill] sm:$0xff] %v8314_v53  ;;  %v5794_v30 = vpack.c.bf16 %v2698_v20, %v2698_v20  ;;  %v2667_v52 = vadd.f32 %v8243_v48, %v2521_v21  ;;  %v6609_v53 = vld [vmem:[#allocation4 + $0x1b8] sm:$0xff]  }
 0x21c   : > { %v8316_v28 = vpop.f32.mrf.mxu1  ;;  %v3310_v11 = vsel %vm8279_vm0, %v3002_v0, %v3309_v50  ;;  %v3007_v1 = vrot.slane %v3005_v37, 7  ;;  %v2526_v43 = vpop.f32.mrf.mxu0  ;;  %v6621_v50 = vld [vmem:[#allocation4 + $0x110] sm:$0xff]  }
 0x21d   : > { %9682 = vst [vmem:[#allocation66_spill] sm:$0xff] %v8316_v28  ;;  %3311 = vst [vmem:[#allocation3 + $0x18] sm:$0xf] %v3310_v11  ;;  %v3014_v3 = vshrl.u32 %v5794_v30, 16  ;;  %v2699_v25 = vmax.f32 %v2667_v52, 0.0  ;;  %v3017_v28 = vshll.u32 %v5794_v30, 16  ;;  %v2527_v8 = vadd.f32 %v2526_v43, %v2334_v60  ;;  %6058 = vmatpush3.bf16.msra.mxu1 %v6621_v50 }
 0x21e   : > { %v8325_v13 = vpop.f32.mrf.mxu1  ;;  %v3010_v20 = vor.u32 %v3008_v36, %v3007_v1  ;;  %v3012_v21 = vrot.slane %v3007_v1, 4  ;;  %v2528_v59 = vpop.f32.mrf.mxu0  ;;  %v3316_v52 = vld [vmem:[#allocation3 + $0x24] sm:$0xf]  ;;  %v6616_v1 = vld [vmem:[#allocation4 + $0x1f0] sm:$0xff]  }
 0x21f   : > { %v3016_v39 = vrot.slane %v3014_v3, 7  ;;  %v5795_v37 = vpack.c.bf16 %v2699_v25, %v2699_v25  ;;  %v8329_v55 = vadd.f32 %v2528_v59, %v2336_v17  ;;  %v8331_v45 = vld [vmem:[#allocation3 + $0xc] sm:$0xff]   ;;  %v2668_v60 = vadd.f32 %v8243_v48, %v2527_v8 }
 0x220   : > { %v8327_v0 = vpop.f32.mrf.mxu1  ;;  %v3011_v42 = vsel %vm6934_vm7, %v3003_v23, %v3010_v20  ;;  %v3314_v30 = vsel %vm8003_vm13, %v3012_v21, %v3313_v38  ;;  %v2530_v11 = vpop.f32.mrf.mxu0  ;;  %4712 = vmatprep.mubr.bf16.mxu0 %v8331_v45  ;;  %v2344_v38 = vadd.f32 %v8182_v49, %v8024_v18  ;;  %v2346_v8 = vadd.f32 %v8186_v33, %v8029_v31  ;;  %v3320_v59 = vld [vmem:[#allocation3 + $0x2c] sm:$0x1] }
 0x221   : > { %3312 = vst [vmem:[#allocation3 + $0x1c] sm:$0xf] %v3011_v42  ;;  %3315 = vst [vmem:[#allocation3 + $0x20] sm:$0x1] %v3314_v30  ;;  %v3019_v43 = vor.u32 %v3017_v28, %v3016_v39  ;;  %v3022_v17 = vshrl.u32 %v5795_v37, 16  ;;  %v2700_v47 = vmax.f32 %v2668_v60, 0.0  ;;  %v2531_v44 = vadd.f32 %v2530_v11, %v2338_v5  ;;  %4713 = vmatmul.mubr.bf16.vlgmr.msra.gmra.mxu0 %v8063_v6 }
 0x222   : > { %v8340_v36 = vpop.f32.mrf.mxu1  ;;  %v8343_v23 = vpop.f32.mrf.mxu0  ;;  %v3025_v21 = vshll.u32 %v5795_v37, 16  ;;  %6160 = vmatpush3.bf16.msra.mxu0 %v6609_v53  ;;  %v6617_v28 = vld [vmem:[#allocation4 + $0x1b0] sm:$0xff]   ;;  %v3627_v18 = vshll.u32 %v8331_v45, 16  ;;  %v3020_v42 = vrot.slane %v3016_v39, 4  ;;  %v2348_v33 = vadd.f32 %v8190_v51, %v8033_v41  ;;  %v3323_v39 = vld [vmem:[#allocation3 + $0x30] sm:$0xf] }
 0x223   : > { %9683 = vst [vmem:[#allocation67_spill] sm:$0xff] %v8343_v23  ;;  %v3317_v25 = vsel %vm8279_vm0, %v3019_v43, %v3316_v52  ;;  %v3024_v20 = vrot.slane %v3022_v17, 7  ;;  %v5796_v50 = vpack.c.bf16 %v2700_v47, %v2700_v47  ;;  %v2669_v6 = vadd.f32 %v8243_v48, %v2531_v44  ;;  %6161 = vmatprep.subr.bf16.mxu0 %v6616_v1  ;;  %v8358_v53 = vld [vmem:[#allocation3 + $0x14] ss:$0 sps:$4 sm:$0x11]   ;;  %v6628_v41 = vld [vmem:[#allocation4 + $0x148] sm:$0xff]  }
 0x224   : > { %v8348_v3 = vpop.f32.mrf.mxu1  ;;  %3318 = vst [vmem:[#allocation3 + $0x24] sm:$0xf] %v3317_v25  ;;  %v2536_v5 = vpop.f32.mrf.mxu0  ;;  %v6626_v25 = vld [vmem:[#allocation4 + $0x1a8] sm:$0xff]   ;;  %6059 = vmatprep.subr.bf16.mxu1 %v6628_v41 }
 0x225   : > { %9684 = vst [vmem:[#allocation68_spill] sm:$0xff] %v8348_v3  ;;  %v3027_v30 = vor.u32 %v3025_v21, %v3024_v20  ;;  %v3029_v52 = vrot.slane %v3024_v20, 4  ;;  %v2537_v37 = vadd.f32 %v2536_v5, %v2344_v38  ;;  %v3031_v31 = vshrl.u32 %v5796_v50, 16  ;;  %v6625_v38 = vld [vmem:[#allocation4 + $0x1e8] sm:$0xff]   ;;  %v3327_v3 = vld [vmem:[#allocation3 + $0x38] sm:$0x1] }
 0x226   : > { %v8356_v49 = vpop.f32.mrf.mxu1  ;;  %v2701_v60 = vmax.f32 %v2669_v6, 0.0  ;;  %v2538_v11 = vpop.f32.mrf.mxu0  ;;  %6162 = vmatpush3.bf16.msra.mxu0 %v6617_v28  ;;  %v3034_v20 = vshll.u32 %v5796_v50, 16  ;;  %v3629_v5 = vrot.slane %v3627_v18, 1  ;;  %v3632_v28 = vshll.u32 %v8358_v53, 16 }
 0x227   : > { %v3028_v17 = vsel %vm6934_vm7, %v3020_v42, %v3027_v30  ;;  %v3321_v1 = vsel %vm8003_vm13, %v3029_v52, %v3320_v59  ;;  %v2670_v47 = vadd.f32 %v8243_v48, %v2537_v37  ;;  %v8369_v44 = vadd.f32 %v2538_v11, %v2346_v8  ;;  %6163 = vmatprep.subr.bf16.mxu0 %v6625_v38 }
 0x228   : > { %v8362_v43 = vpop.f32.mrf.mxu1  ;;  %3319 = vst [vmem:[#allocation3 + $0x28] sm:$0xf] %v3028_v17  ;;  %3322 = vst [vmem:[#allocation3 + $0x2c] sm:$0x1] %v3321_v1  ;;  %v3033_v51 = vrot.slane %v3031_v31, 7  ;;  %v5797_v21 = vpack.c.bf16 %v2701_v60, %v2701_v60  ;;  %v2540_v6 = vpop.f32.mrf.mxu0  ;;  %v8371_v42 = vld [vmem:[#allocation3 + $0x18] sm:$0xff]  }
 0x229   : > { %9685 = vst [vmem:[#allocation69_spill] sm:$0xff] %v8369_v44  ;;  %v2702_v59 = vmax.f32 %v2670_v47, 0.0  ;;  %v2541_v52 = vadd.f32 %v2540_v6, %v2348_v33  ;;  %v3625_v8 = vshrl.u32 %v8331_v45, 16  ;;  %4720 = vmatprep.mubr.bf16.mxu0 %v8371_v42  ;;  %v3634_v38 = vrot.slane %v3632_v28, 1 }
 0x22a   : > { %v8373_v30 = vpop.f32.mrf.mxu1  ;;  %v3036_v37 = vor.u32 %v3034_v20, %v3033_v51  ;;  %v3039_v11 = vshrl.u32 %v5797_v21, 16  ;;  %v8377_v17 = vpop.f32.mrf.mxu0  ;;  %6164 = vmatpush3.bf16.msra.mxu0 %v6626_v25  ;;  %v3042_v47 = vshll.u32 %v5797_v21, 16  ;;  %v2354_v20 = vadd.f32 %v8200_v40, %v8039_v26 }
 0x22b   : > { %9686 = vst [vmem:[#allocation70_spill] sm:$0xff] %v8377_v17  ;;  %v5798_v18 = vpack.c.bf16 %v2702_v59, %v2702_v59  ;;  %v2671_v31 = vadd.f32 %v8243_v48, %v2541_v52  ;;  %v3630_v60 = vor.u32 %v3629_v5, %v3625_v8  ;;  %v3037_v17 = vrot.slane %v3033_v51, 4  ;;  %v6629_v8 = vld [vmem:[#allocation4 + $0x108] sm:$0xff]  }
 0x22c   : > { %v8380_v50 = vpop.f32.mrf.mxu1  ;;  %v3324_v33 = vsel %vm8279_vm0, %v3036_v37, %v3323_v39  ;;  %v3041_v1 = vrot.slane %v3039_v11, 7  ;;  %v2546_v41 = vpop.f32.mrf.mxu0  ;;  %v3823_v26 = vrot.slane %v8331_v45, 1  ;;  %v2356_v40 = vadd.f32 %v8204_v4, %v8041_v35  ;;  %6060 = vmatpush3.bf16.msra.mxu1 %v6629_v8  ;;  %v3334_v8 = vld [vmem:[#allocation3 + $0x44] sm:$0x1] }
 0x22d   : > { %9687 = vst [vmem:[#allocation71_spill] sm:$0xff] %v8380_v50  ;;  %3325 = vst [vmem:[#allocation3 + $0x30] sm:$0xf] %v3324_v33  ;;  %v3048_v50 = vshrl.u32 %v5798_v18, 16  ;;  %v2703_v59 = vmax.f32 %v2671_v31, 0.0  ;;  %v8390_v25 = vsel %vm1039_vm9, %v3630_v60, %v3634_v38  ;;  %v3051_v37 = vshll.u32 %v5798_v18, 16 }
 0x22e   : > { %v8387_v6 = vpop.f32.mrf.mxu1  ;;  %v3044_v52 = vor.u32 %v3042_v47, %v3041_v1  ;;  %v3046_v5 = vrot.slane %v3041_v1, 4  ;;  %v2548_v39 = vpop.f32.mrf.mxu0  ;;  %4559 = vmatprep.mubr.bf16.mxu1 %v8390_v25  ;;  %v3330_v60 = vld [vmem:[#allocation3 + $0x3c] sm:$0xf]  ;;  %v2358_v1 = vadd.f32 %v8208_v14, %v8045_v62 }
 0x22f   : > { %v3050_v28 = vrot.slane %v3048_v50, 7  ;;  %v5799_v11 = vpack.c.bf16 %v2703_v59, %v2703_v59  ;;  %4560 = vmatmul.mubr.bf16.gmra.mxu1 %v8331_v45  ;;  %v3824_v50 = vrot.slane %v8358_v53, 1  ;;  %v8404_v33 = vld [vmem:[#allocation3 + $0x24] sm:$0xff]   ;;  %v2547_v45 = vadd.f32 %v2546_v41, %v2354_v20 }
 0x230   : > { %v8392_v21 = vpop.f32.mrf.mxu1  ;;  %v3045_v51 = vsel %vm6934_vm7, %v3037_v17, %v3044_v52  ;;  %v3328_v31 = vsel %vm8003_vm13, %v3046_v5, %v3327_v3  ;;  %v2550_v18 = vpop.f32.mrf.mxu0  ;;  %v6590_v17 = vld [vmem:[#allocation3 + $0x20] ss:$0 sps:$4 sm:$0x11]   ;;  %v8413_v38 = vadd.f32 %v2548_v39, %v2356_v40  ;;  %v3639_v41 = vshll.u32 %v8371_v42, 16 }
 0x231   : > { %3326 = vst [vmem:[#allocation3 + $0x34] sm:$0xf] %v3045_v51  ;;  %3329 = vst [vmem:[#allocation3 + $0x38] sm:$0x1] %v3328_v31  ;;  %v3053_v35 = vor.u32 %v3051_v37, %v3050_v28  ;;  %v3056_v4 = vshrl.u32 %v5799_v11, 16  ;;  %v8411_v3 = vsel %vm1264_vm10, %v3823_v26, %v3824_v50  ;;  %v3059_v52 = vshll.u32 %v5799_v11, 16 }
 0x232   : > { %v8408_v47 = vpop.f32.mrf.mxu1  ;;  %9688 = vst [vmem:[#allocation72_spill] sm:$0xff] %v8413_v38  ;;  %v8415_v53 = vpop.f32.mrf.mxu0  ;;  %4721 = vmatmul.mubr.bf16.gmra.mxu0 %v8411_v3  ;;  %v2551_v5 = vadd.f32 %v2550_v18, %v2358_v1  ;;  %v3054_v37 = vrot.slane %v3050_v28, 4  ;;  %v2672_v26 = vadd.f32 %v8243_v48, %v2547_v45  ;;  %v3644_v11 = vshll.u32 %v6590_v17, 16 }
 0x233   : > { %9689 = vst [vmem:[#allocation73_spill] sm:$0xff] %v8415_v53  ;;  %v3331_v62 = vsel %vm8279_vm0, %v3053_v35, %v3330_v60  ;;  %v3058_v14 = vrot.slane %v3056_v4, 7  ;;  %4728 = vmatprep.mubr.bf16.mxu0 %v8404_v33  ;;  %v3637_v50 = vshrl.u32 %v8371_v42, 16  ;;  %v3641_v28 = vrot.slane %v3639_v41, 1 }
 0x234   : > { %v8417_v59 = vpop.f32.mrf.mxu1  ;;  %3332 = vst [vmem:[#allocation3 + $0x3c] sm:$0xf] %v3331_v62  ;;  %v2556_v20 = vpop.f32.mrf.mxu0  ;;  %v2673_v31 = vadd.f32 %v8243_v48, %v2551_v5  ;;  %v2704_v60 = vmax.f32 %v2672_v26, 0.0  ;;  %v2364_v1 = vadd.f32 %v8220_v10, %v8051_v7  ;;  %v6636_v5 = vld [vmem:[#allocation4 + $0x140] sm:$0xff]   ;;  %v3826_v10 = vrot.slane %v8371_v42, 1 }
 0x235   : > { %9690 = vst [vmem:[#allocation74_spill] sm:$0xff] %v8417_v59  ;;  %v3061_v40 = vor.u32 %v3059_v52, %v3058_v14  ;;  %v3063_v51 = vrot.slane %v3058_v14, 4  ;;  %v6634_v14 = vld [vmem:[#allocation4 + $0x1e0] sm:$0xff]   ;;  %v3642_v41 = vor.u32 %v3641_v28, %v3637_v50  ;;  %v3646_v59 = vrot.slane %v3644_v11, 1  ;;  %6061 = vmatprep.subr.bf16.mxu1 %v6636_v5 }
 0x236   : > { %v8425_v39 = vpop.f32.mrf.mxu1  ;;  %v2558_v18 = vpop.f32.mrf.mxu0  ;;  %v2705_v62 = vmax.f32 %v2673_v31, 0.0  ;;  %v6635_v52 = vld [vmem:[#allocation4 + $0x1a0] sm:$0xff]   ;;  %v5800_v26 = vpack.c.bf16 %v2704_v60, %v2704_v60  ;;  %v3827_v38 = vrot.slane %v6590_v17, 1  ;;  %6165 = vmatprep.subr.bf16.mxu0 %v6634_v14 }
 0x237   : > { %v3062_v4 = vsel %vm6934_vm7, %v3054_v37, %v3061_v40  ;;  %v3335_v45 = vsel %vm8003_vm13, %v3063_v51, %v3334_v8  ;;  %v2557_v37 = vadd.f32 %v2556_v20, %v2364_v1  ;;  %v2366_v8 = vadd.f32 %v8226_v34, %v8054_v24  ;;  %6166 = vmatpush3.bf16.msra.mxu0 %v6635_v52 }
 0x238   : > { %v8431_v35 = vpop.f32.mrf.mxu1  ;;  %3333 = vst [vmem:[#allocation3 + $0x40] sm:$0xf] %v3062_v4  ;;  %3336 = vst [vmem:[#allocation3 + $0x44] sm:$0x1] %v3335_v45  ;;  %v2560_v44 = vpop.f32.mrf.mxu0  ;;  %v5801_v7 = vpack.c.bf16 %v2705_v62, %v2705_v62  ;;  %v8440_v40 = vld [vmem:[#allocation3 + $0x30] sm:$0xff]   ;;  %v2368_v51 = vadd.f32 %v8232_v19, %v8058_v46  ;;  %v3065_v31 = vshrl.u32 %v5800_v26, 16  ;;  %v8447_v11 = vsel %vm1039_vm9, %v3642_v41, %v3646_v59 }
 0x239   : > { %4567 = vmatprep.mubr.bf16.mxu1 %v8447_v11  ;;  %v8455_v20 = vsel %vm1264_vm10, %v3826_v10, %v3827_v38  ;;  %v2674_v24 = vadd.f32 %v8243_v48, %v2557_v37  ;;  %v3068_v28 = vshll.u32 %v5800_v26, 16  ;;  %v8460_v46 = vadd.f32 %v2558_v18, %v2366_v8  ;;  %v6594_v59 = vld [vmem:[#allocation3 + $0x2c] ss:$0 sps:$4 sm:$0x11]   ;;  %v3337_v45 = vld [vmem:[#allocation3 + $0x48] sm:$0xf] }
 0x23a   : > { %v8437_v53 = vpop.f32.mrf.mxu1  ;;  %v8449_v60 = vpop.f32.mrf.mxu0  ;;  %v3073_v17 = vshrl.u32 %v5801_v7, 16  ;;  %v3067_v34 = vrot.slane %v3065_v31, 7  ;;  %4568 = vmatmul.mubr.bf16.gmra.mxu1 %v8371_v42  ;;  %4729 = vmatmul.mubr.bf16.gmra.mxu0 %v8455_v20  ;;  %v2561_v19 = vadd.f32 %v2560_v44, %v2368_v51  ;;  %v3076_v14 = vshll.u32 %v5801_v7, 16  ;;  %v3341_v42 = vld [vmem:[#allocation3 + $0x50] sm:$0x1]  ;;  %v6637_v10 = vld [vmem:[#allocation4 + $0x100] sm:$0xff]  }
 0x23b   : > { %9691 = vst [vmem:[#allocation75_spill] sm:$0xff] %v8449_v60  ;;  %9693 = vst [vmem:[#allocation77_spill] sm:$0xff] %v8460_v46  ;;  %v2706_v38 = vmax.f32 %v2674_v24, 0.0  ;;  %v3651_v52 = vshll.u32 %v8404_v33, 16  ;;  %4736 = vmatprep.mubr.bf16.mxu0 %v8440_v40  ;;  %v3649_v31 = vshrl.u32 %v8404_v33, 16  ;;  %v3656_v24 = vshll.u32 %v6594_v59, 16  ;;  %6062 = vmatpush3.bf16.msra.mxu1 %v6637_v10 }
 0x23c   : > { %v8451_v50 = vpop.f32.mrf.mxu1  ;;  %v2566_v1 = vpop.f32.mrf.mxu0  ;;  %v3075_v62 = vrot.slane %v3073_v17, 7  ;;  %v3070_v5 = vor.u32 %v3068_v28, %v3067_v34  ;;  %v3071_v26 = vrot.slane %v3067_v34, 4  ;;  %v2675_v51 = vadd.f32 %v8243_v48, %v2561_v19  ;;  %v6639_v34 = vld [vmem:[#allocation4 + $0x1d8] sm:$0xff]   ;;  %v6642_v60 = vld [vmem:[#allocation4 + $0x1d0] sm:$0xff]  }
 0x23d   : > { %9692 = vst [vmem:[#allocation76_spill] sm:$0xff] %v8451_v50  ;;  %v5802_v8 = vpack.c.bf16 %v2706_v38, %v2706_v38  ;;  %v3653_v17 = vrot.slane %v3651_v52, 1  ;;  %v6641_v38 = vld [vmem:[#allocation4 + $0x198] sm:$0xff]   ;;  %v3658_v10 = vrot.slane %v3656_v24, 1  ;;  %6167 = vmatprep.subr.bf16.mxu0 %v6639_v34 }
 0x23e   : > { %v8462_v4 = vpop.f32.mrf.mxu1  ;;  %v2568_v41 = vpop.f32.mrf.mxu0  ;;  %v3078_v44 = vor.u32 %v3076_v14, %v3075_v62  ;;  %v3080_v37 = vrot.slane %v3075_v62, 4  ;;  %v3338_v7 = vsel %vm8279_vm0, %v3070_v5, %v3337_v45  ;;  %v2374_v45 = vadd.f32 %v8245_v56, %v8067_v27  ;;  %6168 = vmatpush3.bf16.msra.mxu0 %v6641_v38  ;;  %v6643_v27 = vld [vmem:[#allocation4 + $0x190] sm:$0xff]   ;;  %v3344_v56 = vld [vmem:[#allocation3 + $0x54] sm:$0xf] }
 0x23f   : > { %3339 = vst [vmem:[#allocation3 + $0x48] sm:$0xf] %v3338_v7  ;;  %v3082_v19 = vshrl.u32 %v5802_v8, 16  ;;  %v2707_v52 = vmax.f32 %v2675_v51, 0.0  ;;  %v3654_v5 = vor.u32 %v3653_v17, %v3649_v31  ;;  %v8487_v23 = vld [vmem:[#allocation3 + $0x3c] sm:$0xff]   ;;  %6169 = vmatprep.subr.bf16.mxu0 %v6642_v60  ;;  %v2376_v17 = vadd.f32 %v8249_v22, %v8069_v15 }
 0x240   : > { %v8466_v18 = vpop.f32.mrf.mxu1  ;;  %v2570_v50 = vpop.f32.mrf.mxu0  ;;  %v3079_v14 = vsel %vm6934_vm7, %v3071_v26, %v3078_v44  ;;  %v3342_v62 = vsel %vm8003_vm13, %v3080_v37, %v3341_v42  ;;  %v3085_v26 = vshll.u32 %v5802_v8, 16  ;;  %v3829_v44 = vrot.slane %v8404_v33, 1 }
 0x241   : > { %3340 = vst [vmem:[#allocation3 + $0x4c] sm:$0xf] %v3079_v14  ;;  %3343 = vst [vmem:[#allocation3 + $0x50] sm:$0x1] %v3342_v62  ;;  %v8482_v7 = vrot.slane %v3082_v19, 7  ;;  %v3830_v42 = vrot.slane %v6594_v59, 1  ;;  %v5803_v14 = vpack.c.bf16 %v2707_v52, %v2707_v52  ;;  %v8490_v51 = vsel %vm1039_vm9, %v3654_v5, %v3658_v10 }
 0x242   : > { %v8472_v28 = vpop.f32.mrf.mxu1  ;;  %v8485_v37 = vpop.f32.mrf.mxu0  ;;  %v2567_v31 = vadd.f32 %v2566_v1, %v2374_v45  ;;  %v2378_v8 = vadd.f32 %v8255_v32, %v8073_v58  ;;  %4575 = vmatprep.mubr.bf16.mxu1 %v8490_v51  ;;  %v8503_v62 = vld [vmem:[#allocation3 + $0x38] ss:$0 sps:$4 sm:$0x11]   ;;  %v2384_v60 = vadd.f32 %v8270_v29, %v8081_v16  ;;  %v3348_v19 = vld [vmem:[#allocation3 + $0x5c] sm:$0x1]  ;;  %v8514_v38 = vadd.f32 %v2568_v41, %v2376_v17  ;;  %v6644_v29 = vld [vmem:[#allocation4 + $0x1c8] sm:$0xff]  }
 0x243   : > { %9695 = vst [vmem:[#allocation79_spill] sm:$0xff] %v8485_v37  ;;  %v3087_v24 = vor.u32 %v3085_v26, %v8482_v7  ;;  %v8501_v34 = vsel %vm1264_vm10, %v3829_v44, %v3830_v42  ;;  %v3090_v1 = vshrl.u32 %v5803_v14, 16  ;;  %4576 = vmatmul.mubr.bf16.gmra.mxu1 %v8404_v33  ;;  %v3093_v22 = vshll.u32 %v5803_v14, 16  ;;  %6170 = vmatpush3.bf16.msra.mxu0 %v6643_v27  ;;  %v6645_v33 = vld [vmem:[#allocation4 + $0x188] sm:$0xff]   ;;  %v9697_v52 = vld [vmem:[#allocation60_spill] sm:$0xff]  ;;  %v6646_v42 = vld [vmem:[#allocation4 + $0x1c0] sm:$0xff]  }
 0x244   : > { %v8480_v46 = vpop.f32.mrf.mxu1  ;;  %4737 = vmatmul.mubr.bf16.gmra.mxu0 %v8501_v34  ;;  %v2676_v15 = vadd.f32 %v8243_v48, %v2567_v31  ;;  %9696 = vst [vmem:[#allocation80_spill] sm:$0xff] %v8514_v38  ;;  %v2571_v45 = vadd.f32 %v2570_v50, %v2378_v8  ;;  %v2576_v16 = vpop.f32.mrf.mxu0  ;;  %v2386_v5 = vadd.f32 %v9697_v52, %v8083_v12  ;;  %v3663_v44 = vshll.u32 %v8440_v40, 16  ;;  %v9699_v14 = vld [vmem:[#allocation62_spill] sm:$0xff]  ;;  %v9700_v50 = vld [vmem:[#allocation37_spill] sm:$0xff] }
 0x245   : > { %9694 = vst [vmem:[#allocation78_spill] sm:$0xff] %v8480_v46  ;;  %v3345_v32 = vsel %vm8279_vm0, %v3087_v24, %v3344_v56  ;;  %4744 = vmatprep.mubr.bf16.mxu0 %v8487_v23  ;;  %v3092_v10 = vrot.slane %v3090_v1, 7  ;;  %v9698_v56 = vld [vmem:[#allocation20_spill] sm:$0xff]  ;;  %v2424_v31 = vadd.f32 %v8387_v6, %v9700_v50  ;;  %v3668_v8 = vshll.u32 %v8503_v62, 16  ;;  %6171 = vmatprep.subr.bf16.mxu0 %v6644_v29  ;;  %v9701_v52 = vld [vmem:[#allocation38_spill] sm:$0xff] }
 0x246   : > { %v8496_v59 = vpop.f32.mrf.mxu1  ;;  %3346 = vst [vmem:[#allocation3 + $0x54] sm:$0xf] %v3345_v32  ;;  %v2708_v26 = vmax.f32 %v2676_v15, 0.0  ;;  %v8522_v41 = vadd.f32 %v9699_v14, %v9698_v56  ;;  %v2677_v27 = vadd.f32 %v8243_v48, %v2571_v45  ;;  %v3088_v12 = vrot.slane %v8482_v7, 4  ;;  %v6648_v32 = vld [vmem:[#allocation4 + $0x238] sm:$0xff]   ;;  %v2578_v37 = vpop.f32.mrf.mxu0  ;;  %v6647_v45 = vld [vmem:[#allocation4 + $0x180] sm:$0xff]  }
 0x247   : > { %v3095_v24 = vor.u32 %v3093_v22, %v3092_v10  ;;  %v3097_v1 = vrot.slane %v3092_v10, 4  ;;  %v2426_v56 = vadd.f32 %v8392_v21, %v9701_v52  ;;  %v3661_v6 = vshrl.u32 %v8440_v40, 16  ;;  %6172 = vmatpush3.bf16.msra.mxu0 %v6645_v33  ;;  %6295 = vmatprep.subr.bf16.mxu1 %v6648_v32 }
 0x248   : > { %v8510_v58 = vpop.f32.mrf.mxu1  ;;  %v5804_v15 = vpack.c.bf16 %v2708_v26, %v2708_v26  ;;  %v2709_v46 = vmax.f32 %v2677_v27, 0.0  ;;  %v3665_v50 = vrot.slane %v3663_v44, 1  ;;  %v3670_v10 = vrot.slane %v3668_v8, 1  ;;  %6173 = vmatprep.subr.bf16.mxu0 %v6646_v42  ;;  %v3351_v42 = vld [vmem:[#allocation3 + $0x60] sm:$0xf] }
 0x249   : > { %v3096_v29 = vsel %vm6934_vm7, %v3088_v12, %v3095_v24  ;;  %v3349_v7 = vsel %vm8003_vm13, %v3097_v1, %v3348_v19  ;;  %v3832_v44 = vrot.slane %v8440_v40, 1  ;;  %v3833_v38 = vrot.slane %v8503_v62, 1  ;;  %v9703_v24 = vld [vmem:[#allocation23_spill] sm:$0xff] }
 0x24a   : > { %v8526_v17 = vpop.f32.mrf.mxu1  ;;  %v3099_v22 = vshrl.u32 %v5804_v15, 16  ;;  %3347 = vst [vmem:[#allocation3 + $0x58] sm:$0xf] %v3096_v29  ;;  %3350 = vst [vmem:[#allocation3 + $0x5c] sm:$0x1] %v3349_v7  ;;  %v3102_v26 = vshll.u32 %v5804_v15, 16  ;;  %v5805_v27 = vpack.c.bf16 %v2709_v46, %v2709_v46  ;;  %v3666_v52 = vor.u32 %v3665_v50, %v3661_v6  ;;  %v2580_v46 = vpop.f32.mrf.mxu0 }
 0x24b   : > { %v2577_v12 = vadd.f32 %v2576_v16, %v2384_v60  ;;  %v8544_v19 = vadd.f32 %v8299_v61, %v9703_v24  ;;  %v8549_v15 = vadd.f32 %v2578_v37, %v2386_v5  ;;  %v8551_v6 = vld [vmem:[#allocation3 + $0x48] sm:$0xff]   ;;  %6174 = vmatpush3.bf16.msra.mxu0 %v6647_v45  ;;  %v8561_v37 = vsel %vm1264_vm10, %v3832_v44, %v3833_v38 }
 0x24c   : > { %v8533_v14 = vpop.f32.mrf.mxu1  ;;  %v3107_v1 = vshrl.u32 %v5805_v27, 16  ;;  %v8547_v32 = vsel %vm1039_vm9, %v3666_v52, %v3670_v10  ;;  %v3110_v7 = vshll.u32 %v5805_v27, 16  ;;  %v3355_v10 = vld [vmem:[#allocation3 + $0x68] sm:$0x1]  ;;  %4745 = vmatmul.mubr.bf16.gmra.mxu0 %v8561_v37  ;;  %v2581_v38 = vadd.f32 %v2580_v46, %v8522_v41  ;;  %v8570_v52 = vpop.f32.mrf.mxu0 }
 0x24d   : > { %9702 = vst [vmem:[#allocation60_spill] sm:$0xff] %v8533_v14  ;;  %v3101_v14 = vrot.slane %v3099_v22, 7  ;;  %9704 = vst [vmem:[#allocation20_spill] sm:$0xff] %v8549_v15  ;;  %4583 = vmatprep.mubr.bf16.mxu1 %v8547_v32  ;;  %v2678_v5 = vadd.f32 %v8243_v48, %v2577_v12  ;;  %4752 = vmatprep.mubr.bf16.mxu0 %v8551_v6  ;;  %v9709_v44 = vld [vmem:[#allocation24_spill] sm:$0xff] }
 0x24e   : > { %v2616_v21 = vpop.f32.mrf.mxu1  ;;  %v3109_v29 = vrot.slane %v3107_v1, 7  ;;  %4584 = vmatmul.mubr.bf16.gmra.mxu1 %v8440_v40  ;;  %9708 = vst [vmem:[#allocation38_spill] sm:$0xff] %v8570_v52 }
 0x24f   : > { %v2617_v33 = vadd.f32 %v2616_v21, %v2424_v31  ;;  %v9705_v31 = vld [vmem:[#allocation39_spill] sm:$0xff]  ;;  %v3104_v61 = vor.u32 %v3102_v26, %v3101_v14  ;;  %v2710_v40 = vmax.f32 %v2678_v5, 0.0 }
 0x250   : > { %v2618_v8 = vpop.f32.mrf.mxu1  ;;  %v2428_v62 = vadd.f32 %v8408_v47, %v9705_v31  ;;  %v3105_v47 = vrot.slane %v3101_v14, 4  ;;  %v3112_v26 = vor.u32 %v3110_v7, %v3109_v29  ;;  %v3114_v27 = vrot.slane %v3109_v29, 4  ;;  %v9713_v29 = vld [vmem:[#allocation47_spill] sm:$0xff] }
 0x251   : > { %v2686_v60 = vadd.f32 %v8243_v48, %v2617_v33  ;;  %v8556_v16 = vadd.f32 %v2618_v8, %v2426_v56  ;;  %v3352_v56 = vsel %vm8279_vm0, %v3104_v61, %v3351_v42  ;;  %v8575_v14 = vadd.f32 %v8303_v9, %v9709_v44  ;;  %v9710_v33 = vld [vmem:[#allocation42_spill] sm:$0xff] }
 0x252   : > { %v2620_v50 = vpop.f32.mrf.mxu1  ;;  %3353 = vst [vmem:[#allocation3 + $0x60] sm:$0xf] %v3352_v56  ;;  %v2434_v12 = vadd.f32 %v8425_v39, %v9710_v33  ;;  %v3113_v1 = vsel %vm6934_vm7, %v3105_v47, %v3112_v26  ;;  %v3356_v41 = vsel %vm8003_vm13, %v3114_v27, %v3355_v10  ;;  %v5806_v46 = vpack.c.bf16 %v2710_v40, %v2710_v40  ;;  %v8591_v56 = vpop.f32.mrf.mxu0  ;;  %v3386_v40 = vld [vmem:[#allocation3 + $0x9c] sm:$0xf] }
 0x253   : > { %9706 = vst [vmem:[#allocation62_spill] sm:$0xff] %v8556_v16  ;;  %v2718_v45 = vmax.f32 %v2686_v60, 0.0  ;;  %v2621_v22 = vadd.f32 %v2620_v50, %v2428_v62  ;;  %v2679_v31 = vadd.f32 %v8243_v48, %v2581_v38  ;;  %v9711_v62 = vld [vmem:[#allocation43_spill] sm:$0xff]  ;;  %v9712_v60 = vld [vmem:[#allocation44_spill] sm:$0xff]  ;;  %3354 = vst [vmem:[#allocation3 + $0x64] sm:$0xf] %v3113_v1  ;;  %v2444_v7 = vadd.f32 %v8462_v4, %v9713_v29 }
 0x254   : > { %v8567_v21 = vpop.f32.mrf.mxu1  ;;  %v2436_v9 = vadd.f32 %v8431_v35, %v9711_v62  ;;  %v2438_v61 = vadd.f32 %v8437_v53, %v9712_v60  ;;  %3357 = vst [vmem:[#allocation3 + $0x68] sm:$0x1] %v3356_v41  ;;  %v3119_v33 = vshll.u32 %v5806_v46, 16  ;;  %v9715_v4 = vld [vmem:[#allocation48_spill] sm:$0xff] }
 0x255   : > { %9707 = vst [vmem:[#allocation37_spill] sm:$0xff] %v8567_v21  ;;  %v5814_v24 = vpack.c.bf16 %v2718_v45, %v2718_v45  ;;  %v2687_v8 = vadd.f32 %v8243_v48, %v2621_v22  ;;  %v3116_v22 = vshrl.u32 %v5806_v46, 16  ;;  %v2711_v47 = vmax.f32 %v2679_v31, 0.0 }
 0x256   : > { %v2626_v42 = vpop.f32.mrf.mxu1  ;;  %v3673_v46 = vshrl.u32 %v8487_v23, 16 }
 0x257   : > { %v3184_v39 = vshrl.u32 %v5814_v24, 16  ;;  %v2719_v50 = vmax.f32 %v2687_v8, 0.0  ;;  %v2627_v5 = vadd.f32 %v2626_v42, %v2434_v12  ;;  %v3187_v26 = vshll.u32 %v5814_v24, 16  ;;  %v9716_v42 = vld [vmem:[#allocation49_spill] sm:$0xff]  ;;  %v3358_v24 = vld [vmem:[#allocation3 + $0x6c] sm:$0xf] }
 0x258   : > { %v2628_v45 = vpop.f32.mrf.mxu1  ;;  %v8596_v44 = vrot.slane %v3116_v22, 7  ;;  %v5807_v8 = vpack.c.bf16 %v2711_v47, %v2711_v47  ;;  %v2446_v12 = vadd.f32 %v8466_v18, %v9715_v4  ;;  %v2448_v1 = vadd.f32 %v8472_v28, %v9716_v42  ;;  %v8616_v22 = vld [vmem:[%s9593_s2] ss:$0 sm:$0xff] }
 0x259   : > { %v3186_v10 = vrot.slane %v3184_v39, 7  ;;  %v5815_v27 = vpack.c.bf16 %v2719_v50, %v2719_v50  ;;  %v8593_v35 = vadd.f32 %v2628_v45, %v2436_v9  ;;  %v2688_v53 = vadd.f32 %v8243_v48, %v2627_v5  ;;  %v8605_v39 = vld [vmem:[#allocation3 + $0x44] ss:$0 sps:$4 sm:$0x11]   ;;  %v8608_v50 = vpop.f32.mrf.mxu0 }
 0x25a   : > { %v2630_v38 = vpop.f32.mrf.mxu1  ;;  %v3121_v48 = vor.u32 %v3119_v33, %v8596_v44  ;;  %v3390_v5 = vld [vmem:[#allocation3 + $0xa4] sm:$0x1]  ;;  %v3675_v45 = vshll.u32 %v8487_v23, 16 }
 0x25b   : > { %9714 = vst [vmem:[#allocation23_spill] sm:$0xff] %v8593_v35  ;;  %v3189_v41 = vor.u32 %v3187_v26, %v3186_v10  ;;  %v3192_v31 = vshrl.u32 %v5815_v27, 16  ;;  %v2720_v62 = vmax.f32 %v2688_v53, 0.0  ;;  %v2631_v9 = vadd.f32 %v2630_v38, %v2438_v61  ;;  %v8622_v21 = vpop.f32.mrf.mxu0 }
 0x25c   : > { %v8602_v60 = vpop.f32.mrf.mxu1  ;;  %v3195_v28 = vshll.u32 %v5815_v27, 16  ;;  %v3359_v26 = vsel %vm8279_vm0, %v3121_v48, %v3358_v24  ;;  %v3124_v38 = vshrl.u32 %v5807_v8, 16  ;;  %v3127_v35 = vshll.u32 %v5807_v8, 16 }
 0x25d   : > { %9717 = vst [vmem:[#allocation39_spill] sm:$0xff] %v8602_v60  ;;  %v3387_v18 = vsel %vm8279_vm0, %v3189_v41, %v3386_v40  ;;  %v3194_v29 = vrot.slane %v3192_v31, 7  ;;  %v5816_v61 = vpack.c.bf16 %v2720_v62, %v2720_v62  ;;  %v2689_v47 = vadd.f32 %v8616_v22, %v2631_v9  ;;  %3360 = vst [vmem:[#allocation3 + $0x6c] sm:$0xf] %v3359_v26  ;;  %v3362_v26 = vld [vmem:[#allocation3 + $0x74] sm:$0x1] }
 0x25e   : > { %3388 = vst [vmem:[#allocation3 + $0x9c] sm:$0xf] %v3387_v18  ;;  %v2636_v53 = vpop.f32.mrf.mxu1  ;;  %v3190_v40 = vrot.slane %v3186_v10, 4  ;;  %v3126_v62 = vrot.slane %v3124_v38, 7  ;;  %v3680_v18 = vshll.u32 %v8605_v39, 16 }
 0x25f   : > { %v3197_v33 = vor.u32 %v3195_v28, %v3194_v29  ;;  %v3199_v27 = vrot.slane %v3194_v29, 4  ;;  %v2637_v4 = vadd.f32 %v2636_v53, %v2444_v7  ;;  %v3201_v42 = vshrl.u32 %v5816_v61, 16  ;;  %v3393_v38 = vld [vmem:[#allocation3 + $0xa8] sm:$0xf] }
 0x260   : > { %v2721_v41 = vmax.f32 %v2689_v47, 0.0  ;;  %v2638_v31 = vpop.f32.mrf.mxu1  ;;  %v3204_v29 = vshll.u32 %v5816_v61, 16  ;;  %v3131_v47 = vrot.slane %v3126_v62, 4  ;;  %v3129_v61 = vor.u32 %v3127_v35, %v3126_v62 }
 0x261   : > { %v3198_v9 = vsel %vm6934_vm7, %v3190_v40, %v3197_v33  ;;  %v3391_v24 = vsel %vm8003_vm13, %v3199_v27, %v3390_v5  ;;  %v2690_v10 = vadd.f32 %v8616_v22, %v2637_v4  ;;  %v8629_v48 = vadd.f32 %v2638_v31, %v2446_v12  ;;  %v8634_v4 = vpop.f32.mrf.mxu0 }
 0x262   : > { %3389 = vst [vmem:[#allocation3 + $0xa0] sm:$0xf] %v3198_v9  ;;  %3392 = vst [vmem:[#allocation3 + $0xa4] sm:$0x1] %v3391_v24  ;;  %v3203_v7 = vrot.slane %v3201_v42, 7  ;;  %v5817_v28 = vpack.c.bf16 %v2721_v41, %v2721_v41  ;;  %v2640_v53 = vpop.f32.mrf.mxu1  ;;  %v3677_v40 = vrot.slane %v3675_v45, 1  ;;  %v3363_v41 = vsel %vm8003_vm13, %v3131_v47, %v3362_v26 }
 0x263   : > { %9718 = vst [vmem:[#allocation24_spill] sm:$0xff] %v8629_v48  ;;  %v2722_v60 = vmax.f32 %v2690_v10, 0.0  ;;  %v2641_v16 = vadd.f32 %v2640_v53, %v2448_v1  ;;  %v3122_v27 = vrot.slane %v8596_v44, 4  ;;  %9720 = vst [vmem:[#allocation43_spill] sm:$0xff] %v8634_v4  ;;  %v3682_v9 = vrot.slane %v3680_v18, 1  ;;  %v9721_v44 = vld [vmem:[#allocation25_spill] sm:$0xff]  ;;  %v8648_v18 = vpop.f32.mrf.mxu0 }
 0x264   : > { %v3206_v33 = vor.u32 %v3204_v29, %v3203_v7  ;;  %v3209_v52 = vshrl.u32 %v5817_v28, 16  ;;  %v3212_v5 = vshll.u32 %v5817_v28, 16  ;;  %v8632_v12 = vpop.f32.mrf.mxu1  ;;  %3364 = vst [vmem:[#allocation3 + $0x74] sm:$0x1] %v3363_v41  ;;  %v3678_v45 = vor.u32 %v3677_v40, %v3673_v46  ;;  %v3397_v29 = vld [vmem:[#allocation3 + $0xb0] sm:$0x1] }
 0x265   : > { %9719 = vst [vmem:[#allocation42_spill] sm:$0xff] %v8632_v12  ;;  %v5818_v42 = vpack.c.bf16 %v2722_v60, %v2722_v60  ;;  %v2691_v31 = vadd.f32 %v8616_v22, %v2641_v16  ;;  %v2398_v10 = vadd.f32 %v8312_v54, %v9721_v44  ;;  %v3130_v35 = vsel %vm6934_vm7, %v3122_v27, %v3129_v61  ;;  %v9722_v40 = vld [vmem:[#allocation52_spill] sm:$0xff]  ;;  %v3400_v27 = vld [vmem:[#allocation3 + $0xb4] sm:$0xf] }
 0x266   : > { %v3394_v8 = vsel %vm8279_vm0, %v3206_v33, %v3393_v38  ;;  %v3211_v1 = vrot.slane %v3209_v52, 7  ;;  %v2646_v24 = vpop.f32.mrf.mxu1  ;;  %v3207_v28 = vrot.slane %v3203_v7, 4  ;;  %3361 = vst [vmem:[#allocation3 + $0x70] sm:$0xf] %v3130_v35  ;;  %v8646_v52 = vsel %vm1039_vm9, %v3678_v45, %v3682_v9  ;;  %v9723_v41 = vld [vmem:[#allocation53_spill] sm:$0xff] }
 0x267   : > { %3395 = vst [vmem:[#allocation3 + $0xa8] sm:$0xf] %v3394_v8  ;;  %v3218_v60 = vshrl.u32 %v5818_v42, 16  ;;  %v2723_v62 = vmax.f32 %v2691_v31, 0.0  ;;  %v3221_v53 = vshll.u32 %v5818_v42, 16  ;;  %4591 = vmatprep.mubr.bf16.mxu1 %v8646_v52  ;;  %v3835_v38 = vrot.slane %v8487_v23, 1 }
 0x268   : > { %v3214_v16 = vor.u32 %v3212_v5, %v3211_v1  ;;  %v3216_v47 = vrot.slane %v3211_v1, 4  ;;  %v2648_v46 = vpop.f32.mrf.mxu1  ;;  %v2454_v33 = vadd.f32 %v8496_v59, %v9722_v40  ;;  %4592 = vmatmul.mubr.bf16.gmra.mxu1 %v8487_v23  ;;  %v3836_v61 = vrot.slane %v8605_v39, 1  ;;  %v8660_v42 = vld [vmem:[#allocation3 + $0x54] sm:$0xff]  }
 0x269   : > { %v3220_v26 = vrot.slane %v3218_v60, 7  ;;  %v5819_v54 = vpack.c.bf16 %v2723_v62, %v2723_v62  ;;  %v2456_v31 = vadd.f32 %v8510_v58, %v9723_v41  ;;  %v9724_v8 = vld [vmem:[#allocation54_spill] sm:$0xff]  ;;  %v2587_v23 = vadd.f32 %v8591_v56, %v8544_v19  ;;  %v8671_v60 = vpop.f32.mrf.mxu0  ;;  %v9727_v41 = vld [vmem:[#allocation27_spill] sm:$0xff] }
 0x26a   : > { %v3215_v7 = vsel %vm6934_vm7, %v3207_v28, %v3214_v16  ;;  %v3398_v5 = vsel %vm8003_vm13, %v3216_v47, %v3397_v29  ;;  %v2458_v1 = vadd.f32 %v8526_v17, %v9724_v8  ;;  %v2650_v9 = vpop.f32.mrf.mxu1  ;;  %v8667_v29 = vsel %vm1264_vm10, %v3835_v38, %v3836_v61  ;;  %v3404_v17 = vld [vmem:[#allocation3 + $0xbc] sm:$0x1]  ;;  %v8685_v47 = vld [vmem:[#allocation3 + $0x50] ss:$0 sps:$4 sm:$0x11]  }
 0x26b   : > { %3396 = vst [vmem:[#allocation3 + $0xac] sm:$0xf] %v3215_v7  ;;  %3399 = vst [vmem:[#allocation3 + $0xb0] sm:$0x1] %v3398_v5  ;;  %v3223_v59 = vor.u32 %v3221_v53, %v3220_v26  ;;  %v3226_v45 = vshrl.u32 %v5819_v54, 16  ;;  %v3229_v44 = vshll.u32 %v5819_v54, 16  ;;  %v2647_v39 = vadd.f32 %v2646_v24, %v2454_v33  ;;  %4753 = vmatmul.mubr.bf16.gmra.mxu0 %v8667_v29  ;;  %v2600_v33 = vpop.f32.mrf.mxu0 }
 0x26c   : > { %v8678_v62 = vadd.f32 %v8608_v50, %v8575_v14  ;;  %v8680_v28 = vadd.f32 %v2648_v46, %v2456_v31  ;;  %v2680_v16 = vadd.f32 %v8616_v22, %v2587_v23  ;;  %v2591_v56 = vadd.f32 %v8622_v21, %v2398_v10  ;;  %4760 = vmatprep.mubr.bf16.mxu0 %v8660_v42 }
 0x26d   : > { %v3401_v58 = vsel %vm8279_vm0, %v3223_v59, %v3400_v27  ;;  %v3228_v35 = vrot.slane %v3226_v45, 7  ;;  %v2692_v19 = vadd.f32 %v8616_v22, %v2647_v39  ;;  %v2651_v24 = vadd.f32 %v2650_v9, %v2458_v1  ;;  %v9728_v45 = vld [vmem:[#allocation29_spill] sm:$0xff] }
 0x26e   : > { %9725 = vst [vmem:[#allocation44_spill] sm:$0xff] %v8678_v62  ;;  %9726 = vst [vmem:[#allocation47_spill] sm:$0xff] %v8680_v28  ;;  %v3224_v53 = vrot.slane %v3220_v26, 4  ;;  %v2712_v40 = vmax.f32 %v2680_v16, 0.0  ;;  %v2681_v50 = vadd.f32 %v8616_v22, %v2591_v56  ;;  %v3687_v10 = vshll.u32 %v8551_v6, 16 }
 0x26f   : > { %3402 = vst [vmem:[#allocation3 + $0xb4] sm:$0xf] %v3401_v58  ;;  %v3231_v54 = vor.u32 %v3229_v44, %v3228_v35  ;;  %v3233_v38 = vrot.slane %v3228_v35, 4  ;;  %v2724_v14 = vmax.f32 %v2692_v19, 0.0  ;;  %v2693_v46 = vadd.f32 %v8616_v22, %v2651_v24  ;;  %v9729_v44 = vld [vmem:[#allocation30_spill] sm:$0xff]  ;;  %v8703_v35 = vpop.f32.mrf.mxu0 }
 0x270   : > { %v5808_v26 = vpack.c.bf16 %v2712_v40, %v2712_v40  ;;  %v2713_v27 = vmax.f32 %v2681_v50, 0.0  ;;  %v2404_v31 = vadd.f32 %v8325_v13, %v9727_v41  ;;  %v3685_v8 = vshrl.u32 %v8551_v6, 16  ;;  %9730 = vst [vmem:[#allocation48_spill] sm:$0xff] %v8703_v35  ;;  %v3365_v24 = vld [vmem:[#allocation3 + $0x78] sm:$0xf] }
 0x271   : > { %v3232_v7 = vsel %vm6934_vm7, %v3224_v53, %v3231_v54  ;;  %v3405_v21 = vsel %vm8003_vm13, %v3233_v38, %v3404_v17  ;;  %v5820_v5 = vpack.c.bf16 %v2724_v14, %v2724_v14  ;;  %v2725_v61 = vmax.f32 %v2693_v46, 0.0  ;;  %v3407_v40 = vld [vmem:[#allocation3 + $0xc0] sm:$0xf] }
 0x272   : > { %3403 = vst [vmem:[#allocation3 + $0xb8] sm:$0xf] %v3232_v7  ;;  %3406 = vst [vmem:[#allocation3 + $0xbc] sm:$0x1] %v3405_v21  ;;  %v3689_v1 = vrot.slane %v3687_v10, 1  ;;  %v3692_v59 = vshll.u32 %v8685_v47, 16  ;;  %v2406_v9 = vadd.f32 %v8327_v0, %v9728_v45  ;;  %v2408_v23 = vadd.f32 %v8340_v36, %v9729_v44  ;;  %v2606_v45 = vpop.f32.mrf.mxu0 }
 0x273   : > { %v3133_v39 = vshrl.u32 %v5808_v26, 16  ;;  %v3235_v58 = vshrl.u32 %v5820_v5, 16  ;;  %v3136_v17 = vshll.u32 %v5808_v26, 16  ;;  %v5809_v16 = vpack.c.bf16 %v2713_v27, %v2713_v27  ;;  %v3369_v41 = vld [vmem:[#allocation3 + $0x80] sm:$0x1] }
 0x274   : > { %v5821_v19 = vpack.c.bf16 %v2725_v61, %v2725_v61  ;;  %v3690_v56 = vor.u32 %v3689_v1, %v3685_v8  ;;  %v3238_v54 = vshll.u32 %v5820_v5, 16  ;;  %v3694_v38 = vrot.slane %v3692_v59, 1  ;;  %v3411_v59 = vld [vmem:[#allocation3 + $0xc8] sm:$0x1] }
 0x275   : > { %v3135_v13 = vrot.slane %v3133_v39, 7  ;;  %v3237_v53 = vrot.slane %v3235_v58, 7  ;;  %v3141_v14 = vshrl.u32 %v5809_v16, 16  ;;  %v3144_v50 = vshll.u32 %v5809_v16, 16  ;;  %v8716_v58 = vld [vmem:[#allocation3 + $0x60] sm:$0xff]  }
 0x276   : > { %v3243_v0 = vshrl.u32 %v5821_v19, 16  ;;  %v3246_v46 = vshll.u32 %v5821_v19, 16  ;;  %v8706_v61 = vsel %vm1039_vm9, %v3690_v56, %v3694_v38  ;;  %v3838_v8 = vrot.slane %v8551_v6, 1 }
 0x277   : > { %v3138_v7 = vor.u32 %v3136_v17, %v3135_v13  ;;  %v3139_v36 = vrot.slane %v3135_v13, 4  ;;  %v3240_v21 = vor.u32 %v3238_v54, %v3237_v53  ;;  %v3241_v10 = vrot.slane %v3237_v53, 4  ;;  %4599 = vmatprep.mubr.bf16.mxu1 %v8706_v61  ;;  %v6606_v13 = vld [vmem:[#allocation3 + $0x5c] ss:$0 sps:$4 sm:$0x11]  }
 0x278   : > { %v3143_v26 = vrot.slane %v3141_v14, 7  ;;  %v3245_v27 = vrot.slane %v3243_v0, 7  ;;  %v3839_v44 = vrot.slane %v8685_v47, 1  ;;  %v2597_v39 = vadd.f32 %v8648_v18, %v2404_v31  ;;  %4600 = vmatmul.mubr.bf16.gmra.mxu1 %v8551_v6  ;;  %v2608_v31 = vpop.f32.mrf.mxu0  ;;  %v9732_v14 = vld [vmem:[#allocation32_spill] sm:$0xff] }
 0x279   : > { %v3366_v5 = vsel %vm8279_vm0, %v3138_v7, %v3365_v24  ;;  %v3408_v1 = vsel %vm8279_vm0, %v3240_v21, %v3407_v40  ;;  %v8724_v47 = vadd.f32 %v8671_v60, %v2406_v9  ;;  %v2601_v18 = vadd.f32 %v2600_v33, %v2408_v23  ;;  %v9733_v23 = vld [vmem:[#allocation33_spill] sm:$0xff] }
 0x27a   : > { %3367 = vst [vmem:[#allocation3 + $0x78] sm:$0xf] %v3366_v5  ;;  %3409 = vst [vmem:[#allocation3 + $0xc0] sm:$0xf] %v3408_v1  ;;  %v3146_v17 = vor.u32 %v3144_v50, %v3143_v26  ;;  %v3148_v16 = vrot.slane %v3143_v26, 4  ;;  %v3248_v19 = vor.u32 %v3246_v46, %v3245_v27  ;;  %v3250_v56 = vrot.slane %v3245_v27, 4 }
 0x27b   : > { %v8720_v24 = vsel %vm1264_vm10, %v3838_v8, %v3839_v44  ;;  %v2682_v53 = vadd.f32 %v8616_v22, %v2597_v39  ;;  %9731 = vst [vmem:[#allocation49_spill] sm:$0xff] %v8724_v47  ;;  %v2414_v60 = vadd.f32 %v8356_v49, %v9732_v14  ;;  %v2683_v9 = vadd.f32 %v8616_v22, %v2601_v18  ;;  %v9734_v26 = vld [vmem:[#allocation34_spill] sm:$0xff]  ;;  %v8750_v39 = vld [vmem:[#allocation3 + $0x6c] sm:$0xff]  }
 0x27c   : > { %v3147_v54 = vsel %vm6934_vm7, %v3139_v36, %v3146_v17  ;;  %v3370_v38 = vsel %vm8003_vm13, %v3148_v16, %v3369_v41  ;;  %v3249_v6 = vsel %vm6934_vm7, %v3241_v10, %v3248_v19  ;;  %v3412_v40 = vsel %vm8003_vm13, %v3250_v56, %v3411_v59  ;;  %4761 = vmatmul.mubr.bf16.gmra.mxu0 %v8720_v24  ;;  %v2610_v41 = vpop.f32.mrf.mxu0  ;;  %v8748_v59 = vld [vmem:[#allocation3 + $0x68] ss:$0 sps:$4 sm:$0x11]  }
 0x27d   : > { %3368 = vst [vmem:[#allocation3 + $0x7c] sm:$0xf] %v3147_v54  ;;  %3371 = vst [vmem:[#allocation3 + $0x80] sm:$0x1] %v3370_v38  ;;  %v2714_v33 = vmax.f32 %v2682_v53, 0.0  ;;  %4768 = vmatprep.mubr.bf16.mxu0 %v8716_v58  ;;  %v2416_v50 = vadd.f32 %v8362_v43, %v9733_v23  ;;  %v3699_v0 = vshll.u32 %v8660_v42, 16  ;;  %v2607_v10 = vadd.f32 %v2606_v45, %v2414_v60 }
 0x27e   : > { %3410 = vst [vmem:[#allocation3 + $0xc4] sm:$0xf] %v3249_v6  ;;  %3413 = vst [vmem:[#allocation3 + $0xc8] sm:$0x1] %v3412_v40  ;;  %v3704_v46 = vshll.u32 %v6606_v13, 16  ;;  %v3841_v7 = vrot.slane %v8660_v42, 1  ;;  %v2418_v27 = vadd.f32 %v8373_v30, %v9734_v26 }
 0x27f   : > { %v5810_v36 = vpack.c.bf16 %v2714_v33, %v2714_v33  ;;  %v2715_v21 = vmax.f32 %v2683_v9, 0.0  ;;  %v3842_v49 = vrot.slane %v6606_v13, 1  ;;  %v3697_v8 = vshrl.u32 %v8660_v42, 16  ;;  %v3372_v53 = vld [vmem:[#allocation3 + $0x84] sm:$0xf] }
 0x280   : > { %v3701_v5 = vrot.slane %v3699_v0, 1  ;;  %v8746_v1 = vadd.f32 %v2608_v31, %v2416_v50  ;;  %v3706_v16 = vrot.slane %v3704_v46, 1  ;;  %v2684_v19 = vadd.f32 %v8616_v22, %v2607_v10  ;;  %v3376_v31 = vld [vmem:[#allocation3 + $0x8c] sm:$0x1] }
 0x281   : > { %v3150_v43 = vshrl.u32 %v5810_v36, 16  ;;  %v5811_v44 = vpack.c.bf16 %v2715_v21, %v2715_v21  ;;  %v2611_v45 = vadd.f32 %v2610_v41, %v2418_v27  ;;  %v3153_v13 = vshll.u32 %v5810_v36, 16 }
 0x282   : > { %9735 = vst [vmem:[#allocation25_spill] sm:$0xff] %v8746_v1  ;;  %v3702_v17 = vor.u32 %v3701_v5, %v3697_v8  ;;  %v8754_v18 = vsel %vm1264_vm10, %v3841_v7, %v3842_v49  ;;  %v2716_v38 = vmax.f32 %v2684_v19, 0.0  ;;  %v3711_v40 = vshll.u32 %v8716_v58, 16  ;;  %v8767_v7 = vld [vmem:[#allocation3 + $0x74] ss:$0 sps:$4 sm:$0x11]  }
 0x283   : > { %v3152_v56 = vrot.slane %v3150_v43, 7  ;;  %v3158_v30 = vshrl.u32 %v5811_v44, 16  ;;  %v2685_v6 = vadd.f32 %v8616_v22, %v2611_v45  ;;  %v3161_v33 = vshll.u32 %v5811_v44, 16 }
 0x284   : > { %v8757_v54 = vsel %vm1039_vm9, %v3702_v17, %v3706_v16  ;;  %4769 = vmatmul.mubr.bf16.gmra.mxu0 %v8754_v18  ;;  %v3716_v9 = vshll.u32 %v8748_v59, 16  ;;  %v5812_v23 = vpack.c.bf16 %v2716_v38, %v2716_v38  ;;  %v3709_v0 = vshrl.u32 %v8716_v58, 16  ;;  %v3379_v16 = vld [vmem:[#allocation3 + $0x90] sm:$0xf] }
 0x285   : > { %v3155_v14 = vor.u32 %v3153_v13, %v3152_v56  ;;  %v3160_v60 = vrot.slane %v3158_v30, 7  ;;  %4607 = vmatprep.mubr.bf16.mxu1 %v8757_v54  ;;  %4776 = vmatprep.mubr.bf16.mxu0 %v8750_v39  ;;  %v2717_v50 = vmax.f32 %v2685_v6, 0.0  ;;  %v3713_v46 = vrot.slane %v3711_v40, 1  ;;  %v8781_v13 = vpop.f32.mrf.mxu1  ;;  %v6618_v38 = vld [vmem:[#allocation3 + $0x80] ss:$0 sps:$4 sm:$0x11]  }
 0x286   : > { %4608 = vmatmul.mubr.bf16.gmra.mxu1 %v8660_v42  ;;  %v3156_v22 = vrot.slane %v3152_v56, 4  ;;  %v3167_v10 = vshrl.u32 %v5812_v23, 16  ;;  %v3718_v27 = vrot.slane %v3716_v9, 1  ;;  %v3844_v43 = vrot.slane %v8716_v58, 1  ;;  %v8779_v56 = vld [vmem:[#allocation3 + $0x78] sm:$0xff]   ;;  %9736 = vst [vmem:[#allocation52_spill] sm:$0xff] %v8781_v13 }
 0x287   : > { %v3373_v36 = vsel %vm8279_vm0, %v3155_v14, %v3372_v53  ;;  %v3163_v21 = vor.u32 %v3161_v33, %v3160_v60  ;;  %v3165_v49 = vrot.slane %v3160_v60, 4  ;;  %v5813_v41 = vpack.c.bf16 %v2717_v50, %v2717_v50  ;;  %v3383_v60 = vld [vmem:[#allocation3 + $0x98] sm:$0x1]  ;;  %v5839_v50 = vpop.f32.mrf.mxu1 }
 0x288   : > { %3374 = vst [vmem:[#allocation3 + $0x84] sm:$0xf] %v3373_v36  ;;  %v3714_v26 = vor.u32 %v3713_v46, %v3709_v0  ;;  %v3169_v44 = vrot.slane %v3167_v10, 7  ;;  %v3170_v17 = vshll.u32 %v5812_v23, 16  ;;  %v3845_v53 = vrot.slane %v8748_v59, 1 }
 0x289   : > { %v3164_v8 = vsel %vm6934_vm7, %v3156_v22, %v3163_v21  ;;  %v3377_v5 = vsel %vm8003_vm13, %v3165_v49, %v3376_v31  ;;  %v3175_v19 = vshrl.u32 %v5813_v41, 16  ;;  %v3723_v30 = vshll.u32 %v8750_v39, 16 }
 0x28a   : > { %3375 = vst [vmem:[#allocation3 + $0x88] sm:$0xf] %v3164_v8  ;;  %3378 = vst [vmem:[#allocation3 + $0x8c] sm:$0x1] %v3377_v5  ;;  %v8777_v45 = vsel %vm1039_vm9, %v3714_v26, %v3718_v27  ;;  %v3728_v31 = vshll.u32 %v8767_v7, 16  ;;  %v3172_v6 = vor.u32 %v3170_v17, %v3169_v44  ;;  %v3178_v14 = vshll.u32 %v5813_v41, 16  ;;  %v5840_v17 = vpop.f32.mrf.mxu1 }
 0x28b   : > { %4615 = vmatprep.mubr.bf16.mxu1 %v8777_v45  ;;  %v3177_v40 = vrot.slane %v3175_v19, 7  ;;  %v8788_v33 = vsel %vm1264_vm10, %v3844_v43, %v3845_v53  ;;  %v3721_v9 = vshrl.u32 %v8750_v39, 16  ;;  %v3725_v23 = vrot.slane %v3723_v30, 1 }
 0x28c   : > { %v3173_v0 = vrot.slane %v3169_v44, 4  ;;  %v3380_v59 = vsel %vm8279_vm0, %v3172_v6, %v3379_v16  ;;  %4777 = vmatmul.mubr.bf16.gmra.mxu0 %v8788_v33  ;;  %v3730_v21 = vrot.slane %v3728_v31, 1  ;;  %v3735_v49 = vshll.u32 %v8779_v56, 16 }
 0x28d   : > { %v3180_v46 = vor.u32 %v3178_v14, %v3177_v40  ;;  %v3182_v22 = vrot.slane %v3177_v40, 4  ;;  %3381 = vst [vmem:[#allocation3 + $0x90] sm:$0xf] %v3380_v59  ;;  %v3726_v36 = vor.u32 %v3725_v23, %v3721_v9  ;;  %4784 = vmatprep.mubr.bf16.mxu0 %v8779_v56  ;;  %v3740_v10 = vshll.u32 %v6618_v38, 16 }
 0x28e   : > { %4616 = vmatmul.mubr.bf16.gmra.mxu1 %v8716_v58  ;;  %v3847_v26 = vrot.slane %v8750_v39, 1  ;;  %v3848_v8 = vrot.slane %v8767_v7, 1  ;;  %v3733_v5 = vshrl.u32 %v8779_v56, 16  ;;  %v3737_v43 = vrot.slane %v3735_v49, 1  ;;  %v8836_v49 = vld [vmem:[#allocation3 + $0x9c] sm:$0xff]  }
 0x28f   : > { %v3181_v41 = vsel %vm6934_vm7, %v3173_v0, %v3180_v46  ;;  %v3384_v63 = vsel %vm8003_vm13, %v3182_v22, %v3383_v60  ;;  %v8803_v27 = vsel %vm1039_vm9, %v3726_v36, %v3730_v21  ;;  %v8810_v16 = vadd.f32 %v5840_v17, %v5839_v50  ;;  %v6630_v17 = vld [vmem:[#allocation3 + $0xa4] ss:$0 sps:$4 sm:$0x11]  }
 0x290   : > { %3382 = vst [vmem:[#allocation3 + $0x94] sm:$0xf] %v3181_v41  ;;  %3385 = vst [vmem:[#allocation3 + $0x98] sm:$0x1] %v3384_v63  ;;  %4623 = vmatprep.mubr.bf16.mxu1 %v8803_v27  ;;  %v3738_v19 = vor.u32 %v3737_v43, %v3733_v5  ;;  %v3742_v53 = vrot.slane %v3740_v10, 1  ;;  %v8814_v31 = vsel %vm1264_vm10, %v3847_v26, %v3848_v8  ;;  %v3850_v23 = vrot.slane %v8779_v56, 1 }
 0x291   : > { %v8807_v44 = vld [vmem:[#allocation3 + $0x84] sm:$0xff]   ;;  %v6622_v2 = vld [vmem:[#allocation3 + $0x8c] ss:$0 sps:$4 sm:$0x11]   ;;  %v3851_v50 = vrot.slane %v6618_v38, 1  ;;  %v3771_v5 = vshll.u32 %v8836_v49, 16 }
 0x292   : > { %v3747_v30 = vshll.u32 %v8807_v44, 16  ;;  %v8817_v7 = vsel %vm1039_vm9, %v3738_v19, %v3742_v53  ;;  %v3745_v40 = vshrl.u32 %v8807_v44, 16  ;;  %v3752_v14 = vshll.u32 %v6622_v2, 16 }
 0x293   : > { %v8832_v21 = vsel %vm1264_vm10, %v3850_v23, %v3851_v50  ;;  %v3853_v63 = vrot.slane %v8807_v44, 1  ;;  %v3854_v26 = vrot.slane %v6622_v2, 1  ;;  %v3773_v53 = vrot.slane %v3771_v5, 1 }
 0x294   : > { %v3749_v6 = vrot.slane %v3747_v30, 1  ;;  %4785 = vmatmul.mubr.bf16.gmra.mxu0 %v8814_v31  ;;  %v3754_v0 = vrot.slane %v3752_v14, 1  ;;  %v8851_v30 = vld [vmem:[#allocation3 + $0xa8] sm:$0xff]   ;;  %v3769_v2 = vshrl.u32 %v8836_v49, 16 }
 0x295   : > { %4792 = vmatprep.mubr.bf16.mxu0 %v8807_v44  ;;  %v8847_v19 = vsel %vm1264_vm10, %v3853_v63, %v3854_v26  ;;  %v3783_v23 = vshll.u32 %v8851_v30, 16  ;;  %v3859_v63 = vrot.slane %v8836_v49, 1  ;;  %v3860_v26 = vrot.slane %v6630_v17, 1 }
 0x296   : > { %4624 = vmatmul.mubr.bf16.gmra.mxu1 %v8750_v39  ;;  %v3750_v60 = vor.u32 %v3749_v6, %v3745_v40  ;;  %v3776_v6 = vshll.u32 %v6630_v17, 16 }
 0x297   : > { %4631 = vmatprep.mubr.bf16.mxu1 %v8817_v7  ;;  %v8824_v9 = vld [vmem:[#allocation3 + $0x90] sm:$0xff]   ;;  %v6627_v59 = vld [vmem:[#allocation3 + $0x98] ss:$0 sps:$4 sm:$0x11]  }
 0x298   : > { %v3759_v46 = vshll.u32 %v8824_v9, 16  ;;  %v8829_v22 = vsel %vm1039_vm9, %v3750_v60, %v3754_v0  ;;  %v3757_v10 = vshrl.u32 %v8824_v9, 16  ;;  %v3764_v38 = vshll.u32 %v6627_v59, 16  ;;  %v6632_v0 = vld [vmem:[#allocation3 + $0xb0] ss:$0 sps:$4 sm:$0x11]  }
 0x299   : > { %v3856_v40 = vrot.slane %v8824_v9, 1  ;;  %v3857_v14 = vrot.slane %v6627_v59, 1  ;;  %v3774_v60 = vor.u32 %v3773_v53, %v3769_v2  ;;  %v3778_v50 = vrot.slane %v3776_v6, 1  ;;  %v6638_v2 = vld [vmem:[#allocation3 + $0xbc] ss:$0 sps:$4 sm:$0x11]  }
 0x29a   : > { %v3761_v36 = vrot.slane %v3759_v46, 1  ;;  %v3766_v8 = vrot.slane %v3764_v38, 1  ;;  %v8866_v38 = vld [vmem:[#allocation3 + $0xb4] sm:$0xff]   ;;  %v3781_v59 = vshrl.u32 %v8851_v30, 16  ;;  %v8874_v6 = vsel %vm1264_vm10, %v3859_v63, %v3860_v26  ;;  %v8888_v63 = vld [vmem:[#allocation3 + $0xc0] sm:$0xff]  }
 0x29b   : > { %v8859_v46 = vsel %vm1264_vm10, %v3856_v40, %v3857_v14  ;;  %v3795_v5 = vshll.u32 %v8866_v38, 16  ;;  %v3793_v17 = vshrl.u32 %v8866_v38, 16 }
 0x29c   : > { %4793 = vmatmul.mubr.bf16.gmra.mxu0 %v8832_v21  ;;  %v3762_v41 = vor.u32 %v3761_v36, %v3757_v10  ;;  %v8863_v36 = vsel %vm1039_vm9, %v3774_v60, %v3778_v50  ;;  %v3785_v10 = vrot.slane %v3783_v23, 1  ;;  %v3800_v60 = vshll.u32 %v6638_v2, 16 }
 0x29d   : > { %4800 = vmatprep.mubr.bf16.mxu0 %v8824_v9  ;;  %v3797_v14 = vrot.slane %v3795_v5, 1  ;;  %v3862_v23 = vrot.slane %v8851_v30, 1  ;;  %v3863_v50 = vrot.slane %v6632_v0, 1 }
 0x29e   : > { %4632 = vmatmul.mubr.bf16.gmra.mxu1 %v8779_v56  ;;  %v8844_v43 = vsel %vm1039_vm9, %v3762_v41, %v3766_v8  ;;  %v3788_v41 = vshll.u32 %v6632_v0, 16  ;;  %v3786_v8 = vor.u32 %v3785_v10, %v3781_v59  ;;  %v3802_v59 = vrot.slane %v3800_v60, 1 }
 0x29f   : > { %4639 = vmatprep.mubr.bf16.mxu1 %v8829_v22  ;;  %v3798_v10 = vor.u32 %v3797_v14, %v3793_v17  ;;  %v3865_v0 = vrot.slane %v8866_v38, 1  ;;  %v2880_v14 = vld [vmem:[#allocation3 + $0xd4] sm:$0x1] }
 0x2a0   : > { %v3790_v53 = vrot.slane %v3788_v41, 1  ;;  %v8886_v41 = vsel %vm1264_vm10, %v3862_v23, %v3863_v50  ;;  %v2881_v23 = vsel %vm8016_vm14, 0, %v2880_v14  ;;  %v6678_v50 = vld [vmem:[#allocation3 + $0x18] sm:$0xff]   ;;  %v8923_v14 = vld [vmem:[%s9595_s4] ss:$0 sm:$0xff] }
 0x2a1   : > { %v8892_v26 = vsel %vm1039_vm9, %v3798_v10, %v3802_v59  ;;  %2882 = vst [vmem:[#allocation3 + $0xd4] sm:$0x1] %v2881_v23  ;;  %v6679_v10 = vld [vmem:[#allocation4 + $0x238] sm:$0xff]   ;;  %v6680_v59 = vld [vmem:[#allocation3 + $0x24] sm:$0xff]  }
 0x2a2   : > { %v8878_v40 = vsel %vm1039_vm9, %v3786_v8, %v3790_v53  ;;  %v3866_v8 = vrot.slane %v6638_v2, 1  ;;  %v2825_v53 = vld [vmem:[#allocation3 + $0xcc] sm:$0x1] }
 0x2a3   : > { %v2826_v17 = vsel %vm8003_vm13, 0, %v2825_v53  ;;  %v6649_v2 = vld [vmem:[#allocation4 + $0x230] sm:$0xff]   ;;  %v5842_v53 = vpop.f32.mrf.mxu1 }
 0x2a4   : > { %4801 = vmatmul.mubr.bf16.gmra.mxu0 %v8847_v19  ;;  %v8899_v5 = vsel %vm1264_vm10, %v3865_v0, %v3866_v8  ;;  %2827 = vst [vmem:[#allocation3 + $0xcc] sm:$0x1] %v2826_v17  ;;  %v6653_v0 = vld [vmem:[#allocation4 + $0x210] sm:$0xff]   ;;  %v6681_v8 = vld [vmem:[#allocation3 + $0x30] sm:$0xff]   ;;  %v6654_v17 = vld [vmem:[#allocation4 + $0x208] sm:$0xff]  }
 0x2a5   : > { %4808 = vmatprep.mubr.bf16.mxu0 %v8836_v49  ;;  %v5843_v60 = vpop.f32.mrf.mxu1 }
 0x2a6   : > { %4640 = vmatmul.mubr.bf16.gmra.mxu1 %v8807_v44 }
 0x2a7   : > { %4647 = vmatprep.mubr.bf16.mxu1 %v8844_v43 }
 0x2ac   : > { %4809 = vmatmul.mubr.bf16.gmra.mxu0 %v8859_v46 }
 0x2ad   : > { %4816 = vmatprep.mubr.bf16.mxu0 %v8851_v30 }
 0x2ae   : > { %4648 = vmatmul.mubr.bf16.gmra.mxu1 %v8824_v9 }
 0x2af   : > { %4655 = vmatprep.mubr.bf16.mxu1 %v8863_v36 }
 0x2b4   : > { %4817 = vmatmul.mubr.bf16.gmra.mxu0 %v8874_v6 }
 0x2b5   : > { %4824 = vmatprep.mubr.bf16.mxu0 %v8866_v38 }
 0x2b6   : > { %4656 = vmatmul.mubr.bf16.gmra.mxu1 %v8836_v49 }
 0x2b7   : > { %4663 = vmatprep.mubr.bf16.mxu1 %v8878_v40 }
 0x2bc   : > { %4825 = vmatmul.mubr.bf16.gmra.mxu0 %v8886_v41 }
 0x2bd   : > { %4832 = vmatprep.mubr.bf16.mxu0 %v8888_v63 }
 0x2be   : > { %4664 = vmatmul.mubr.bf16.gmra.mxu1 %v8851_v30 }
 0x2bf   : > { %4671 = vmatprep.mubr.bf16.mxu1 %v8892_v26 }
 0x2c4   : > { %4833 = vmatmul.mubr.bf16.gmra.mxu0 %v8899_v5 }
 0x2c5   : > { %5034 = vmatprep.mubr.bf16.mxu0 %v8447_v11 }
 0x2c6   : > { %4672 = vmatmul.mubr.bf16.gmra.mxu1 %v8866_v38 }
 0x2c7   : > { %4873 = vmatprep.mubr.bf16.mxu1 %v8411_v3  ;;  %v6650_v3 = vld [vmem:[#allocation4 + $0x228] sm:$0xff]  }
 0x2cc   : > { %5035 = vmatmul.mubr.bf16.vlgmr.msra.gmra.mxu0 %v6678_v50  ;;  %v5844_v50 = vadd.f32 %v5843_v60, %v5842_v53 }
 0x2cd   : > { %5042 = vmatprep.mubr.bf16.mxu0 %v8490_v51 }
 0x2ce   : > { %4874 = vmatmul.mubr.bf16.vlgmr.msra.gmra.mxu1 %v8390_v25  ;;  %v6652_v25 = vld [vmem:[#allocation4 + $0x218] sm:$0xff]  }
 0x2cf   : > { %6296 = vmatpush3.bf16.msra.mxu1 %v6679_v10  ;;  %4881 = vmatprep.mubr.bf16.mxu1 %v8455_v20 }
 0x2d0   : > { %6297 = vmatprep.subr.bf16.mxu1 %v6649_v2 }
 0x2d3   : > { %6298 = vmatpush3.bf16.msra.mxu1 %v6649_v2 }
 0x2d4   : > { %6299 = vmatprep.subr.bf16.mxu1 %v6650_v3  ;;  %5043 = vmatmul.mubr.bf16.gmra.mxu0 %v6680_v59 }
 0x2d5   : > { %5050 = vmatprep.mubr.bf16.mxu0 %v8547_v32 }
 0x2d6   : > { %4882 = vmatmul.mubr.bf16.gmra.mxu1 %v8447_v11  ;;  %v8918_v11 = vpop.f32.mrf.mxu0 }
 0x2d7   : > { %4889 = vmatprep.mubr.bf16.mxu1 %v8501_v34  ;;  %6300 = vmatpush3.bf16.msra.mxu1 %v6650_v3  ;;  %9738 = vst [vmem:[#allocation53_spill] sm:$0xff] %v8918_v11  ;;  %v6656_v3 = vld [vmem:[#allocation4 + $0x200] sm:$0xff]  }
 0x2d8   : > { %6301 = vmatprep.subr.bf16.mxu1 %v6651_v57 }
 0x2db   : > { %6302 = vmatpush3.bf16.msra.mxu1 %v6651_v57  ;;  %v6682_v57 = vld [vmem:[#allocation3 + $0x3c] sm:$0xff]  }
 0x2dc   : > { %6303 = vmatprep.subr.bf16.mxu1 %v6652_v25  ;;  %5051 = vmatmul.mubr.bf16.gmra.mxu0 %v6681_v8 }
 0x2dd   : > { %5058 = vmatprep.mubr.bf16.mxu0 %v8646_v52 }
 0x2de   : > { %4890 = vmatmul.mubr.bf16.gmra.mxu1 %v8490_v51  ;;  %v4554_v51 = vadd.f32 %v8810_v16, %v8923_v14  ;;  %v4557_v16 = vadd.f32 %v5844_v50, %v8923_v14 }
 0x2df   : > { %4897 = vmatprep.mubr.bf16.mxu1 %v8561_v37  ;;  %6304 = vmatpush3.bf16.msra.mxu1 %v6652_v25 }
 0x2e0   : > { %6305 = vmatprep.subr.bf16.mxu1 %v6653_v0 }
 0x2e1   : > { %v5951_v23 = vpop.f32.mrf.mxu0 }
 0x2e3   : > { %v5952_v2 = vpop.f32.mrf.mxu0  ;;  %6306 = vmatpush3.bf16.msra.mxu1 %v6653_v0 }
 0x2e4   : > { %v5953_v10 = vadd.f32 %v5952_v2, %v5951_v23  ;;  %6307 = vmatprep.subr.bf16.mxu1 %v6654_v17  ;;  %5059 = vmatmul.mubr.bf16.gmra.mxu0 %v6682_v57 }
 0x2e5   : > { %v5954_v59 = vpop.f32.mrf.mxu0  ;;  %5066 = vmatprep.mubr.bf16.mxu0 %v8706_v61 }
 0x2e6   : > { %4898 = vmatmul.mubr.bf16.gmra.mxu1 %v8547_v32  ;;  %v8930_v25 = vadd.f32 %v5953_v10, %v4554_v51  ;;  %v6683_v32 = vld [vmem:[#allocation3 + $0x48] sm:$0xff]  }
 0x2e7   : > { %4905 = vmatprep.mubr.bf16.mxu1 %v8667_v29  ;;  %v5955_v8 = vpop.f32.mrf.mxu0  ;;  %6308 = vmatpush3.bf16.msra.mxu1 %v6654_v17 }
 0x2e8   : > { %v5956_v0 = vadd.f32 %v5955_v8, %v5954_v59  ;;  %6309 = vmatprep.subr.bf16.mxu1 %v6656_v3 }
 0x2ea   : > { %v8933_v53 = vadd.f32 %v5956_v0, %v4557_v16 }
 0x2eb   : > { %6310 = vmatpush3.bf16.msra.mxu1 %v6656_v3 }
 0x2ec   : > { %5067 = vmatmul.mubr.bf16.gmra.mxu0 %v6683_v32 }
 0x2ed   : > { %5074 = vmatprep.mubr.bf16.mxu0 %v8757_v54 }
 0x2ee   : > { %4906 = vmatmul.mubr.bf16.gmra.mxu1 %v8646_v52 }
 0x2ef   : > { %4913 = vmatprep.mubr.bf16.mxu1 %v8720_v24  ;;  %v5845_v60 = vpop.f32.mrf.mxu1 }
 0x2f1   : > { %v5846_v23 = vpop.f32.mrf.mxu1 }
 0x2f2   : > { %v5957_v51 = vpop.f32.mrf.mxu0  ;;  %v5847_v2 = vadd.f32 %v5846_v23, %v5845_v60 }
 0x2f3   : > { %v5848_v17 = vpop.f32.mrf.mxu1 }
 0x2f4   : > { %v4562_v50 = vadd.f32 %v5847_v2, %v8923_v14  ;;  %v5958_v10 = vpop.f32.mrf.mxu0  ;;  %5075 = vmatmul.mubr.bf16.gmra.mxu0 %v8660_v42 }
 0x2f5   : > { %v5959_v3 = vadd.f32 %v5958_v10, %v5957_v51  ;;  %v5849_v52 = vpop.f32.mrf.mxu1  ;;  %5082 = vmatprep.mubr.bf16.mxu0 %v8777_v45 }
 0x2f6   : > { %4914 = vmatmul.mubr.bf16.gmra.mxu1 %v8706_v61  ;;  %v5960_v57 = vpop.f32.mrf.mxu0  ;;  %v5850_v59 = vadd.f32 %v5849_v52, %v5848_v17 }
 0x2f7   : > { %4921 = vmatprep.mubr.bf16.mxu1 %v8754_v18  ;;  %v8943_v8 = vadd.f32 %v5959_v3, %v4562_v50 }
 0x2f8   : > { %v4565_v16 = vadd.f32 %v5850_v59, %v8923_v14  ;;  %v5961_v0 = vpop.f32.mrf.mxu0 }
 0x2f9   : > { %v5962_v32 = vadd.f32 %v5961_v0, %v5960_v57 }
 0x2fa   : > { %v5851_v23 = vpop.f32.mrf.mxu1  ;;  %v5963_v61 = vpop.f32.mrf.mxu0 }
 0x2fb   : > { %v8946_v60 = vadd.f32 %v5962_v32, %v4565_v16 }
 0x2fc   : > { %5083 = vmatmul.mubr.bf16.gmra.mxu0 %v8716_v58  ;;  %v5852_v42 = vpop.f32.mrf.mxu1  ;;  %v5964_v51 = vpop.f32.mrf.mxu0 }
 0x2fd   : > { %5090 = vmatprep.mubr.bf16.mxu0 %v8803_v27  ;;  %v5853_v2 = vadd.f32 %v5852_v42, %v5851_v23  ;;  %v5965_v17 = vadd.f32 %v5964_v51, %v5963_v61 }
 0x2fe   : > { %4922 = vmatmul.mubr.bf16.gmra.mxu1 %v8757_v54  ;;  %v5854_v50 = vpop.f32.mrf.mxu1  ;;  %v5966_v10 = vpop.f32.mrf.mxu0 }
 0x2ff   : > { %4929 = vmatprep.mubr.bf16.mxu1 %v8788_v33  ;;  %v4570_v3 = vadd.f32 %v5853_v2, %v8923_v14 }
 0x300   : > { %v5855_v52 = vpop.f32.mrf.mxu1  ;;  %v5967_v57 = vpop.f32.mrf.mxu0 }
 0x301   : > { %v8953_v59 = vadd.f32 %v5965_v17, %v4570_v3  ;;  %v5856_v16 = vadd.f32 %v5855_v52, %v5854_v50  ;;  %v5968_v54 = vadd.f32 %v5967_v57, %v5966_v10 }
 0x303   : > { %v4573_v58 = vadd.f32 %v5856_v16, %v8923_v14  ;;  %v5857_v0 = vpop.f32.mrf.mxu1 }
 0x304   : > { %5091 = vmatmul.mubr.bf16.gmra.mxu0 %v8750_v39  ;;  %v5969_v32 = vpop.f32.mrf.mxu0 }
 0x305   : > { %5098 = vmatprep.mubr.bf16.mxu0 %v8817_v7  ;;  %v8960_v23 = vadd.f32 %v5968_v54, %v4573_v58  ;;  %v5858_v61 = vpop.f32.mrf.mxu1 }
 0x306   : > { %4930 = vmatmul.mubr.bf16.gmra.mxu1 %v8777_v45  ;;  %v5970_v42 = vpop.f32.mrf.mxu0  ;;  %v5859_v51 = vadd.f32 %v5858_v61, %v5857_v0 }
 0x307   : > { %4937 = vmatprep.mubr.bf16.mxu1 %v8814_v31  ;;  %v5971_v2 = vadd.f32 %v5970_v42, %v5969_v32  ;;  %v5860_v17 = vpop.f32.mrf.mxu1 }
 0x308   : > { %v5972_v50 = vpop.f32.mrf.mxu0  ;;  %v4578_v10 = vadd.f32 %v5859_v51, %v8923_v14 }
 0x309   : > { %v5861_v3 = vpop.f32.mrf.mxu1 }
 0x30a   : > { %v5973_v45 = vpop.f32.mrf.mxu0  ;;  %v8963_v52 = vadd.f32 %v5971_v2, %v4578_v10  ;;  %v5862_v39 = vadd.f32 %v5861_v3, %v5860_v17 }
 0x30b   : > { %v5974_v57 = vadd.f32 %v5973_v45, %v5972_v50 }
 0x30c   : > { %5099 = vmatmul.mubr.bf16.gmra.mxu0 %v8779_v56  ;;  %v4581_v16 = vadd.f32 %v5862_v39, %v8923_v14  ;;  %v5975_v0 = vpop.f32.mrf.mxu0 }
 0x30d   : > { %5106 = vmatprep.mubr.bf16.mxu0 %v8829_v22 }
 0x30e   : > { %4938 = vmatmul.mubr.bf16.gmra.mxu1 %v8803_v27  ;;  %v8970_v54 = vadd.f32 %v5974_v57, %v4581_v16  ;;  %v5863_v58 = vpop.f32.mrf.mxu1  ;;  %v5976_v42 = vpop.f32.mrf.mxu0 }
 0x30f   : > { %4945 = vmatprep.mubr.bf16.mxu1 %v8832_v21  ;;  %v5977_v51 = vadd.f32 %v5976_v42, %v5975_v0  ;;  %v6655_v0 = vld [vmem:[#allocation3 + $0xc8] ss:$0 sps:$4 sm:$0x11]  }
 0x310   : > { %v5864_v32 = vpop.f32.mrf.mxu1  ;;  %v5978_v27 = vpop.f32.mrf.mxu0 }
 0x311   : > { %v5865_v61 = vadd.f32 %v5864_v32, %v5863_v58 }
 0x312   : > { %v5866_v2 = vpop.f32.mrf.mxu1  ;;  %v5979_v3 = vpop.f32.mrf.mxu0 }
 0x313   : > { %v4586_v56 = vadd.f32 %v5865_v61, %v8923_v14  ;;  %v5980_v45 = vadd.f32 %v5979_v3, %v5978_v27 }
 0x314   : > { %5107 = vmatmul.mubr.bf16.gmra.mxu0 %v8807_v44  ;;  %v5867_v17 = vpop.f32.mrf.mxu1 }
 0x315   : > { %5114 = vmatprep.mubr.bf16.mxu0 %v8844_v43  ;;  %v8977_v50 = vadd.f32 %v5977_v51, %v4586_v56  ;;  %v5868_v10 = vadd.f32 %v5867_v17, %v5866_v2  ;;  %v3894_v2 = vshrl.u32 %v8888_v63, 16  ;;  %v3901_v56 = vshll.u32 %v6655_v0, 16 }
 0x316   : > { %4946 = vmatmul.mubr.bf16.gmra.mxu1 %v8817_v7  ;;  %v3896_v7 = vshll.u32 %v8888_v63, 16 }
 0x317   : > { %4953 = vmatprep.mubr.bf16.mxu1 %v8847_v19  ;;  %v4589_v39 = vadd.f32 %v5868_v10, %v8923_v14  ;;  %v8999_v10 = vld [vmem:[#allocation3 + $0xd4] ss:$0 sps:$4 sm:$0x11]  }
 0x319   : > { %v8980_v57 = vadd.f32 %v5980_v45, %v4589_v39 }
 0x31c   : > { %5115 = vmatmul.mubr.bf16.gmra.mxu0 %v8824_v9  ;;  %v8991_v9 = vld [vmem:[#allocation3 + $0xcc] sm:$0xff]  }
 0x31d   : > { %5122 = vmatprep.mubr.bf16.mxu0 %v8863_v36 }
 0x31e   : > { %4954 = vmatmul.mubr.bf16.gmra.mxu1 %v8829_v22 }
 0x31f   : > { %4961 = vmatprep.mubr.bf16.mxu1 %v8859_v46 }
 0x324   : > { %5123 = vmatmul.mubr.bf16.gmra.mxu0 %v8836_v49 }
 0x325   : > { %5130 = vmatprep.mubr.bf16.mxu0 %v8878_v40 }
 0x326   : > { %4962 = vmatmul.mubr.bf16.gmra.mxu1 %v8844_v43  ;;  %v3898_v43 = vrot.slane %v3896_v7, 1  ;;  %v3903_v7 = vrot.slane %v3901_v56, 1 }
 0x327   : > { %4969 = vmatprep.mubr.bf16.mxu1 %v8874_v6 }
 0x328   : > { %v5869_v44 = vpop.f32.mrf.mxu1  ;;  %v3899_v3 = vor.u32 %v3898_v43, %v3894_v2  ;;  %v3907_v2 = vrot.slane %v6655_v0, 1 }
 0x32a   : > { %v5870_v16 = vpop.f32.mrf.mxu1 }
 0x32b   : > { %v5981_v58 = vpop.f32.mrf.mxu0  ;;  %v5871_v22 = vadd.f32 %v5870_v16, %v5869_v44  ;;  %v3920_v16 = vshrl.u32 %v8991_v9, 16 }
 0x32c   : > { %v5872_v32 = vpop.f32.mrf.mxu1  ;;  %5131 = vmatmul.mubr.bf16.gmra.mxu0 %v8851_v30 }
 0x32d   : > { %v4594_v49 = vadd.f32 %v5871_v22, %v8923_v14  ;;  %v5982_v61 = vpop.f32.mrf.mxu0  ;;  %5138 = vmatprep.mubr.bf16.mxu0 %v8892_v26  ;;  %v3927_v22 = vshll.u32 %v8999_v10, 16 }
 0x32e   : > { %4970 = vmatmul.mubr.bf16.gmra.mxu1 %v8863_v36  ;;  %v5983_v42 = vadd.f32 %v5982_v61, %v5981_v58  ;;  %v5873_v51 = vpop.f32.mrf.mxu1  ;;  %v3922_v36 = vshll.u32 %v8991_v9, 16 }
 0x32f   : > { %4977 = vmatprep.mubr.bf16.mxu1 %v8886_v41  ;;  %v5984_v27 = vpop.f32.mrf.mxu0  ;;  %v5874_v17 = vadd.f32 %v5873_v51, %v5872_v32  ;;  %v3904_v32 = vsel %vm1039_vm9, %v3899_v3, %v3903_v7  ;;  %v3929_v43 = vrot.slane %v3927_v22, 1  ;;  %v3906_v51 = vrot.slane %v8888_v63, 1 }
 0x330   : > { %v9002_v30 = vadd.f32 %v5983_v42, %v4594_v49  ;;  %v3924_v58 = vrot.slane %v3922_v36, 1 }
 0x331   : > { %v4597_v45 = vadd.f32 %v5874_v17, %v8923_v14  ;;  %v5985_v39 = vpop.f32.mrf.mxu0 }
 0x332   : > { %v5986_v44 = vadd.f32 %v5985_v39, %v5984_v27  ;;  %v3925_v49 = vor.u32 %v3924_v58, %v3920_v16 }
 0x334   : > { %v9007_v61 = vadd.f32 %v5986_v44, %v4597_v45  ;;  %5139 = vmatmul.mubr.bf16.gmra.mxu0 %v8866_v38  ;;  %v3930_v17 = vsel %vm1039_vm9, %v3925_v49, %v3929_v43  ;;  %v9017_v38 = vsel %vm1264_vm10, %v3906_v51, %v3907_v2 }
 0x335   : > { %5146 = vmatprep.mubr.bf16.mxu0 %v3904_v32 }
 0x336   : > { %4978 = vmatmul.mubr.bf16.gmra.mxu1 %v8878_v40 }
 0x337   : > { %4985 = vmatprep.mubr.bf16.mxu1 %v8899_v5 }
 0x338   : > { %v5875_v42 = vpop.f32.mrf.mxu1 }
 0x33a   : > { %v5876_v27 = vpop.f32.mrf.mxu1 }
 0x33b   : > { %v5877_v36 = vadd.f32 %v5876_v27, %v5875_v42 }
 0x33c   : > { %v5987_v56 = vpop.f32.mrf.mxu0  ;;  %5147 = vmatmul.mubr.bf16.gmra.mxu0 %v8888_v63  ;;  %v5878_v3 = vpop.f32.mrf.mxu1 }
 0x33d   : > { %v4602_v45 = vadd.f32 %v5877_v36, %v8923_v14  ;;  %5154 = vmatprep.mubr.bf16.mxu0 %v3930_v17 }
 0x33e   : > { %4986 = vmatmul.mubr.bf16.gmra.mxu1 %v8892_v26  ;;  %v5988_v40 = vpop.f32.mrf.mxu0  ;;  %v5879_v44 = vpop.f32.mrf.mxu1 }
 0x33f   : > { %4993 = vmatprep.mubr.bf16.mxu1 %v9017_v38  ;;  %v5989_v39 = vadd.f32 %v5988_v40, %v5987_v56  ;;  %v5880_v16 = vadd.f32 %v5879_v44, %v5878_v3 }
 0x340   : > { %v5990_v0 = vpop.f32.mrf.mxu0 }
 0x341   : > { %v9022_v7 = vadd.f32 %v5989_v39, %v4602_v45  ;;  %v4605_v26 = vadd.f32 %v5880_v16, %v8923_v14 }
 0x342   : > { %v5991_v58 = vpop.f32.mrf.mxu0 }
 0x343   : > { %v5992_v22 = vadd.f32 %v5991_v58, %v5990_v0 }
 0x344   : > { %v5993_v49 = vpop.f32.mrf.mxu0  ;;  %5155 = vmatmul.mubr.bf16.gmra.mxu0 %v8991_v9 }
 0x345   : > { %v9025_v43 = vadd.f32 %v5992_v22, %v4605_v26 }
 0x346   : > { %v5881_v63 = vpop.f32.mrf.mxu1  ;;  %4994 = vmatmul.mubr.bf16.gmra.mxu1 %v3904_v32  ;;  %v5994_v42 = vpop.f32.mrf.mxu0 }
 0x347   : > { %6311 = vmatprep.mubr.bf16.mxu1 %v8455_v20  ;;  %v5995_v51 = vadd.f32 %v5994_v42, %v5993_v49 }
 0x348   : > { %v5882_v2 = vpop.f32.mrf.mxu1  ;;  %v5996_v56 = vpop.f32.mrf.mxu0 }
 0x349   : > { %v5883_v27 = vadd.f32 %v5882_v2, %v5881_v63 }
 0x34a   : > { %v5884_v17 = vpop.f32.mrf.mxu1  ;;  %v5997_v36 = vpop.f32.mrf.mxu0 }
 0x34b   : > { %v4610_v40 = vadd.f32 %v5883_v27, %v8923_v14  ;;  %v5998_v3 = vadd.f32 %v5997_v36, %v5996_v56 }
 0x34c   : > { %v5885_v45 = vpop.f32.mrf.mxu1  ;;  %v5999_v32 = vpop.f32.mrf.mxu0 }
 0x34d   : > { %v9030_v39 = vadd.f32 %v5995_v51, %v4610_v40  ;;  %v5886_v0 = vadd.f32 %v5885_v45, %v5884_v17 }
 0x34e   : > { %v5887_v44 = vpop.f32.mrf.mxu1  ;;  %6312 = vmatmul.mubr.bf16.vlgmr.msra.gmra.mxu1 %v8501_v34  ;;  %v6000_v58 = vpop.f32.mrf.mxu0 }
 0x34f   : > { %v4613_v16 = vadd.f32 %v5886_v0, %v8923_v14  ;;  %6315 = vmatprep.mubr.bf16.mxu1 %v8561_v37  ;;  %v6001_v49 = vadd.f32 %v6000_v58, %v5999_v32 }
 0x350   : > { %v5888_v20 = vpop.f32.mrf.mxu1  ;;  %v6002_v42 = vpop.f32.mrf.mxu0 }
 0x351   : > { %v9035_v26 = vadd.f32 %v5998_v3, %v4613_v16  ;;  %v5889_v22 = vadd.f32 %v5888_v20, %v5887_v44 }
 0x352   : > { %v5890_v63 = vpop.f32.mrf.mxu1  ;;  %v6003_v56 = vpop.f32.mrf.mxu0 }
 0x353   : > { %v4618_v51 = vadd.f32 %v5889_v22, %v8923_v14  ;;  %v6004_v17 = vadd.f32 %v6003_v56, %v6002_v42 }
 0x354   : > { %v5891_v2 = vpop.f32.mrf.mxu1  ;;  %v6005_v37 = vpop.f32.mrf.mxu0 }
 0x355   : > { %v9038_v27 = vadd.f32 %v6001_v49, %v4618_v51  ;;  %v5892_v34 = vadd.f32 %v5891_v2, %v5890_v63 }
 0x356   : > { %v5893_v36 = vpop.f32.mrf.mxu1  ;;  %6316 = vmatmul.mubr.bf16.gmra.mxu1 %v8667_v29  ;;  %v6006_v45 = vpop.f32.mrf.mxu0 }
 0x357   : > { %v4621_v40 = vadd.f32 %v5892_v34, %v8923_v14  ;;  %6319 = vmatprep.mubr.bf16.mxu1 %v8720_v24  ;;  %v6007_v32 = vadd.f32 %v6006_v45, %v6005_v37 }
 0x358   : > { %v5894_v3 = vpop.f32.mrf.mxu1  ;;  %v6008_v20 = vpop.f32.mrf.mxu0 }
 0x359   : > { %v9043_v0 = vadd.f32 %v6004_v17, %v4621_v40  ;;  %v5895_v44 = vadd.f32 %v5894_v3, %v5893_v36 }
 0x35a   : > { %v5896_v16 = vpop.f32.mrf.mxu1  ;;  %v6009_v49 = vpop.f32.mrf.mxu0 }
 0x35b   : > { %v4626_v58 = vadd.f32 %v5895_v44, %v8923_v14  ;;  %v6010_v42 = vadd.f32 %v6009_v49, %v6008_v20 }
 0x35c   : > { %v5897_v22 = vpop.f32.mrf.mxu1  ;;  %v6011_v24 = vpop.f32.mrf.mxu0 }
 0x35d   : > { %v9046_v63 = vadd.f32 %v6007_v32, %v4626_v58  ;;  %v5898_v29 = vadd.f32 %v5897_v22, %v5896_v16 }
 0x35e   : > { %v5899_v51 = vpop.f32.mrf.mxu1  ;;  %6320 = vmatmul.mubr.bf16.gmra.mxu1 %v8754_v18  ;;  %v6012_v34 = vpop.f32.mrf.mxu0 }
 0x35f   : > { %v4629_v2 = vadd.f32 %v5898_v29, %v8923_v14  ;;  %6323 = vmatprep.mubr.bf16.mxu1 %v8788_v33  ;;  %v6013_v37 = vadd.f32 %v6012_v34, %v6011_v24 }
 0x360   : > { %v5900_v56 = vpop.f32.mrf.mxu1  ;;  %v6014_v3 = vpop.f32.mrf.mxu0 }
 0x361   : > { %v9051_v17 = vadd.f32 %v6010_v42, %v4629_v2  ;;  %v5901_v36 = vadd.f32 %v5900_v56, %v5899_v51 }
 0x362   : > { %v5902_v40 = vpop.f32.mrf.mxu1  ;;  %v6015_v32 = vpop.f32.mrf.mxu0 }
 0x363   : > { %v4634_v45 = vadd.f32 %v5901_v36, %v8923_v14  ;;  %v6016_v20 = vadd.f32 %v6015_v32, %v6014_v3 }
 0x364   : > { %v5903_v44 = vpop.f32.mrf.mxu1  ;;  %v6017_v33 = vpop.f32.mrf.mxu0 }
 0x365   : > { %v9054_v16 = vadd.f32 %v6013_v37, %v4634_v45  ;;  %v5904_v18 = vadd.f32 %v5903_v44, %v5902_v40 }
 0x366   : > { %v5905_v58 = vpop.f32.mrf.mxu1  ;;  %6324 = vmatmul.mubr.bf16.gmra.mxu1 %v8814_v31  ;;  %v6018_v29 = vpop.f32.mrf.mxu0 }
 0x367   : > { %v4637_v22 = vadd.f32 %v5904_v18, %v8923_v14  ;;  %6327 = vmatprep.mubr.bf16.mxu1 %v8832_v21  ;;  %v6019_v24 = vadd.f32 %v6018_v29, %v6017_v33 }
 0x368   : > { %v5906_v49 = vpop.f32.mrf.mxu1  ;;  %v6020_v56 = vpop.f32.mrf.mxu0 }
 0x369   : > { %v9059_v42 = vadd.f32 %v6016_v20, %v4637_v22  ;;  %v5907_v51 = vadd.f32 %v5906_v49, %v5905_v58 }
 0x36a   : > { %v5908_v2 = vpop.f32.mrf.mxu1  ;;  %v6021_v37 = vpop.f32.mrf.mxu0 }
 0x36b   : > { %v4642_v34 = vadd.f32 %v5907_v51, %v8923_v14  ;;  %v6022_v3 = vadd.f32 %v6021_v37, %v6020_v56 }
 0x36c   : > { %v5909_v36 = vpop.f32.mrf.mxu1  ;;  %v6023_v21 = vpop.f32.mrf.mxu0 }
 0x36d   : > { %v9062_v40 = vadd.f32 %v6019_v24, %v4642_v34  ;;  %v5910_v31 = vadd.f32 %v5909_v36, %v5908_v2 }
 0x36e   : > { %v5911_v45 = vpop.f32.mrf.mxu1  ;;  %6328 = vmatmul.mubr.bf16.gmra.mxu1 %v8847_v19  ;;  %v6024_v18 = vpop.f32.mrf.mxu0 }
 0x36f   : > { %v4645_v44 = vadd.f32 %v5910_v31, %v8923_v14  ;;  %6331 = vmatprep.mubr.bf16.mxu1 %v8859_v46  ;;  %v6025_v33 = vadd.f32 %v6024_v18, %v6023_v21 }
 0x370   : > { %v5912_v32 = vpop.f32.mrf.mxu1  ;;  %v6026_v49 = vpop.f32.mrf.mxu0 }
 0x371   : > { %v9067_v20 = vadd.f32 %v6022_v3, %v4645_v44  ;;  %v5913_v58 = vadd.f32 %v5912_v32, %v5911_v45 }
 0x372   : > { %v5914_v22 = vpop.f32.mrf.mxu1  ;;  %v6027_v24 = vpop.f32.mrf.mxu0 }
 0x373   : > { %v4650_v29 = vadd.f32 %v5913_v58, %v8923_v14  ;;  %v6028_v56 = vadd.f32 %v6027_v24, %v6026_v49  ;;  %v3932_v24 = vrot.slane %v8991_v9, 1 }
 0x374   : > { %v5915_v51 = vpop.f32.mrf.mxu1  ;;  %v6029_v46 = vpop.f32.mrf.mxu0 }
 0x375   : > { %v9070_v2 = vadd.f32 %v6025_v33, %v4650_v29  ;;  %v5916_v19 = vadd.f32 %v5915_v51, %v5914_v22 }
 0x376   : > { %v5917_v34 = vpop.f32.mrf.mxu1  ;;  %6332 = vmatmul.mubr.bf16.gmra.mxu1 %v8874_v6  ;;  %v6030_v31 = vpop.f32.mrf.mxu0 }
 0x377   : > { %v4653_v36 = vadd.f32 %v5916_v19, %v8923_v14  ;;  %6335 = vmatprep.mubr.bf16.mxu1 %v8886_v41  ;;  %v6031_v21 = vadd.f32 %v6030_v31, %v6029_v46  ;;  %v3933_v19 = vrot.slane %v8999_v10, 1 }
 0x378   : > { %v5918_v37 = vpop.f32.mrf.mxu1  ;;  %v6032_v32 = vpop.f32.mrf.mxu0 }
 0x379   : > { %v9075_v3 = vadd.f32 %v6028_v56, %v4653_v36  ;;  %v5919_v45 = vadd.f32 %v5918_v37, %v5917_v34 }
 0x37a   : > { %v5920_v44 = vpop.f32.mrf.mxu1  ;;  %v6033_v33 = vpop.f32.mrf.mxu0 }
 0x37b   : > { %v4658_v18 = vadd.f32 %v5919_v45, %v8923_v14  ;;  %v6034_v49 = vadd.f32 %v6033_v33, %v6032_v32 }
 0x37c   : > { %v5921_v58 = vpop.f32.mrf.mxu1  ;;  %v6035_v41 = vpop.f32.mrf.mxu0 }
 0x37d   : > { %v9078_v22 = vadd.f32 %v6031_v21, %v4658_v18  ;;  %v5922_v6 = vadd.f32 %v5921_v58, %v5920_v44 }
 0x37e   : > { %v5923_v29 = vpop.f32.mrf.mxu1  ;;  %6336 = vmatmul.mubr.bf16.gmra.mxu1 %v8899_v5  ;;  %v6036_v34 = vpop.f32.mrf.mxu0  ;;  %v3934_v5 = vsel %vm1264_vm10, %v3932_v24, %v3933_v19 }
 0x37f   : > { %v4661_v51 = vadd.f32 %v5922_v6, %v8923_v14  ;;  %6339 = vmatprep.mubr.bf16.mxu1 %v9017_v38  ;;  %v6037_v37 = vadd.f32 %v6036_v34, %v6035_v41 }
 0x380   : > { %v5924_v56 = vpop.f32.mrf.mxu1  ;;  %v6038_v45 = vpop.f32.mrf.mxu0 }
 0x381   : > { %v9085_v46 = vadd.f32 %v6034_v49, %v4661_v51  ;;  %v5925_v36 = vadd.f32 %v5924_v56, %v5923_v29 }
 0x382   : > { %v5926_v31 = vpop.f32.mrf.mxu1  ;;  %v6039_v32 = vpop.f32.mrf.mxu0 }
 0x383   : > { %v4666_v21 = vadd.f32 %v5925_v36, %v8923_v14  ;;  %v6040_v9 = vadd.f32 %v6039_v32, %v6038_v45 }
 0x384   : > { %v5927_v44 = vpop.f32.mrf.mxu1  ;;  %v6041_v10 = vpop.f32.mrf.mxu0 }
 0x385   : > { %v9089_v18 = vadd.f32 %v6037_v37, %v4666_v21  ;;  %v5928_v38 = vadd.f32 %v5927_v44, %v5926_v31 }
 0x386   : > { %v5929_v58 = vpop.f32.mrf.mxu1  ;;  %6340 = vmatmul.mubr.bf16.gmra.mxu1 %v3934_v5  ;;  %v6042_v49 = vpop.f32.mrf.mxu0 }
 0x387   : > { %v4669_v33 = vadd.f32 %v5928_v38, %v8923_v14  ;;  %v6043_v51 = vadd.f32 %v6042_v49, %v6041_v10 }
 0x388   : > { %v5930_v6 = vpop.f32.mrf.mxu1  ;;  %v6044_v34 = vpop.f32.mrf.mxu0 }
 0x389   : > { %v9092_v29 = vadd.f32 %v6040_v9, %v4669_v33  ;;  %v5931_v41 = vadd.f32 %v5930_v6, %v5929_v58 }
 0x38a   : > { %v5932_v56 = vpop.f32.mrf.mxu1  ;;  %v6045_v36 = vpop.f32.mrf.mxu0 }
 0x38b   : > { %v4674_v24 = vadd.f32 %v5931_v41, %v8923_v14  ;;  %v6046_v45 = vadd.f32 %v6045_v36, %v6044_v34 }
 0x38c   : > { %v5933_v19 = vpop.f32.mrf.mxu1  ;;  %v6175_v5 = vpop.f32.mrf.mxu0 }
 0x38d   : > { %v9095_v37 = vadd.f32 %v6043_v51, %v4674_v24  ;;  %v5934_v31 = vadd.f32 %v5933_v19, %v5932_v56 }
 0x38e   : > { %v6063_v21 = vpop.f32.mrf.mxu1  ;;  %v6176_v38 = vpop.f32.mrf.mxu0 }
 0x38f   : > { %9739 = vst [vmem:[#allocation54_spill] sm:$0xff] %v9095_v37  ;;  %v4677_v44 = vadd.f32 %v5934_v31, %v8923_v14  ;;  %v6177_v10 = vadd.f32 %v6176_v38, %v6175_v5 }
 0x390   : > { %v6064_v32 = vpop.f32.mrf.mxu1  ;;  %v6178_v6 = vpop.f32.mrf.mxu0 }
 0x391   : > { %v9098_v9 = vadd.f32 %v6046_v45, %v4677_v44  ;;  %v6065_v58 = vadd.f32 %v6064_v32, %v6063_v21 }
 0x392   : > { %v6066_v33 = vpop.f32.mrf.mxu1  ;;  %v6179_v12 = vpop.f32.mrf.mxu0 }
 0x393   : > { %9740 = vst [vmem:[#allocation27_spill] sm:$0xff] %v9098_v9  ;;  %v4876_v49 = vadd.f32 %v6065_v58, %v8930_v25  ;;  %v6180_v24 = vadd.f32 %v6179_v12, %v6178_v6 }
 0x394   : > { %v6067_v41 = vpop.f32.mrf.mxu1  ;;  %v9103_v19 = vpop.f32.mrf.mxu0 }
 0x395   : > { %v6068_v51 = vadd.f32 %v6067_v41, %v6066_v33  ;;  %v9101_v56 = vadd.f32 %v6177_v10, %v4876_v49 }
 0x396   : > { %v6069_v34 = vpop.f32.mrf.mxu1  ;;  %v9106_v31 = vpop.f32.mrf.mxu0 }
 0x397   : > { %v4879_v14 = vadd.f32 %v6068_v51, %v8933_v53 }
 0x398   : > { %v6070_v36 = vpop.f32.mrf.mxu1  ;;  %v9110_v44 = vpop.f32.mrf.mxu0 }
 0x399   : > { %v6071_v45 = vadd.f32 %v6070_v36, %v6069_v34  ;;  %v9108_v21 = vadd.f32 %v6180_v24, %v4879_v14 }
 0x39a   : > { %v6072_v5 = vpop.f32.mrf.mxu1  ;;  %v9115_v32 = vpop.f32.mrf.mxu0 }
 0x39b   : > { %v9113_v25 = vadd.f32 %v6071_v45, %v8943_v8 }
 0x39c   : > { %v6073_v12 = vpop.f32.mrf.mxu1  ;;  %v9117_v10 = vpop.f32.mrf.mxu0 }
 0x39d   : > { %v6074_v38 = vadd.f32 %v6073_v12, %v6072_v5 }
 0x39e   : > { %v6075_v58 = vpop.f32.mrf.mxu1  ;;  %v9122_v6 = vpop.f32.mrf.mxu0 }
 0x39f   : > { %v9120_v53 = vadd.f32 %v6074_v38, %v8946_v60 }
 0x3a0   : > { %v6076_v33 = vpop.f32.mrf.mxu1  ;;  %v9124_v51 = vpop.f32.mrf.mxu0 }
 0x3a1   : > { %v6077_v49 = vadd.f32 %v6076_v33, %v6075_v58 }
 0x3a2   : > { %v6078_v41 = vpop.f32.mrf.mxu1  ;;  %v9129_v34 = vpop.f32.mrf.mxu0 }
 0x3a3   : > { %v9127_v8 = vadd.f32 %v6077_v49, %v8953_v59 }
 0x3a4   : > { %v6079_v24 = vpop.f32.mrf.mxu1  ;;  %v9131_v45 = vpop.f32.mrf.mxu0 }
 0x3a5   : > { %v6080_v14 = vadd.f32 %v6079_v24, %v6078_v41 }
 0x3a6   : > { %v6081_v36 = vpop.f32.mrf.mxu1  ;;  %v9136_v12 = vpop.f32.mrf.mxu0 }
 0x3a7   : > { %v9134_v60 = vadd.f32 %v6080_v14, %v8960_v23 }
 0x3a8   : > { %v6082_v5 = vpop.f32.mrf.mxu1  ;;  %v9138_v33 = vpop.f32.mrf.mxu0 }
 0x3a9   : > { %v6083_v38 = vadd.f32 %v6082_v5, %v6081_v36 }
 0x3aa   : > { %v6084_v58 = vpop.f32.mrf.mxu1  ;;  %v9143_v48 = vpop.f32.mrf.mxu0 }
 0x3ab   : > { %v9141_v59 = vadd.f32 %v6083_v38, %v8963_v52 }
 0x3ac   : > { %v6085_v49 = vpop.f32.mrf.mxu1  ;;  %v9145_v13 = vpop.f32.mrf.mxu0 }
 0x3ad   : > { %v6086_v41 = vadd.f32 %v6085_v49, %v6084_v58 }
 0x3ae   : > { %v6087_v24 = vpop.f32.mrf.mxu1  ;;  %v9150_v28 = vpop.f32.mrf.mxu0 }
 0x3af   : > { %v9148_v23 = vadd.f32 %v6086_v41, %v8970_v54 }
 0x3b0   : > { %v6088_v14 = vpop.f32.mrf.mxu1  ;;  %v9152_v9 = vpop.f32.mrf.mxu0 }
 0x3b1   : > { %v6089_v36 = vadd.f32 %v6088_v14, %v6087_v24 }
 0x3b2   : > { %v6090_v5 = vpop.f32.mrf.mxu1  ;;  %v9157_v37 = vpop.f32.mrf.mxu0 }
 0x3b3   : > { %v9155_v52 = vadd.f32 %v6089_v36, %v8977_v50 }
 0x3b4   : > { %v6091_v38 = vpop.f32.mrf.mxu1  ;;  %v9159_v35 = vpop.f32.mrf.mxu0 }
 0x3b5   : > { %9741 = vst [vmem:[#allocation29_spill] sm:$0xff] %v9155_v52  ;;  %v6092_v58 = vadd.f32 %v6091_v38, %v6090_v5 }
 0x3b6   : > { %v6093_v49 = vpop.f32.mrf.mxu1  ;;  %v9164_v47 = vpop.f32.mrf.mxu0 }
 0x3b7   : > { %v9162_v54 = vadd.f32 %v6092_v58, %v8980_v57 }
 0x3b8   : > { %v6094_v41 = vpop.f32.mrf.mxu1  ;;  %v9166_v11 = vpop.f32.mrf.mxu0 }
 0x3b9   : > { %9742 = vst [vmem:[#allocation30_spill] sm:$0xff] %v9162_v54  ;;  %v6095_v24 = vadd.f32 %v6094_v41, %v6093_v49 }
 0x3ba   : > { %v6096_v14 = vpop.f32.mrf.mxu1  ;;  %v9171_v1 = vpop.f32.mrf.mxu0 }
 0x3bb   : > { %v9169_v50 = vadd.f32 %v6095_v24, %v9002_v30 }
 0x3bc   : > { %v6097_v36 = vpop.f32.mrf.mxu1  ;;  %v9173_v15 = vpop.f32.mrf.mxu0 }
 0x3bd   : > { %v6098_v5 = vadd.f32 %v6097_v36, %v6096_v14  ;;  %9743 = vst [vmem:[#allocation32_spill] sm:$0xff] %v9173_v15 }
 0x3be   : > { %v6099_v38 = vpop.f32.mrf.mxu1  ;;  %v9178_v4 = vpop.f32.mrf.mxu0 }
 0x3bf   : > { %v9176_v57 = vadd.f32 %v6098_v5, %v9007_v61  ;;  %9744 = vst [vmem:[#allocation33_spill] sm:$0xff] %v9178_v4 }
 0x3c0   : > { %v6100_v58 = vpop.f32.mrf.mxu1  ;;  %v9180_v62 = vpop.f32.mrf.mxu0 }
 0x3c1   : > { %v6101_v49 = vadd.f32 %v6100_v58, %v6099_v38  ;;  %9745 = vst [vmem:[#allocation34_spill] sm:$0xff] %v9180_v62 }
 0x3c2   : > { %v6102_v41 = vpop.f32.mrf.mxu1  ;;  %v9185_v54 = vpop.f32.mrf.mxu0 }
 0x3c3   : > { %v9183_v30 = vadd.f32 %v6101_v49, %v9022_v7  ;;  %9747 = vst [vmem:[#allocation81_spill] sm:$0xff] %v9185_v54 }
 0x3c4   : > { %v6103_v24 = vpop.f32.mrf.mxu1  ;;  %v9187_v52 = vpop.f32.mrf.mxu0 }
 0x3c5   : > { %9746 = vst [vmem:[#allocation15_spill] sm:$0xff] %v9183_v30  ;;  %v6104_v14 = vadd.f32 %v6103_v24, %v6102_v41 }
 0x3c6   : > { %v6105_v36 = vpop.f32.mrf.mxu1  ;;  %v9192_v15 = vpop.f32.mrf.mxu0 }
 0x3c7   : > { %v9190_v61 = vadd.f32 %v6104_v14, %v9025_v43 }
 0x3c8   : > { %v6106_v5 = vpop.f32.mrf.mxu1  ;;  %v9194_v4 = vpop.f32.mrf.mxu0 }
 0x3c9   : > { %9748 = vst [vmem:[#allocation82_spill] sm:$0xff] %v9190_v61  ;;  %v6107_v38 = vadd.f32 %v6106_v5, %v6105_v36 }
 0x3ca   : > { %v6108_v58 = vpop.f32.mrf.mxu1  ;;  %v9199_v30 = vpop.f32.mrf.mxu0 }
 0x3cb   : > { %v9197_v7 = vadd.f32 %v6107_v38, %v9030_v39  ;;  %9750 = vst [vmem:[#allocation84_spill] sm:$0xff] %v9199_v30 }
 0x3cc   : > { %v6109_v49 = vpop.f32.mrf.mxu1  ;;  %v9201_v54 = vpop.f32.mrf.mxu0 }
 0x3cd   : > { %9749 = vst [vmem:[#allocation83_spill] sm:$0xff] %v9197_v7  ;;  %v6110_v41 = vadd.f32 %v6109_v49, %v6108_v58  ;;  %9751 = vst [vmem:[#allocation85_spill] sm:$0xff] %v9201_v54 }
 0x3ce   : > { %v6111_v24 = vpop.f32.mrf.mxu1  ;;  %v9206_v61 = vpop.f32.mrf.mxu0 }
 0x3cf   : > { %v9204_v43 = vadd.f32 %v6110_v41, %v9035_v26  ;;  %9752 = vst [vmem:[#allocation86_spill] sm:$0xff] %v9206_v61 }
 0x3d0   : > { %v6112_v14 = vpop.f32.mrf.mxu1  ;;  %v9208_v62 = vpop.f32.mrf.mxu0 }
 0x3d1   : > { %v6113_v36 = vadd.f32 %v6112_v14, %v6111_v24  ;;  %9753 = vst [vmem:[#allocation87_spill] sm:$0xff] %v9208_v62 }
 0x3d2   : > { %v6114_v5 = vpop.f32.mrf.mxu1  ;;  %v9213_v7 = vpop.f32.mrf.mxu0 }
 0x3d3   : > { %v9211_v39 = vadd.f32 %v6113_v36, %v9038_v27  ;;  %9755 = vst [vmem:[#allocation89_spill] sm:$0xff] %v9213_v7 }
 0x3d4   : > { %v6115_v38 = vpop.f32.mrf.mxu1  ;;  %v9215_v30 = vpop.f32.mrf.mxu0 }
 0x3d5   : > { %9754 = vst [vmem:[#allocation88_spill] sm:$0xff] %v9211_v39  ;;  %v6116_v58 = vadd.f32 %v6115_v38, %v6114_v5 }
 0x3d6   : > { %v6117_v49 = vpop.f32.mrf.mxu1  ;;  %v9220_v61 = vpop.f32.mrf.mxu0 }
 0x3d7   : > { %v9218_v26 = vadd.f32 %v6116_v58, %v9043_v0 }
 0x3d8   : > { %v6118_v41 = vpop.f32.mrf.mxu1  ;;  %v9225_v36 = vpop.f32.mrf.mxu0 }
 0x3d9   : > { %9756 = vst [vmem:[#allocation90_spill] sm:$0xff] %v9218_v26  ;;  %v6119_v54 = vadd.f32 %v6118_v41, %v6117_v49 }
 0x3da   : > { %v6120_v24 = vpop.f32.mrf.mxu1  ;;  %v9230_v62 = vpop.f32.mrf.mxu0 }
 0x3db   : > { %v9223_v14 = vadd.f32 %v6119_v54, %v9046_v63 }
 0x3dc   : > { %v6121_v27 = vpop.f32.mrf.mxu1  ;;  %v9235_v26 = vpop.f32.mrf.mxu0 }
 0x3dd   : > { %9757 = vst [vmem:[#allocation91_spill] sm:$0xff] %v9223_v14  ;;  %v6122_v39 = vadd.f32 %v6121_v27, %v6120_v24 }
 0x3de   : > { %v6123_v7 = vpop.f32.mrf.mxu1  ;;  %v9240_v27 = vpop.f32.mrf.mxu0 }
 0x3df   : > { %v9228_v5 = vadd.f32 %v6122_v39, %v9051_v17 }
 0x3e0   : > { %v6124_v38 = vpop.f32.mrf.mxu1 }
 0x3e1   : > { %9758 = vst [vmem:[#allocation92_spill] sm:$0xff] %v9228_v5  ;;  %v6125_v0 = vadd.f32 %v6124_v38, %v6123_v7  ;;  %v9245_v38 = vpop.f32.mrf.mxu0 }
 0x3e2   : > { %v6126_v58 = vpop.f32.mrf.mxu1  ;;  %9761 = vst [vmem:[#allocation95_spill] sm:$0xff] %v9245_v38 }
 0x3e3   : > { %v9233_v49 = vadd.f32 %v6125_v0, %v9054_v16 }
 0x3e4   : > { %v6127_v41 = vpop.f32.mrf.mxu1 }
 0x3e5   : > { %9759 = vst [vmem:[#allocation93_spill] sm:$0xff] %v9233_v49  ;;  %v6128_v63 = vadd.f32 %v6127_v41, %v6126_v58  ;;  %v9250_v41 = vpop.f32.mrf.mxu0 }
 0x3e6   : > { %v6129_v54 = vpop.f32.mrf.mxu1 }
 0x3e7   : > { %v9238_v14 = vadd.f32 %v6128_v63, %v9059_v42 }
 0x3e8   : > { %v6130_v24 = vpop.f32.mrf.mxu1 }
 0x3e9   : > { %9760 = vst [vmem:[#allocation94_spill] sm:$0xff] %v9238_v14  ;;  %v6131_v17 = vadd.f32 %v6130_v24, %v6129_v54  ;;  %v9255_v24 = vpop.f32.mrf.mxu0 }
 0x3ea   : > { %v6132_v39 = vpop.f32.mrf.mxu1 }
 0x3eb   : > { %v9243_v5 = vadd.f32 %v6131_v17, %v9062_v40 }
 0x3ec   : > { %v6133_v7 = vpop.f32.mrf.mxu1 }
 0x3ed   : > { %v6134_v16 = vadd.f32 %v6133_v7, %v6132_v39  ;;  %v9260_v7 = vpop.f32.mrf.mxu0 }
 0x3ee   : > { %v6135_v0 = vpop.f32.mrf.mxu1 }
 0x3ef   : > { %v9248_v49 = vadd.f32 %v6134_v16, %v9067_v20 }
 0x3f0   : > { %v6136_v58 = vpop.f32.mrf.mxu1 }
 0x3f1   : > { %9762 = vst [vmem:[#allocation96_spill] sm:$0xff] %v9248_v49  ;;  %v6137_v42 = vadd.f32 %v6136_v58, %v6135_v0  ;;  %v9265_v58 = vpop.f32.mrf.mxu0 }
 0x3f2   : > { %v6138_v63 = vpop.f32.mrf.mxu1 }
 0x3f3   : > { %v9253_v14 = vadd.f32 %v6137_v42, %v9070_v2 }
 0x3f4   : > { %v6139_v54 = vpop.f32.mrf.mxu1 }
 0x3f5   : > { %9763 = vst [vmem:[#allocation97_spill] sm:$0xff] %v9253_v14  ;;  %v6140_v40 = vadd.f32 %v6139_v54, %v6138_v63 }
 0x3f6   : > { %v6141_v17 = vpop.f32.mrf.mxu1 }
 0x3f7   : > { %v9258_v38 = vadd.f32 %v6140_v40, %v9075_v3  ;;  %v9270_v3 = vpop.f32.mrf.mxu0 }
 0x3f8   : > { %v6142_v39 = vpop.f32.mrf.mxu1 }
 0x3f9   : > { %9764 = vst [vmem:[#allocation98_spill] sm:$0xff] %v9258_v38  ;;  %v6143_v20 = vadd.f32 %v6142_v39, %v6141_v17 }
 0x3fa   : > { %v6144_v16 = vpop.f32.mrf.mxu1 }
 0x3fb   : > { %v9263_v49 = vadd.f32 %v6143_v20, %v9078_v22  ;;  %v9275_v22 = vpop.f32.mrf.mxu0 }
 0x3fc   : > { %v6145_v0 = vpop.f32.mrf.mxu1  ;;  %9768 = vst [vmem:[#allocation102_spill] sm:$0xff] %v9275_v22 }
 0x3fd   : > { %9765 = vst [vmem:[#allocation99_spill] sm:$0xff] %v9263_v49  ;;  %v6146_v2 = vadd.f32 %v6145_v0, %v6144_v16  ;;  %v6183_v0 = vadd.f32 %v9106_v31, %v9103_v19  ;;  %v9778_v31 = vld [vmem:[#allocation12_spill] sm:$0xff] }
 0x3fe   : > { %v6147_v42 = vpop.f32.mrf.mxu1 }
 0x3ff   : > { %v9268_v14 = vadd.f32 %v6146_v2, %v9085_v46  ;;  %v9286_v2 = vpop.f32.mrf.mxu0  ;;  %v5045_v19 = vadd.f32 %v6183_v0, %v9113_v25  ;;  %v6195_v25 = vadd.f32 %v9136_v12, %v9131_v45  ;;  %v6198_v12 = vadd.f32 %v9143_v48, %v9138_v33  ;;  %v9788_v33 = vld [vmem:[#allocation67_spill] sm:$0xff] }
 0x400   : > { %v6148_v63 = vpop.f32.mrf.mxu1  ;;  %9772 = vst [vmem:[#allocation106_spill] sm:$0xff] %v9286_v2  ;;  %v9785_v2 = vld [vmem:[#allocation41_spill] sm:$0xff] }
 0x401   : > { %9766 = vst [vmem:[#allocation100_spill] sm:$0xff] %v9268_v14  ;;  %v6149_v54 = vadd.f32 %v6148_v63, %v6147_v42  ;;  %v9775_v63 = vld [vmem:[#allocation28_spill] sm:$0xff] }
 0x402   : > { %v6150_v40 = vpop.f32.mrf.mxu1 }
 0x403   : > { %v9273_v17 = vadd.f32 %v6149_v54, %v9089_v18  ;;  %v9774_v18 = vld [vmem:[#allocation13_spill] sm:$0xff] }
 0x404   : > { %v6151_v39 = vpop.f32.mrf.mxu1  ;;  %v2320_v54 = vadd.f32 %v9775_v63, %v9774_v18 }
 0x405   : > { %9767 = vst [vmem:[#allocation101_spill] sm:$0xff] %v9273_v17  ;;  %v6152_v20 = vadd.f32 %v6151_v39, %v6150_v40  ;;  %v6186_v40 = vadd.f32 %v9115_v32, %v9110_v44  ;;  %v9302_v39 = vpop.f32.mrf.mxu0  ;;  %v9783_v44 = vld [vmem:[#allocation58_spill] sm:$0xff] }
 0x406   : > { %v9277_v38 = vpop.f32.mrf.mxu1  ;;  %9777 = vst [vmem:[#allocation28_spill] sm:$0xff] %v9302_v39 }
 0x407   : > { %9769 = vst [vmem:[#allocation103_spill] sm:$0xff] %v9277_v38  ;;  %v9280_v16 = vadd.f32 %v6152_v20, %v9092_v29  ;;  %v9298_v29 = vld [vmem:[%s9596_s5] ss:$0 sm:$0xff]  ;;  %v9779_v20 = vld [vmem:[#allocation22_spill] sm:$0xff]  ;;  %v9317_v0 = vpop.f32.mrf.mxu0 }
 0x408   : > { %v9282_v46 = vpop.f32.mrf.mxu1  ;;  %v2739_v48 = vadd.f32 %v9298_v29, %v8329_v55  ;;  %v5064_v55 = vadd.f32 %v6198_v12, %v9148_v23 }
 0x409   : > { %9770 = vst [vmem:[#allocation104_spill] sm:$0xff] %v9280_v16  ;;  %9771 = vst [vmem:[#allocation105_spill] sm:$0xff] %v9282_v46  ;;  %v2310_v16 = vadd.f32 %v9779_v20, %v9778_v31  ;;  %v9782_v46 = vld [vmem:[#allocation57_spill] sm:$0xff] }
 0x40a   : > { %v9288_v42 = vpop.f32.mrf.mxu1  ;;  %v2733_v38 = vadd.f32 %v9298_v29, %v9782_v46 }
 0x40b   : > { %9773 = vst [vmem:[#allocation107_spill] sm:$0xff] %v9288_v42  ;;  %v9780_v42 = vld [vmem:[#allocation63_spill] sm:$0xff]  ;;  %v2503_v32 = vadd.f32 %v9783_v44, %v2310_v16 }
 0x40c   : > { %v9292_v17 = vpop.f32.mrf.mxu1  ;;  %v2513_v18 = vadd.f32 %v9780_v42, %v2320_v54  ;;  %v5048_v54 = vadd.f32 %v6186_v40, %v9120_v53  ;;  %v9784_v44 = vld [vmem:[#allocation11_spill] sm:$0xff] }
 0x40d   : > { %9776 = vst [vmem:[#allocation13_spill] sm:$0xff] %v9292_v17  ;;  %v9781_v17 = vld [vmem:[#allocation61_spill] sm:$0xff]  ;;  %v2340_v22 = vadd.f32 %v9785_v2, %v9784_v44  ;;  %v2734_v45 = vadd.f32 %v9298_v29, %v2503_v32  ;;  %v9787_v2 = vld [vmem:[#allocation35_spill] sm:$0xff] }
 0x40e   : > { %v6313_v63 = vpop.f32.mrf.mxu1  ;;  %v2735_v14 = vadd.f32 %v9298_v29, %v9781_v17  ;;  %v2736_v17 = vadd.f32 %v9298_v29, %v2513_v18  ;;  %v6192_v18 = vadd.f32 %v9129_v34, %v9124_v51 }
 0x40f   : > { %v5206_v49 = vadd.f32 %v6313_v63, %v5045_v19  ;;  %v6189_v19 = vadd.f32 %v9122_v6, %v9117_v10 }
 0x410   : > { %v5197_v39 = vpop.f32.mrf.mxu1  ;;  %v5056_v44 = vadd.f32 %v6192_v18, %v9134_v60 }
 0x411   : > { %v5326_v31 = vadd.f32 %v5206_v49, %v2735_v14  ;;  %v5198_v42 = vadd.f32 %v5197_v39, %v9101_v56  ;;  %v9329_v14 = vpop.f32.mrf.mxu0  ;;  %v5061_v49 = vadd.f32 %v6195_v25, %v9141_v59  ;;  %v2533_v39 = vadd.f32 %v9788_v33, %v2340_v22  ;;  %v9789_v59 = vld [vmem:[#allocation10_spill] sm:$0xff] }
 0x412   : > { %v6314_v20 = vpop.f32.mrf.mxu1  ;;  %v2737_v25 = vadd.f32 %v9298_v29, %v9789_v59  ;;  %v6207_v22 = vadd.f32 %v9164_v47, %v9159_v35  ;;  %v9791_v35 = vld [vmem:[#allocation17_spill] sm:$0xff]  ;;  %v9792_v47 = vld [vmem:[#allocation51_spill] sm:$0xff] }
 0x413   : > { %v5358_v46 = vmax.f32 %v5326_v31, 0.0  ;;  %v5324_v63 = vadd.f32 %v5198_v42, %v2733_v38  ;;  %v5209_v16 = vadd.f32 %v6314_v20, %v5048_v54  ;;  %v9786_v38 = vld [vmem:[#allocation14_spill] sm:$0xff]  ;;  %v9351_v51 = vpop.f32.mrf.mxu0  ;;  %v9797_v59 = vld [vmem:[#allocation29_spill] sm:$0xff] }
 0x414   : > { %v5200_v56 = vpop.f32.mrf.mxu1  ;;  %v2330_v40 = vadd.f32 %v9787_v2, %v9786_v38 }
 0x415   : > { %5390 = vst [vmem:[%s9331_s29 + $0x10] sm:$0xff] %v5358_v46  ;;  %v5356_v10 = vmax.f32 %v5324_v63, 0.0  ;;  %v5327_v53 = vadd.f32 %v5209_v16, %v2736_v17  ;;  %v5201_v6 = vadd.f32 %v5200_v56, %v9108_v21  ;;  %v5053_v21 = vadd.f32 %v6189_v19, %v9127_v8  ;;  %v9790_v17 = vld [vmem:[#allocation65_spill] sm:$0xff]  ;;  %v9364_v38 = vpop.f32.mrf.mxu0 }
 0x416   : > { %v6317_v32 = vpop.f32.mrf.mxu1  ;;  %v2523_v20 = vadd.f32 %v9790_v17, %v2330_v40  ;;  %v2740_v8 = vadd.f32 %v9298_v29, %v2533_v39  ;;  %v9793_v40 = vld [vmem:[#allocation16_spill] sm:$0xff] }
 0x417   : > { %5388 = vst [vmem:[%s9331_s29] sm:$0xff] %v5356_v10  ;;  %v5359_v31 = vmax.f32 %v5327_v53, 0.0  ;;  %v5325_v42 = vadd.f32 %v5201_v6, %v2734_v45  ;;  %v5222_v54 = vadd.f32 %v6317_v32, %v5061_v49  ;;  %v6201_v45 = vadd.f32 %v9150_v28, %v9145_v13  ;;  %v9795_v39 = vld [vmem:[#allocation72_spill] sm:$0xff]  ;;  %v9796_v32 = vld [vmem:[#allocation73_spill] sm:$0xff] }
 0x418   : > { %v5213_v46 = vpop.f32.mrf.mxu1  ;;  %v2360_v10 = vadd.f32 %v9792_v47, %v9791_v35  ;;  %v2738_v53 = vadd.f32 %v9298_v29, %v2523_v20  ;;  %v6210_v6 = vadd.f32 %v9171_v1, %v9166_v11  ;;  %v5077_v13 = vadd.f32 %v6207_v22, %v9169_v50  ;;  %v9799_v20 = vld [vmem:[#allocation70_spill] sm:$0xff] }
 0x419   : > { %5391 = vst [vmem:[%s9331_s29 + $0x18] sm:$0xff] %v5359_v31  ;;  %v5357_v34 = vmax.f32 %v5325_v42, 0.0  ;;  %v5330_v63 = vadd.f32 %v5222_v54, %v2739_v48  ;;  %v5214_v16 = vadd.f32 %v5213_v46, %v5053_v21  ;;  %v9794_v48 = vld [vmem:[#allocation46_spill] sm:$0xff]  ;;  %v2743_v18 = vadd.f32 %v9298_v29, %v9795_v39 }
 0x41a   : > { %v6318_v19 = vpop.f32.mrf.mxu1  ;;  %v2350_v33 = vadd.f32 %v9794_v48, %v9793_v40  ;;  %v2553_v31 = vadd.f32 %v9796_v32, %v2360_v10  ;;  %v6204_v1 = vadd.f32 %v9157_v37, %v9152_v9  ;;  %v5069_v50 = vadd.f32 %v6201_v45, %v9797_v59  ;;  %v9383_v37 = vpop.f32.mrf.mxu0  ;;  %v9806_v48 = vld [vmem:[#allocation83_spill] sm:$0xff]  ;;  %v9807_v39 = vld [vmem:[#allocation18_spill] sm:$0xff] }
 0x41b   : > { %5389 = vst [vmem:[%s9331_s29 + $0x8] sm:$0xff] %v5357_v34  ;;  %v5362_v23 = vmax.f32 %v5330_v63, 0.0  ;;  %v5328_v12 = vadd.f32 %v5214_v16, %v2737_v25  ;;  %v5225_v56 = vadd.f32 %v6318_v19, %v5064_v55  ;;  %v9798_v25 = vld [vmem:[#allocation69_spill] sm:$0xff]  ;;  %v5080_v22 = vadd.f32 %v6210_v6, %v9176_v57  ;;  %v9805_v6 = vld [vmem:[#allocation84_spill] sm:$0xff] }
 0x41c   : > { %v5216_v49 = vpop.f32.mrf.mxu1  ;;  %v2741_v17 = vadd.f32 %v9298_v29, %v9798_v25  ;;  %v2543_v46 = vadd.f32 %v9799_v20, %v2350_v33  ;;  %v6219_v34 = vadd.f32 %v9192_v15, %v9187_v52  ;;  %v9803_v15 = vld [vmem:[#allocation19_spill] sm:$0xff] }
 0x41d   : > { %5394 = vst [vmem:[%s9331_s29 + $0x30] sm:$0xff] %v5362_v23  ;;  %v5360_v60 = vmax.f32 %v5328_v12, 0.0  ;;  %v5331_v2 = vadd.f32 %v5225_v56, %v2740_v8  ;;  %v5217_v28 = vadd.f32 %v5216_v49, %v5056_v44  ;;  %v2744_v8 = vadd.f32 %v9298_v29, %v2553_v31  ;;  %v9800_v44 = vld [vmem:[#allocation30_spill] sm:$0xff]  ;;  %v9801_v23 = vld [vmem:[#allocation32_spill] sm:$0xff]  ;;  %v9802_v12 = vld [vmem:[#allocation33_spill] sm:$0xff] }
 0x41e   : > { %v6321_v11 = vpop.f32.mrf.mxu1  ;;  %v5072_v45 = vadd.f32 %v6204_v1, %v9800_v44  ;;  %v6213_v56 = vadd.f32 %v9802_v12, %v9801_v23  ;;  %v9804_v52 = vld [vmem:[#allocation59_spill] sm:$0xff]  ;;  %v6222_v49 = vadd.f32 %v9805_v6, %v9194_v4  ;;  %v5093_v33 = vadd.f32 %v6219_v34, %v9806_v48  ;;  %v9809_v31 = vld [vmem:[#allocation80_spill] sm:$0xff]  ;;  %v9812_v4 = vld [vmem:[#allocation81_spill] sm:$0xff] }
 0x41f   : > { %5392 = vst [vmem:[%s9331_s29 + $0x20] sm:$0xff] %v5360_v60  ;;  %v5363_v42 = vmax.f32 %v5331_v2, 0.0  ;;  %v5329_v54 = vadd.f32 %v5217_v28, %v2738_v53  ;;  %v5238_v21 = vadd.f32 %v6321_v11, %v5077_v13  ;;  %v2380_v10 = vadd.f32 %v9804_v52, %v9803_v15  ;;  %v9396_v2 = vpop.f32.mrf.mxu0  ;;  %v9810_v11 = vld [vmem:[#allocation79_spill] sm:$0xff]  ;;  %v9818_v15 = vld [vmem:[#allocation86_spill] sm:$0xff] }
 0x420   : > { %v5229_v55 = vpop.f32.mrf.mxu1  ;;  %v2742_v53 = vadd.f32 %v9298_v29, %v2543_v46  ;;  %v2747_v1 = vadd.f32 %v9298_v29, %v9809_v31  ;;  %v9813_v20 = vld [vmem:[#allocation15_spill] sm:$0xff]  ;;  %v9823_v31 = vld [vmem:[#allocation64_spill] sm:$0xff] }
 0x421   : > { %5395 = vst [vmem:[%s9331_s29 + $0x38] sm:$0xff] %v5363_v42  ;;  %v5361_v9 = vmax.f32 %v5329_v54, 0.0  ;;  %v5334_v63 = vadd.f32 %v5238_v21, %v2743_v18  ;;  %v5230_v16 = vadd.f32 %v5229_v55, %v5069_v50  ;;  %v9808_v18 = vld [vmem:[#allocation56_spill] sm:$0xff]  ;;  %v2573_v42 = vadd.f32 %v9810_v11, %v2380_v10  ;;  %v9811_v54 = vld [vmem:[#allocation34_spill] sm:$0xff]  ;;  %v9814_v55 = vld [vmem:[#allocation77_spill] sm:$0xff] }
 0x422   : > { %v6322_v19 = vpop.f32.mrf.mxu1  ;;  %v2370_v32 = vadd.f32 %v9808_v18, %v9807_v39  ;;  %v6216_v21 = vadd.f32 %v9812_v4, %v9811_v54  ;;  %v5085_v46 = vadd.f32 %v6213_v56, %v9813_v20  ;;  %v9815_v34 = vld [vmem:[#allocation75_spill] sm:$0xff]  ;;  %v9824_v11 = vld [vmem:[#allocation44_spill] sm:$0xff] }
 0x423   : > { %5393 = vst [vmem:[%s9331_s29 + $0x28] sm:$0xff] %v5361_v9  ;;  %v5366_v57 = vmax.f32 %v5334_v63, 0.0  ;;  %v5332_v35 = vadd.f32 %v5230_v16, %v2741_v17  ;;  %v5241_v47 = vadd.f32 %v6322_v19, %v5080_v22  ;;  %v2745_v22 = vadd.f32 %v9298_v29, %v9814_v55  ;;  %v9415_v19 = vpop.f32.mrf.mxu0  ;;  %v9821_v39 = vld [vmem:[#allocation91_spill] sm:$0xff]  ;;  %v9828_v20 = vld [vmem:[#allocation88_spill] sm:$0xff] }
 0x424   : > { %v5232_v60 = vpop.f32.mrf.mxu1  ;;  %v2563_v9 = vadd.f32 %v9815_v34, %v2370_v32  ;;  %v5096_v16 = vadd.f32 %v6222_v49, %v9204_v43  ;;  %v2748_v12 = vadd.f32 %v9298_v29, %v2573_v42  ;;  %v9822_v32 = vld [vmem:[#allocation21_spill] sm:$0xff]  ;;  %v2751_v42 = vadd.f32 %v9298_v29, %v9824_v11  ;;  %v9825_v54 = vld [vmem:[#allocation43_spill] sm:$0xff]  ;;  %v9829_v55 = vld [vmem:[#allocation20_spill] sm:$0xff] }
 0x425   : > { %5398 = vst [vmem:[%s9331_s29 + $0x50] sm:$0xff] %v5366_v57  ;;  %v5364_v28 = vmax.f32 %v5332_v35, 0.0  ;;  %v5335_v13 = vadd.f32 %v5241_v47, %v2744_v8  ;;  %v5233_v40 = vadd.f32 %v5232_v60, %v5072_v45  ;;  %v6231_v8 = vadd.f32 %v9220_v61, %v9215_v30  ;;  %v9816_v57 = vld [vmem:[#allocation82_spill] sm:$0xff]  ;;  %v9817_v47 = vld [vmem:[#allocation85_spill] sm:$0xff]  ;;  %v9839_v11 = vld [vmem:[#allocation95_spill] sm:$0xff] }
 0x426   : > { %v6325_v59 = vpop.f32.mrf.mxu1  ;;  %v5088_v35 = vadd.f32 %v6216_v21, %v9816_v57  ;;  %v6225_v52 = vadd.f32 %v9818_v15, %v9817_v47  ;;  %v9819_v30 = vld [vmem:[#allocation26_spill] sm:$0xff]  ;;  %v2746_v49 = vadd.f32 %v9298_v29, %v2563_v9  ;;  %v6234_v60 = vadd.f32 %v9230_v62, %v9225_v36  ;;  %v9826_v21 = vld [vmem:[#allocation87_spill] sm:$0xff]  ;;  %v9827_v62 = vld [vmem:[#allocation89_spill] sm:$0xff] }
 0x427   : > { %5396 = vst [vmem:[%s9331_s29 + $0x40] sm:$0xff] %v5364_v28  ;;  %v5367_v50 = vmax.f32 %v5335_v13, 0.0  ;;  %v5333_v25 = vadd.f32 %v5233_v40, %v2742_v53  ;;  %v5254_v17 = vadd.f32 %v6325_v59, %v5093_v33  ;;  %v9820_v61 = vld [vmem:[#allocation66_spill] sm:$0xff]  ;;  %v9428_v13 = vpop.f32.mrf.mxu0  ;;  %v5109_v18 = vadd.f32 %v6231_v8, %v9821_v39 }
 0x428   : > { %v5245_v63 = vpop.f32.mrf.mxu1  ;;  %v2400_v6 = vadd.f32 %v9820_v61, %v9819_v30  ;;  %v6228_v36 = vadd.f32 %v9827_v62, %v9826_v21  ;;  %v9830_v34 = vld [vmem:[#allocation38_spill] sm:$0xff]  ;;  %v9840_v21 = vld [vmem:[#allocation93_spill] sm:$0xff] }
 0x429   : > { %5399 = vst [vmem:[%s9331_s29 + $0x58] sm:$0xff] %v5367_v50  ;;  %v5365_v44 = vmax.f32 %v5333_v25, 0.0  ;;  %v5338_v45 = vadd.f32 %v5254_v17, %v2747_v1  ;;  %v5246_v23 = vadd.f32 %v5245_v63, %v5085_v46  ;;  %v2390_v1 = vadd.f32 %v9823_v31, %v9822_v32  ;;  %v9832_v47 = vld [vmem:[#allocation90_spill] sm:$0xff]  ;;  %v9838_v31 = vld [vmem:[#allocation53_spill] sm:$0xff] }
 0x42a   : > { %v6326_v56 = vpop.f32.mrf.mxu1  ;;  %v2593_v4 = vadd.f32 %v9825_v54, %v2400_v6  ;;  %v5101_v46 = vadd.f32 %v6225_v52, %v9828_v20  ;;  %v5104_v15 = vadd.f32 %v6228_v36, %v9832_v47  ;;  %v6237_v52 = vadd.f32 %v9240_v27, %v9235_v26  ;;  %v9835_v27 = vld [vmem:[#allocation31_spill] sm:$0xff] }
 0x42b   : > { %5397 = vst [vmem:[%s9331_s29 + $0x48] sm:$0xff] %v5365_v44  ;;  %v5370_v43 = vmax.f32 %v5338_v45, 0.0  ;;  %v5336_v10 = vadd.f32 %v5246_v23, %v2745_v22  ;;  %v5257_v53 = vadd.f32 %v6326_v56, %v5096_v16  ;;  %v2749_v22 = vadd.f32 %v9298_v29, %v9829_v55  ;;  %v9831_v16 = vld [vmem:[#allocation92_spill] sm:$0xff]  ;;  %v9447_v45 = vpop.f32.mrf.mxu0 }
 0x42c   : > { %v5248_v28 = vpop.f32.mrf.mxu1  ;;  %v2583_v9 = vadd.f32 %v9830_v34, %v2390_v1  ;;  %v5112_v8 = vadd.f32 %v6234_v60, %v9831_v16  ;;  %v6243_v44 = vadd.f32 %v9260_v7, %v9255_v24  ;;  %v2752_v57 = vadd.f32 %v9298_v29, %v2593_v4  ;;  %v9833_v24 = vld [vmem:[#allocation36_spill] sm:$0xff]  ;;  %v9834_v7 = vld [vmem:[#allocation71_spill] sm:$0xff] }
 0x42d   : > { %5402 = vst [vmem:[%s9331_s29 + $0x70] sm:$0xff] %v5370_v43  ;;  %v5368_v40 = vmax.f32 %v5336_v10, 0.0  ;;  %v5339_v48 = vadd.f32 %v5257_v53, %v2748_v12  ;;  %v5249_v33 = vadd.f32 %v5248_v28, %v5088_v35  ;;  %v2420_v30 = vadd.f32 %v9834_v7, %v9833_v24  ;;  %v6265_v60 = vpop.f32.mrf.mxu0  ;;  %v9851_v24 = vld [vmem:[#allocation103_spill] sm:$0xff]  ;;  %v9852_v7 = vld [vmem:[#allocation105_spill] sm:$0xff] }
 0x42e   : > { %v6329_v59 = vpop.f32.mrf.mxu1  ;;  %v2750_v61 = vadd.f32 %v9298_v29, %v2583_v9  ;;  %v6246_v6 = vadd.f32 %v9270_v3, %v9265_v58  ;;  %v5125_v26 = vadd.f32 %v6243_v44, %v9243_v5  ;;  %v6240_v58 = vadd.f32 %v9250_v41, %v9839_v11  ;;  %v9841_v5 = vld [vmem:[#allocation49_spill] sm:$0xff]  ;;  %v9844_v9 = vld [vmem:[#allocation40_spill] sm:$0xff] }
 0x42f   : > { %5400 = vst [vmem:[%s9331_s29 + $0x60] sm:$0xff] %v5368_v40  ;;  %v5371_v50 = vmax.f32 %v5339_v48, 0.0  ;;  %v5337_v25 = vadd.f32 %v5249_v33, %v2746_v49  ;;  %v5270_v17 = vadd.f32 %v6329_v59, %v5109_v18  ;;  %v9836_v33 = vld [vmem:[#allocation68_spill] sm:$0xff]  ;;  %v9837_v18 = vld [vmem:[#allocation25_spill] sm:$0xff]  ;;  %v2613_v1 = vadd.f32 %v9838_v31, %v2420_v30  ;;  %v6266_v41 = vpop.f32.mrf.mxu0 }
 0x430   : > { %v5261_v63 = vpop.f32.mrf.mxu1  ;;  %v2410_v39 = vadd.f32 %v9836_v33, %v9835_v27  ;;  %v2755_v32 = vadd.f32 %v9298_v29, %v9837_v18  ;;  %v5117_v62 = vadd.f32 %v6237_v52, %v9840_v21  ;;  %v2753_v36 = vadd.f32 %v9298_v29, %v9841_v5  ;;  %v9842_v59 = vld [vmem:[#allocation48_spill] sm:$0xff]  ;;  %v9854_v27 = vld [vmem:[#allocation62_spill] sm:$0xff] }
 0x431   : > { %5403 = vst [vmem:[%s9331_s29 + $0x78] sm:$0xff] %v5371_v50  ;;  %v5369_v23 = vmax.f32 %v5337_v25, 0.0  ;;  %v5342_v12 = vadd.f32 %v5270_v17, %v2751_v42  ;;  %v5262_v56 = vadd.f32 %v5261_v63, %v5101_v46  ;;  %v9843_v17 = vld [vmem:[#allocation96_spill] sm:$0xff]  ;;  %v6255_v46 = vadd.f32 %v9351_v51, %v9329_v14  ;;  %v9845_v63 = vld [vmem:[#allocation74_spill] sm:$0xff] }
 0x432   : > { %v6330_v35 = vpop.f32.mrf.mxu1  ;;  %v2603_v50 = vadd.f32 %v9842_v59, %v2410_v39  ;;  %v5128_v20 = vadd.f32 %v6246_v6, %v9843_v17  ;;  %v2430_v16 = vadd.f32 %v9845_v63, %v9844_v9  ;;  %v9850_v52 = vld [vmem:[#allocation76_spill] sm:$0xff]  ;;  %v6155_v30 = vadd.f32 %v9852_v7, %v9851_v24  ;;  %v6268_v6 = vpop.f32.mrf.mxu0  ;;  %v9855_v39 = vld [vmem:[#allocation23_spill] sm:$0xff] }
 0x433   : > { %5401 = vst [vmem:[%s9331_s29 + $0x68] sm:$0xff] %v5369_v23  ;;  %v5374_v43 = vmax.f32 %v5342_v12, 0.0  ;;  %v5340_v10 = vadd.f32 %v5262_v56, %v2749_v22  ;;  %v5273_v53 = vadd.f32 %v6330_v35, %v5112_v8  ;;  %v2756_v8 = vadd.f32 %v9298_v29, %v2613_v1  ;;  %v9846_v23 = vld [vmem:[#allocation94_spill] sm:$0xff]  ;;  %v9862_v17 = vld [vmem:[#allocation107_spill] sm:$0xff] }
 0x434   : > { %v5264_v49 = vpop.f32.mrf.mxu1  ;;  %v5120_v12 = vadd.f32 %v6240_v58, %v9846_v23  ;;  %v9847_v56 = vld [vmem:[#allocation102_spill] sm:$0xff]  ;;  %v2757_v33 = vadd.f32 %v9298_v29, %v9854_v27  ;;  %v2759_v18 = vadd.f32 %v9298_v29, %v9855_v39  ;;  %v9870_v7 = vld [vmem:[#allocation47_spill] sm:$0xff]  ;;  %v9872_v27 = vld [vmem:[#allocation101_spill] sm:$0xff] }
 0x435   : > { %5406 = vst [vmem:[%s9331_s29 + $0x90] sm:$0xff] %v5374_v43  ;;  %v5372_v28 = vmax.f32 %v5340_v10, 0.0  ;;  %v5343_v40 = vadd.f32 %v5273_v53, %v2752_v57  ;;  %v5265_v48 = vadd.f32 %v5264_v49, %v5104_v15  ;;  %v9848_v57 = vld [vmem:[#allocation106_spill] sm:$0xff]  ;;  %v9849_v15 = vld [vmem:[#allocation45_spill] sm:$0xff]  ;;  %v2754_v10 = vadd.f32 %v9298_v29, %v2603_v50  ;;  %v9861_v50 = vld [vmem:[#allocation100_spill] sm:$0xff] }
 0x436   : > { %v6333_v3 = vpop.f32.mrf.mxu1  ;;  %v6249_v35 = vadd.f32 %v9848_v57, %v9847_v56  ;;  %v2440_v43 = vadd.f32 %v9850_v52, %v9849_v15  ;;  %v6258_v53 = vadd.f32 %v9383_v37, %v9364_v38  ;;  %v9857_v37 = vld [vmem:[#allocation28_spill] sm:$0xff]  ;;  %v9867_v15 = vld [vmem:[#allocation27_spill] sm:$0xff] }
 0x437   : > { %5404 = vst [vmem:[%s9331_s29 + $0x80] sm:$0xff] %v5372_v28  ;;  %v5375_v42 = vmax.f32 %v5343_v40, 0.0  ;;  %v5341_v54 = vadd.f32 %v5265_v48, %v2750_v61  ;;  %v5286_v4 = vadd.f32 %v6333_v3, %v5125_v26  ;;  %v9853_v48 = vld [vmem:[#allocation99_spill] sm:$0xff]  ;;  %v6252_v31 = vadd.f32 %v9317_v0, %v9857_v37  ;;  %v6269_v0 = vpop.f32.mrf.mxu0  ;;  %v9866_v56 = vld [vmem:[#allocation60_spill] sm:$0xff] }
 0x438   : > { %v5277_v25 = vpop.f32.mrf.mxu1  ;;  %v5141_v26 = vadd.f32 %v6255_v46, %v9853_v48  ;;  %v9873_v39 = vld [vmem:[#allocation24_spill] sm:$0xff] }
 0x439   : > { %5407 = vst [vmem:[%s9331_s29 + $0x98] sm:$0xff] %v5375_v42  ;;  %v5373_v55 = vmax.f32 %v5341_v54, 0.0  ;;  %v5346_v22 = vadd.f32 %v5286_v4, %v2755_v32  ;;  %v5278_v34 = vadd.f32 %v5277_v25, %v5117_v62  ;;  %v9856_v32 = vld [vmem:[#allocation39_spill] sm:$0xff]  ;;  %v9858_v42 = vld [vmem:[#allocation97_spill] sm:$0xff]  ;;  %v9860_v62 = vld [vmem:[#allocation54_spill] sm:$0xff]  ;;  %v5144_v25 = vadd.f32 %v6258_v53, %v9861_v50 }
 0x43a   : > { %v6334_v44 = vpop.f32.mrf.mxu1  ;;  %v2633_v38 = vadd.f32 %v9856_v32, %v2440_v43  ;;  %v5133_v54 = vadd.f32 %v6249_v35, %v9858_v42  ;;  %v9859_v4 = vld [vmem:[#allocation37_spill] sm:$0xff]  ;;  %v4996_v5 = vadd.f32 %v6155_v30, %v9860_v62  ;;  %v9869_v53 = vld [vmem:[#allocation78_spill] sm:$0xff]  ;;  %v2763_v30 = vadd.f32 %v9298_v29, %v9870_v7 }
 0x43b   : > { %5405 = vst [vmem:[%s9331_s29 + $0x88] sm:$0xff] %v5373_v55  ;;  %v5378_v47 = vmax.f32 %v5346_v22, 0.0  ;;  %v5344_v14 = vadd.f32 %v5278_v34, %v2753_v36  ;;  %v5289_v51 = vadd.f32 %v6334_v44, %v5128_v20  ;;  %v2623_v21 = vadd.f32 %v9859_v4, %v2430_v16  ;;  %v9863_v20 = vld [vmem:[#allocation13_spill] sm:$0xff]  ;;  %v9874_v32 = vld [vmem:[#allocation42_spill] sm:$0xff]  ;;  %v9875_v4 = vld [vmem:[#allocation104_spill] sm:$0xff] }
 0x43c   : > { %v5280_v61 = vpop.f32.mrf.mxu1  ;;  %v6267_v36 = vadd.f32 %v6266_v41, %v6265_v60  ;;  %v6158_v46 = vadd.f32 %v9863_v20, %v9862_v17  ;;  %v2760_v9 = vadd.f32 %v9298_v29, %v2633_v38  ;;  %v6261_v60 = vadd.f32 %v9415_v19, %v9396_v2  ;;  %v9868_v19 = vld [vmem:[#allocation50_spill] sm:$0xff] }
 0x43d   : > { %5410 = vst [vmem:[%s9331_s29 + $0xb0] sm:$0xff] %v5378_v47  ;;  %v5376_v49 = vmax.f32 %v5344_v14, 0.0  ;;  %v5347_v28 = vadd.f32 %v5289_v51, %v2756_v8  ;;  %v5281_v40 = vadd.f32 %v5280_v61, %v5120_v12  ;;  %v9864_v8 = vld [vmem:[#allocation98_spill] sm:$0xff]  ;;  %v9865_v12 = vld [vmem:[#allocation55_spill] sm:$0xff]  ;;  %v2758_v35 = vadd.f32 %v9298_v29, %v2623_v21  ;;  %v9871_v61 = vld [vmem:[#allocation52_spill] sm:$0xff] }
 0x43e   : > { %v6337_v1 = vpop.f32.mrf.mxu1  ;;  %v5136_v16 = vadd.f32 %v6252_v31, %v9864_v8  ;;  %v2460_v57 = vadd.f32 %v9866_v56, %v9865_v12  ;;  %v6270_v47 = vadd.f32 %v6269_v0, %v6268_v6  ;;  %v5157_v51 = vadd.f32 %v6267_v36, %v4996_v5 }
 0x43f   : > { %5408 = vst [vmem:[%s9331_s29 + $0xa0] sm:$0xff] %v5376_v49  ;;  %v5379_v11 = vmax.f32 %v5347_v28, 0.0  ;;  %v5345_v58 = vadd.f32 %v5281_v40, %v2754_v10  ;;  %v5302_v3 = vadd.f32 %v6337_v1, %v5141_v26  ;;  %v4999_v52 = vadd.f32 %v6158_v46, %v9867_v15 }
 0x440   : > { %v5293_v59 = vpop.f32.mrf.mxu1  ;;  %v2450_v24 = vadd.f32 %v9869_v53, %v9868_v19  ;;  %v2653_v49 = vadd.f32 %v9871_v61, %v2460_v57  ;;  %v6264_v6 = vadd.f32 %v9447_v45, %v9428_v13 }
 0x441   : > { %5411 = vst [vmem:[%s9331_s29 + $0xb8] sm:$0xff] %v5379_v11  ;;  %v5377_v55 = vmax.f32 %v5345_v58, 0.0  ;;  %v5350_v22 = vadd.f32 %v5302_v3, %v2759_v18  ;;  %v5294_v34 = vadd.f32 %v5293_v59, %v5133_v54  ;;  %v2761_v18 = vadd.f32 %v9298_v29, %v9873_v39 }
 0x442   : > { %v6338_v63 = vpop.f32.mrf.mxu1  ;;  %v2643_v38 = vadd.f32 %v9874_v32, %v2450_v24  ;;  %v5160_v45 = vadd.f32 %v6270_v47, %v4999_v52  ;;  %v2764_v11 = vadd.f32 %v9298_v29, %v2653_v49  ;;  %v5152_v21 = vadd.f32 %v6264_v6, %v9875_v4 }
 0x443   : > { %5409 = vst [vmem:[%s9331_s29 + $0xa8] sm:$0xff] %v5377_v55  ;;  %v5382_v41 = vmax.f32 %v5350_v22, 0.0  ;;  %v5348_v44 = vadd.f32 %v5294_v34, %v2757_v33  ;;  %v5305_v23 = vadd.f32 %v6338_v63, %v5144_v25  ;;  %v5149_v33 = vadd.f32 %v6261_v60, %v9872_v27 }
 0x444   : > { %v5296_v14 = vpop.f32.mrf.mxu1  ;;  %v2762_v5 = vadd.f32 %v9298_v29, %v2643_v38 }
 0x445   : > { %5414 = vst [vmem:[%s9331_s29 + $0xd0] sm:$0xff] %v5382_v41  ;;  %v5380_v43 = vmax.f32 %v5348_v44, 0.0  ;;  %v5351_v10 = vadd.f32 %v5305_v23, %v2760_v9  ;;  %v5297_v2 = vadd.f32 %v5296_v14, %v5136_v16 }
 0x446   : > { %v6341_v28 = vpop.f32.mrf.mxu1 }
 0x447   : > { %5412 = vst [vmem:[%s9331_s29 + $0xc0] sm:$0xff] %v5380_v43  ;;  %v5383_v40 = vmax.f32 %v5351_v10, 0.0  ;;  %v5349_v48 = vadd.f32 %v5297_v2, %v2758_v35  ;;  %v5318_v26 = vadd.f32 %v6341_v28, %v5157_v51 }
 0x448   : > { %v5309_v37 = vpop.f32.mrf.mxu1 }
 0x449   : > { %5415 = vst [vmem:[%s9331_s29 + $0xd8] sm:$0xff] %v5383_v40  ;;  %v5381_v31 = vmax.f32 %v5349_v48, 0.0  ;;  %v5354_v1 = vadd.f32 %v5318_v26, %v2763_v30  ;;  %v5310_v13 = vadd.f32 %v5309_v37, %v5149_v33 }
 0x44a   : > { %v6342_v58 = vpop.f32.mrf.mxu1 }
 0x44b   : > { %5413 = vst [vmem:[%s9331_s29 + $0xc8] sm:$0xff] %v5381_v31  ;;  %v5386_v3 = vmax.f32 %v5354_v1, 0.0  ;;  %v5352_v42 = vadd.f32 %v5310_v13, %v2761_v18  ;;  %v5321_v54 = vadd.f32 %v6342_v58, %v5160_v45 }
 0x44c   : > { %v5312_v62 = vpop.f32.mrf.mxu1 }
 0x44d   : > { %5418 = vst [vmem:[%s9331_s29 + $0xf0] sm:$0xff] %v5386_v3  ;;  %v5384_v36 = vmax.f32 %v5352_v42, 0.0  ;;  %v5355_v59 = vadd.f32 %v5321_v54, %v2764_v11  ;;  %v5313_v50 = vadd.f32 %v5312_v62, %v5152_v21 }
 0x44f   : > { %5416 = vst [vmem:[%s9331_s29 + $0xe0] sm:$0xff] %v5384_v36  ;;  %v5387_v25 = vmax.f32 %v5355_v59, 0.0  ;;  %v5353_v17 = vadd.f32 %v5313_v50, %v2762_v5 }
 0x451   : > { %5419 = vst [vmem:[%s9331_s29 + $0xf8] sm:$0xff] %v5387_v25  ;;  %v5385_v29 = vmax.f32 %v5353_v17, 0.0 }
 0x453   : > { %5417 = vst [vmem:[%s9331_s29 + $0xe8] sm:$0xff] %v5385_v29 }
 0x454   : > { %6723 = shalt.err (!%p6720_p0)
}
 0x455   : > { %s6724_s16 = scalar_lea.hbm %s9543_s28, 4096  ;;  %s6728_s19 = scalar_lea.hbm %s9597_s6, 8192 }
 0x456   : > { %p6725_p1 = scmp.ne.s32.totalorder %s9543_s28, %s6724_s16  ;;  %p6729_p4 = scmp.lt.s32.totalorder %s9543_s28, %s9597_s6 }
 0x457   : > { %p6730_p7 = scmp.lt.s32.totalorder %s6728_s19, %s6724_s16 }
 0x458   : > { %p6726_p2 = pnand %p6725_p1, %p6857_p5 }
 0x459   : > { %p6731_p8 = por %p6730_p7, %p6729_p4 }
 0x45a   : > { %p6727_p3 = pneg %p6726_p2 }
 0x45c   : > { %p6732_p6 = pnand %p6731_p8, %p6727_p3 }
 0x45e   : > { %6735 = shalt.err (!%p6732_p6)
}
 0x45f   : > { %s6782_s9 = smov 128   ;;  %s6783_s11 = smov 8  }
 0x460   : > { %6355 = dma.vmem_to_hbm [thread:$0]  (%p6857_p5), %s9545_s10, 4096, %s9543_s28, %s9551_s13, %s6782_s9, %s6782_s9, %s6783_s11  }
 0x461 PF: > { %p6367_p9 = scmp.ge.s32.totalorder %s6774_s24, 2  ;;  %s5449_s12 = sand.u32 1, %s6762_s21  }
 0x462   : > { %p9876_p10 = scmp.ne.s32.totalorder %s9605_s8, 0  ;;  %s5450_s25 = scalar_lea.sflag [#allocation6], %s5449_s12 }
 0x464   : > { %p6362_p11 = pnand %p6367_p9, %p9876_p10 }
 0x466   : > { %p6363_p12 = pneg %p6362_p11 }
 0x468   : > { %6757 = dma.done.wait (%p6363_p12), %s5450_s25, 4096  }
 0x469   : > { %6759 = vsyncadd (%p6363_p12), %s5450_s25, 4294963200  ;;  %p17_p13 = scmp.ge.s32.totalorder %s6844_s27, 4   ;;  %s9877_s21 = smov %s6766_s22 }
 0x46a   : > { %s9878_s22 = smov %s6770_s23  ;;  %s9879_s23 = smov %s6855_s30 }
 0x46b   : > { %s9880_s24 = smov %s6844_s27  ;;  %19 = sbr.rel (!%p17_p13) target bundleno = 4 (0x4), region = 88 }
 0x470   :  { %5455 = vsyncpa [#allocation5], 1 }
 0x471   :  { %5457 = vsyncpa [#allocation5 + $0x1], 1 }
 0x472   :  { %5458 = vsyncpa [#allocation6], 1 }
 0x473   :  { %5460 = vsyncpa [#allocation6 + $0x1], 1 }

</bundles_post_ra>
